<compile_context>
chip_gen: v6e
topology: v6e:2x2x1
jax: 0.10.0
libtpu: 0.0.40
codegen_flags: <defaults>
</compile_context>

<pallas_src>
import jax
import jax.numpy as jnp
from jax.experimental import pallas as pl
from jax.experimental.pallas import tpu as pltpu

# MLP dims (PyTorch Discriminator): 784 -> 1024 -> 512 -> 256 -> 1
_D_IN = 784
_D_H1, _D_H2, _D_H3 = 1024, 512, 256


def disc_kernel(x_ref, w1_ref, b1_ref, w2_ref, b2_ref,
                w3_ref, b3_ref, w4_ref, b4_ref, o_ref):
    """One batch tile: x (TB, 784) f32 -> sigmoid scores (TB, 1) f32."""
    # In-kernel bf16 cast of the activations (cheap VPU work, overlapped with DMA).
    x = x_ref[...].astype(jnp.bfloat16)

    # Layer 1: bf16 MXU matmul (K=784, Mosaic pads internally), f32 accumulate.
    h = jnp.dot(x, w1_ref[...], preferred_element_type=jnp.float32)
    h = jnp.maximum(h + b1_ref[...], 0.0)
    # TODO(synk): Dropout(0.5) is identity (eval-mode forward); training-mode
    # stochastic masking would need pltpu.prng_seed / prng_random_bits.

    # Layer 2
    h = jnp.dot(h.astype(jnp.bfloat16), w2_ref[...],
                preferred_element_type=jnp.float32)
    h = jnp.maximum(h + b2_ref[...], 0.0)

    # Layer 3
    h = jnp.dot(h.astype(jnp.bfloat16), w3_ref[...],
                preferred_element_type=jnp.float32)
    h = jnp.maximum(h + b3_ref[...], 0.0)

    # Layer 4 (out_features == 1): VPU multiply + cross-lane (XLU) reduce instead
    # of an N=1 MXU pass at the serialized tail; store the real (TB, 1) column
    # directly (no lane broadcast, 128x less writeback than a (TB,128) slab).
    w4 = w4_ref[...].astype(jnp.float32)                              # (1, 256)
    logits = jnp.sum(h * w4, axis=-1, keepdims=True) + b4_ref[...]    # (TB, 1)
    o_ref[...] = jax.nn.sigmoid(logits)


def _round_up(n, m):
    return ((n + m - 1) // m) * m


def _pick_tb(b):
    """Batch tile: tiny batches -> one small step; otherwise split into >=2 steps
    (v7x megacore), capped at 512 rows (amortizes per-step overhead, fits VMEM)."""
    if b <= 16:
        return _round_up(b, 8)
    half = _round_up((b + 1) // 2, 8)
    return min(512, half)


@jax.jit
def discriminator_forward(x, params):
    """x: (B, 1, 28, 28) float32 (NCHW). Returns (B, 1) sigmoid scores, f32."""
    b = x.shape[0]
    x2d = x.reshape(b, -1).astype(jnp.float32)
    assert x2d.shape[1] == _D_IN

    tb = _pick_tb(b)
    b_pad = _round_up(b, tb)
    if b_pad != b:
        # Batch-dim-only pad, and only when b doesn't divide the tile
        # (no extra pass over x for aligned batches).
        x2d = jnp.pad(x2d, ((0, b_pad - b), (0, 0)))

    w1, b1, w2, b2, w3, b3, w4, b4 = params
    w1c = w1.astype(jnp.bfloat16)                      # (784, 1024)
    w2c = w2.astype(jnp.bfloat16)                      # (1024, 512)
    w3c = w3.astype(jnp.bfloat16)                      # (512, 256)
    w4r = w4.reshape(1, _D_H3).astype(jnp.bfloat16)    # row layout for the VPU reduce

    operands = (x2d, w1c, b1, w2c, b2, w3c, b3, w4r, b4)

    def resident(shape):
        # Whole-array block + constant index map: stays VMEM-resident across grid
        # steps (Pallas skips the re-DMA when the block index is unchanged).
        return pl.BlockSpec(shape, lambda i: tuple(0 for _ in shape))

    grid = (b_pad // tb,)

    matmul_macs = _D_IN * _D_H1 + _D_H1 * _D_H2 + _D_H2 * _D_H3 + _D_H3
    weight_bytes = 2 * matmul_macs                      # bf16 weights
    bias_bytes = 4 * (_D_H1 + _D_H2 + _D_H3 + 1)        # f32 biases
    bytes_accessed = (b_pad * _D_IN * 4                 # f32 input (no pad/cast pass)
                      + weight_bytes + bias_bytes
                      + b_pad * 4)                      # f32 (B, 1) output

    out = pl.pallas_call(
        disc_kernel,
        out_shape=jax.ShapeDtypeStruct((b_pad, 1), jnp.float32),
        grid_spec=pltpu.PrefetchScalarGridSpec(
            num_scalar_prefetch=0,
            grid=grid,
            in_specs=[
                pl.BlockSpec((tb, _D_IN), lambda i: (i, 0)),  # x tiled over batch
                resident(w1c.shape), resident(b1.shape),
                resident(w2c.shape), resident(b2.shape),
                resident(w3c.shape), resident(b3.shape),
                resident(w4r.shape), resident(b4.shape),
            ],
            out_specs=pl.BlockSpec((tb, 1), lambda i: (i, 0)),
        ),
        compiler_params=pltpu.CompilerParams(
            dimension_semantics=("parallel",),   # megacore sharding on v7x
            vmem_limit_bytes=32 << 20,           # ~15 MiB needed at TB=512; v7x-safe
        ),
        cost_estimate=pl.CostEstimate(
            flops=2 * b_pad * matmul_macs,
            transcendentals=b_pad,
            bytes_accessed=bytes_accessed,
        ),
    )(*operands)

    return out[:b]


def init_params(key):
    """Deterministic init mimicking PyTorch nn.Linear default (U[-1/sqrt(fan_in), +])."""
    dims = [(784, 1024), (1024, 512), (512, 256), (256, 1)]
    params = []
    for fan_in, fan_out in dims:
        kw, kb, key = jax.random.split(key, 3)
        bound = 1.0 / jnp.sqrt(float(fan_in))
        w = jax.random.uniform(kw, (fan_in, fan_out), jnp.float32, -bound, bound)
        # biases kept 2-D (1, fan_out) for clean VMEM layout / broadcasting
        bvec = jax.random.uniform(kb, (1, fan_out), jnp.float32, -bound, bound)
        params.extend([w, bvec])
    return tuple(params)


if __name__ == "__main__":
    key = jax.random.PRNGKey(0)
    k_x, k_p = jax.random.split(key)

    B = 2
    x = jax.random.normal(k_x, (B, 1, 28, 28), dtype=jnp.float32)
    params = init_params(k_p)

    out = discriminator_forward(x, params)
    out = jax.block_until_ready(out)

    assert out.shape == (B, 1), out.shape
    assert bool(jnp.all(jnp.isfinite(out)))
    assert bool(jnp.all((out >= 0.0) & (out <= 1.0)))
    print("KERNEL_OK")
</pallas_src>

<mosaic_0001>
module attributes {stable_mosaic.version = 11 : i64} {
  func.func @disc_kernel(%arg0: i32, %arg1: memref<8x784xf32, #tpu.memory_space<vmem>>, %arg2: memref<784x1024xbf16, #tpu.memory_space<vmem>>, %arg3: memref<1x1024xf32, #tpu.memory_space<vmem>>, %arg4: memref<1024x512xbf16, #tpu.memory_space<vmem>>, %arg5: memref<1x512xf32, #tpu.memory_space<vmem>>, %arg6: memref<512x256xbf16, #tpu.memory_space<vmem>>, %arg7: memref<1x256xf32, #tpu.memory_space<vmem>>, %arg8: memref<1x256xbf16, #tpu.memory_space<vmem>>, %arg9: memref<1x1xf32, #tpu.memory_space<vmem>>, %arg10: memref<8x1xf32, #tpu.memory_space<vmem>>) attributes {dimension_semantics = [#tpu.dimension_semantics<parallel>], iteration_bounds = array<i64: 1>, scalar_prefetch = 0 : i64, scratch_operands = 0 : i64, tpu.core_type = #tpu.core_type<tc>, window_params = [{transform_indices = @transform_0, window_bounds = array<i64: 8, 784>}, {pipeline_mode = #tpu.pipeline_mode<synchronous>, transform_indices = @transform_1, window_bounds = array<i64: 784, 1024>}, {pipeline_mode = #tpu.pipeline_mode<synchronous>, transform_indices = @transform_2, window_bounds = array<i64: 1, 1024>}, {pipeline_mode = #tpu.pipeline_mode<synchronous>, transform_indices = @transform_3, window_bounds = array<i64: 1024, 512>}, {pipeline_mode = #tpu.pipeline_mode<synchronous>, transform_indices = @transform_4, window_bounds = array<i64: 1, 512>}, {pipeline_mode = #tpu.pipeline_mode<synchronous>, transform_indices = @transform_5, window_bounds = array<i64: 512, 256>}, {pipeline_mode = #tpu.pipeline_mode<synchronous>, transform_indices = @transform_6, window_bounds = array<i64: 1, 256>}, {pipeline_mode = #tpu.pipeline_mode<synchronous>, transform_indices = @transform_7, window_bounds = array<i64: 1, 256>}, {pipeline_mode = #tpu.pipeline_mode<synchronous>, transform_indices = @transform_8, window_bounds = array<i64: 1, 1>}, {transform_indices = @transform_9, window_bounds = array<i64: 8, 1>}]} {
    %c0 = arith.constant 0 : index
    %c0_0 = arith.constant 0 : index
    %0 = vector.load %arg1[%c0, %c0_0] : memref<8x784xf32, #tpu.memory_space<vmem>>, vector<8x784xf32>
    %1 = arith.truncf %0 : vector<8x784xf32> to vector<8x784xbf16>
    %c0_1 = arith.constant 0 : index
    %c0_2 = arith.constant 0 : index
    %2 = vector.load %arg2[%c0_1, %c0_2] : memref<784x1024xbf16, #tpu.memory_space<vmem>>, vector<784x1024xbf16>
    %cst = arith.constant dense<0.000000e+00> : vector<8x1024xf32>
    %3 = tpu.matmul %1, %2, %cst {dimension_numbers = #tpu.dot_dimension_numbers<[1], [0], [0], [1], [0, 0, 1, 1], [], []>} : vector<8x784xbf16>, vector<784x1024xbf16>, vector<8x1024xf32> -> vector<8x1024xf32>
    %c0_3 = arith.constant 0 : index
    %c0_4 = arith.constant 0 : index
    %4 = vector.load %arg3[%c0_3, %c0_4] : memref<1x1024xf32, #tpu.memory_space<vmem>>, vector<1x1024xf32>
    %5 = vector.broadcast %4 : vector<1x1024xf32> to vector<8x1024xf32>
    %6 = arith.addf %3, %5 : vector<8x1024xf32>
    %cst_5 = arith.constant 0.000000e+00 : f32
    %7 = vector.broadcast %cst_5 : f32 to vector<8x1024xf32>
    %8 = arith.maximumf %6, %7 : vector<8x1024xf32>
    %9 = arith.truncf %8 : vector<8x1024xf32> to vector<8x1024xbf16>
    %c0_6 = arith.constant 0 : index
    %c0_7 = arith.constant 0 : index
    %10 = vector.load %arg4[%c0_6, %c0_7] : memref<1024x512xbf16, #tpu.memory_space<vmem>>, vector<1024x512xbf16>
    %cst_8 = arith.constant dense<0.000000e+00> : vector<8x512xf32>
    %11 = tpu.matmul %9, %10, %cst_8 {dimension_numbers = #tpu.dot_dimension_numbers<[1], [0], [0], [1], [0, 0, 1, 1], [], []>} : vector<8x1024xbf16>, vector<1024x512xbf16>, vector<8x512xf32> -> vector<8x512xf32>
    %c0_9 = arith.constant 0 : index
    %c0_10 = arith.constant 0 : index
    %12 = vector.load %arg5[%c0_9, %c0_10] : memref<1x512xf32, #tpu.memory_space<vmem>>, vector<1x512xf32>
    %13 = vector.broadcast %12 : vector<1x512xf32> to vector<8x512xf32>
    %14 = arith.addf %11, %13 : vector<8x512xf32>
    %cst_11 = arith.constant 0.000000e+00 : f32
    %15 = vector.broadcast %cst_11 : f32 to vector<8x512xf32>
    %16 = arith.maximumf %14, %15 : vector<8x512xf32>
    %17 = arith.truncf %16 : vector<8x512xf32> to vector<8x512xbf16>
    %c0_12 = arith.constant 0 : index
    %c0_13 = arith.constant 0 : index
    %18 = vector.load %arg6[%c0_12, %c0_13] : memref<512x256xbf16, #tpu.memory_space<vmem>>, vector<512x256xbf16>
    %cst_14 = arith.constant dense<0.000000e+00> : vector<8x256xf32>
    %19 = tpu.matmul %17, %18, %cst_14 {dimension_numbers = #tpu.dot_dimension_numbers<[1], [0], [0], [1], [0, 0, 1, 1], [], []>} : vector<8x512xbf16>, vector<512x256xbf16>, vector<8x256xf32> -> vector<8x256xf32>
    %c0_15 = arith.constant 0 : index
    %c0_16 = arith.constant 0 : index
    %20 = vector.load %arg7[%c0_15, %c0_16] : memref<1x256xf32, #tpu.memory_space<vmem>>, vector<1x256xf32>
    %21 = vector.broadcast %20 : vector<1x256xf32> to vector<8x256xf32>
    %22 = arith.addf %19, %21 : vector<8x256xf32>
    %cst_17 = arith.constant 0.000000e+00 : f32
    %23 = vector.broadcast %cst_17 : f32 to vector<8x256xf32>
    %24 = arith.maximumf %22, %23 : vector<8x256xf32>
    %c0_18 = arith.constant 0 : index
    %c0_19 = arith.constant 0 : index
    %25 = vector.load %arg8[%c0_18, %c0_19] : memref<1x256xbf16, #tpu.memory_space<vmem>>, vector<1x256xbf16>
    %26 = arith.extf %25 : vector<1x256xbf16> to vector<1x256xf32>
    %27 = vector.broadcast %26 : vector<1x256xf32> to vector<8x256xf32>
    %28 = arith.mulf %24, %27 : vector<8x256xf32>
    %cst_20 = arith.constant dense<0.000000e+00> : vector<8xf32>
    %29 = vector.multi_reduction <add>, %28, %cst_20 [1] : vector<8x256xf32> to vector<8xf32>
    %30 = vector.shape_cast %29 : vector<8xf32> to vector<8x1xf32>
    %c0_21 = arith.constant 0 : index
    %c0_22 = arith.constant 0 : index
    %31 = vector.load %arg9[%c0_21, %c0_22] : memref<1x1xf32, #tpu.memory_space<vmem>>, vector<1x1xf32>
    %32 = vector.broadcast %31 : vector<1x1xf32> to vector<8x1xf32>
    %33 = arith.addf %30, %32 : vector<8x1xf32>
    %34 = arith.negf %33 : vector<8x1xf32>
    %35 = math.exp %34 : vector<8x1xf32>
    %cst_23 = arith.constant 1.000000e+00 : f32
    %36 = vector.broadcast %cst_23 : f32 to vector<8x1xf32>
    %37 = arith.addf %36, %35 : vector<8x1xf32>
    %38 = arith.divf %36, %37 : vector<8x1xf32>
    %c0_24 = arith.constant 0 : index
    %c0_25 = arith.constant 0 : index
    %39 = vector.load %arg10[%c0_24, %c0_25] : memref<8x1xf32, #tpu.memory_space<vmem>>, vector<8x1xf32>
    tpu.vector_store %arg10[%c0_24, %c0_25], %38 {strides = array<i32>} : memref<8x1xf32, #tpu.memory_space<vmem>>, vector<8x1xf32>,
    return
  }
  func.func @transform_0(%arg0: i32) -> (i32, i32) {
    %c0_i32 = arith.constant 0 : i32
    %c0_i32_0 = arith.constant 0 : i32
    return %arg0, %c0_i32 : i32, i32
  }
  func.func @transform_1(%arg0: i32) -> (i32, i32) {
    %c0_i32 = arith.constant 0 : i32
    %c0_i32_0 = arith.constant 0 : i32
    %c0_i32_1 = arith.constant 0 : i32
    return %c0_i32, %c0_i32_0 : i32, i32
  }
  func.func @transform_2(%arg0: i32) -> (i32, i32) {
    %c0_i32 = arith.constant 0 : i32
    %c0_i32_0 = arith.constant 0 : i32
    %c0_i32_1 = arith.constant 0 : i32
    return %c0_i32, %c0_i32_0 : i32, i32
  }
  func.func @transform_3(%arg0: i32) -> (i32, i32) {
    %c0_i32 = arith.constant 0 : i32
    %c0_i32_0 = arith.constant 0 : i32
    %c0_i32_1 = arith.constant 0 : i32
    return %c0_i32, %c0_i32_0 : i32, i32
  }
  func.func @transform_4(%arg0: i32) -> (i32, i32) {
    %c0_i32 = arith.constant 0 : i32
    %c0_i32_0 = arith.constant 0 : i32
    %c0_i32_1 = arith.constant 0 : i32
    return %c0_i32, %c0_i32_0 : i32, i32
  }
  func.func @transform_5(%arg0: i32) -> (i32, i32) {
    %c0_i32 = arith.constant 0 : i32
    %c0_i32_0 = arith.constant 0 : i32
    %c0_i32_1 = arith.constant 0 : i32
    return %c0_i32, %c0_i32_0 : i32, i32
  }
  func.func @transform_6(%arg0: i32) -> (i32, i32) {
    %c0_i32 = arith.constant 0 : i32
    %c0_i32_0 = arith.constant 0 : i32
    %c0_i32_1 = arith.constant 0 : i32
    return %c0_i32, %c0_i32_0 : i32, i32
  }
  func.func @transform_7(%arg0: i32) -> (i32, i32) {
    %c0_i32 = arith.constant 0 : i32
    %c0_i32_0 = arith.constant 0 : i32
    %c0_i32_1 = arith.constant 0 : i32
    return %c0_i32, %c0_i32_0 : i32, i32
  }
  func.func @transform_8(%arg0: i32) -> (i32, i32) {
    %c0_i32 = arith.constant 0 : i32
    %c0_i32_0 = arith.constant 0 : i32
    %c0_i32_1 = arith.constant 0 : i32
    return %c0_i32, %c0_i32_0 : i32, i32
  }
  func.func @transform_9(%arg0: i32) -> (i32, i32) {
    %c0_i32 = arith.constant 0 : i32
    %c0_i32_0 = arith.constant 0 : i32
    return %arg0, %c0_i32 : i32, i32
  }
}

</mosaic_0001>

<bundles_post_ra>
// kernel: discriminator_forward.1
= control target key start
LH: loop header
LB: loop body
LE: loop exit
PB: predicated region body
PF: predicated region fallthrough
CT: control target
= control target key end

     0   :  { %vm2443_vm0 = vcmask 130048   ;;  %vm5533_vm1 = vcmask 7168   ;;  %s9163_s1 = inlined_call_operand.vmem [shape: bf16[784,1024], index: 1, kind: input, shape index: {}]   ;;  %s9164_s0 = inlined_call_operand.vmem [shape: f32[8,784], index: 0, kind: input, shape index: {}]   ;;  %s9165_s2 = inlined_call_operand.vmem [shape: f32[1,1024], index: 2, kind: input, shape index: {}]   ;;  %s9166_s3 = inlined_call_operand.vmem [shape: bf16[1024,512], index: 3, kind: input, shape index: {}]   ;;  %s9167_s5 = inlined_call_operand.vmem [shape: bf16[512,256], index: 5, kind: input, shape index: {}]   ;;  %s9168_s4 = inlined_call_operand.vmem [shape: f32[1,512], index: 4, kind: input, shape index: {}]   ;;  %s9169_s8 = inlined_call_operand.<no memory space> [shape: f32[1,1], index: 8, kind: input, shape index: {}]   ;;  %s9170_s6 = inlined_call_operand.vmem [shape: f32[1,256], index: 6, kind: input, shape index: {}]   ;;  %s9171_s7 = inlined_call_operand.vmem [shape: bf16[1,256], index: 7, kind: input, shape index: {}]   ;;  %s9172_s9 = inlined_call_operand.vmem [shape: f32[8,1], index: 9, kind: output, shape index: {}]  }
   0x1   :  { %v105_v0 = vld [vmem:[%s9163_s1 + $0x1c0] sm:$0xff]  ;;  %v36_v53 = vld [vmem:[%s9164_s0 + $0x8] sm:$0xff]  ;;  %v38_v54 = vld [vmem:[%s9164_s0 + $0x18] sm:$0xff] }
   0x2   :  { %v109_v1 = vld [vmem:[%s9163_s1 + $0x1e0] sm:$0xff]  ;;  %v6890_v58 = vpack.c.bf16 %v36_v53, %v36_v53  ;;  %v6892_v59 = vpack.c.bf16 %v38_v54, %v38_v54 }
   0x3   :  { %v233_v2 = vld [vmem:[%s9163_s1 + $0x5c0] sm:$0xff]  ;;  %v5596_v3 = vcombine.high %v105_v0, %v109_v1  ;;  %v5595_v5 = vcombine.low %v105_v0, %v109_v1 }
   0x4   :  { %v237_v4 = vld [vmem:[%s9163_s1 + $0x5e0] sm:$0xff]  ;;  %2479 = vmatprep.mubr.bf16.mxu0 %v6890_v58  ;;  %2520 = vmatprep.mubr.bf16.mxu1 %v6892_v59 }
   0x5   :  { %v97_v6 = vld [vmem:[%s9163_s1 + $0x180] sm:$0xff]  ;;  %v5724_v8 = vcombine.high %v233_v2, %v237_v4  ;;  %v5723_v9 = vcombine.low %v233_v2, %v237_v4  ;;  %2447 = vmatprep.subr.bf16.mxu0 %v5596_v3 }
   0x6   :  { %v101_v7 = vld [vmem:[%s9163_s1 + $0x1a0] sm:$0xff]  ;;  %2448 = vmatpush1.bf16.msra.mxu0 %v5595_v5 }
   0x7   :  { %v5588_v10 = vcombine.high %v97_v6, %v101_v7  ;;  %v225_v11 = vld [vmem:[%s9163_s1 + $0x580] sm:$0xff]  ;;  %2488 = vmatprep.subr.bf16.mxu1 %v5724_v8  ;;  %v5587_v18 = vcombine.low %v97_v6, %v101_v7 }
   0x8   :  { %v229_v12 = vld [vmem:[%s9163_s1 + $0x5a0] sm:$0xff]  ;;  %2489 = vmatpush1.bf16.msra.mxu1 %v5723_v9 }
   0x9   :  { %v89_v13 = vld [vmem:[%s9163_s1 + $0x140] sm:$0xff]  ;;  %v5716_v14 = vcombine.high %v225_v11, %v229_v12  ;;  %2449 = vmatprep.subr.bf16.mxu0 %v5588_v10  ;;  %v5715_v19 = vcombine.low %v225_v11, %v229_v12 }
   0xa   :  { %v93_v15 = vld [vmem:[%s9163_s1 + $0x160] sm:$0xff]  ;;  %2450 = vmatpush1.bf16.msra.mxu0 %v5587_v18 }
   0xb   :  { %v217_v16 = vld [vmem:[%s9163_s1 + $0x540] sm:$0xff]  ;;  %v5580_v20 = vcombine.high %v89_v13, %v93_v15  ;;  %2490 = vmatprep.subr.bf16.mxu1 %v5716_v14  ;;  %v5579_v26 = vcombine.low %v89_v13, %v93_v15 }
   0xc   :  { %v221_v17 = vld [vmem:[%s9163_s1 + $0x560] sm:$0xff]  ;;  %2491 = vmatpush1.bf16.msra.mxu1 %v5715_v19 }
   0xd   :  { %v5708_v21 = vcombine.high %v217_v16, %v221_v17  ;;  %v81_v22 = vld [vmem:[%s9163_s1 + $0x100] sm:$0xff]  ;;  %2451 = vmatprep.subr.bf16.mxu0 %v5580_v20  ;;  %v5707_v27 = vcombine.low %v217_v16, %v221_v17 }
   0xe   :  { %v85_v23 = vld [vmem:[%s9163_s1 + $0x120] sm:$0xff]  ;;  %2452 = vmatpush1.bf16.msra.mxu0 %v5579_v26 }
   0xf   :  { %v209_v24 = vld [vmem:[%s9163_s1 + $0x500] sm:$0xff]  ;;  %v5572_v28 = vcombine.high %v81_v22, %v85_v23  ;;  %2492 = vmatprep.subr.bf16.mxu1 %v5708_v21  ;;  %v5571_v34 = vcombine.low %v81_v22, %v85_v23 }
  0x10   :  { %v213_v25 = vld [vmem:[%s9163_s1 + $0x520] sm:$0xff]  ;;  %2493 = vmatpush1.bf16.msra.mxu1 %v5707_v27 }
  0x11   :  { %v5700_v29 = vcombine.high %v209_v24, %v213_v25  ;;  %v73_v30 = vld [vmem:[%s9163_s1 + $0xc0] sm:$0xff]  ;;  %2453 = vmatprep.subr.bf16.mxu0 %v5572_v28  ;;  %v5699_v35 = vcombine.low %v209_v24, %v213_v25 }
  0x12   :  { %v77_v31 = vld [vmem:[%s9163_s1 + $0xe0] sm:$0xff]  ;;  %2454 = vmatpush1.bf16.msra.mxu0 %v5571_v34 }
  0x13   :  { %v201_v32 = vld [vmem:[%s9163_s1 + $0x4c0] sm:$0xff]  ;;  %v5564_v36 = vcombine.high %v73_v30, %v77_v31  ;;  %2494 = vmatprep.subr.bf16.mxu1 %v5700_v29  ;;  %v5563_v42 = vcombine.low %v73_v30, %v77_v31 }
  0x14   :  { %v205_v33 = vld [vmem:[%s9163_s1 + $0x4e0] sm:$0xff]  ;;  %2495 = vmatpush1.bf16.msra.mxu1 %v5699_v35 }
  0x15   :  { %v5692_v37 = vcombine.high %v201_v32, %v205_v33  ;;  %v65_v38 = vld [vmem:[%s9163_s1 + $0x80] sm:$0xff]  ;;  %2455 = vmatprep.subr.bf16.mxu0 %v5564_v36  ;;  %v5691_v43 = vcombine.low %v201_v32, %v205_v33 }
  0x16   :  { %v69_v39 = vld [vmem:[%s9163_s1 + $0xa0] sm:$0xff]  ;;  %2456 = vmatpush1.bf16.msra.mxu0 %v5563_v42 }
  0x17   :  { %v193_v40 = vld [vmem:[%s9163_s1 + $0x480] sm:$0xff]  ;;  %v5556_v44 = vcombine.high %v65_v38, %v69_v39  ;;  %2496 = vmatprep.subr.bf16.mxu1 %v5692_v37  ;;  %v5555_v50 = vcombine.low %v65_v38, %v69_v39 }
  0x18   :  { %v197_v41 = vld [vmem:[%s9163_s1 + $0x4a0] sm:$0xff]  ;;  %2497 = vmatpush1.bf16.msra.mxu1 %v5691_v43 }
  0x19   :  { %v5684_v45 = vcombine.high %v193_v40, %v197_v41  ;;  %v57_v46 = vld [vmem:[%s9163_s1 + $0x40] sm:$0xff]  ;;  %2457 = vmatprep.subr.bf16.mxu0 %v5556_v44  ;;  %v5683_v51 = vcombine.low %v193_v40, %v197_v41 }
  0x1a   :  { %v61_v47 = vld [vmem:[%s9163_s1 + $0x60] sm:$0xff]  ;;  %2458 = vmatpush1.bf16.msra.mxu0 %v5555_v50 }
  0x1b   :  { %v185_v48 = vld [vmem:[%s9163_s1 + $0x440] sm:$0xff]  ;;  %v5548_v52 = vcombine.high %v57_v46, %v61_v47  ;;  %2498 = vmatprep.subr.bf16.mxu1 %v5684_v45  ;;  %v5547_v62 = vcombine.low %v57_v46, %v61_v47 }
  0x1c   :  { %v189_v49 = vld [vmem:[%s9163_s1 + $0x460] sm:$0xff]  ;;  %2499 = vmatpush1.bf16.msra.mxu1 %v5683_v51 }
  0x1d   :  { %v5676_v55 = vcombine.high %v185_v48, %v189_v49  ;;  %v49_v56 = vld [vmem:[%s9163_s1] sm:$0xff]  ;;  %2459 = vmatprep.subr.bf16.mxu0 %v5548_v52  ;;  %v5675_v63 = vcombine.low %v185_v48, %v189_v49 }
  0x1e   :  { %v53_v57 = vld [vmem:[%s9163_s1 + $0x20] sm:$0xff]  ;;  %2460 = vmatpush1.bf16.msra.mxu0 %v5547_v62 }
  0x1f   :  { %v177_v60 = vld [vmem:[%s9163_s1 + $0x400] sm:$0xff]  ;;  %v5540_v0 = vcombine.high %v49_v56, %v53_v57  ;;  %2500 = vmatprep.subr.bf16.mxu1 %v5676_v55  ;;  %v5539_v6 = vcombine.low %v49_v56, %v53_v57 }
  0x20   :  { %v181_v61 = vld [vmem:[%s9163_s1 + $0x420] sm:$0xff]  ;;  %2501 = vmatpush1.bf16.msra.mxu1 %v5675_v63 }
  0x21   :  { %v5668_v1 = vcombine.high %v177_v60, %v181_v61  ;;  %v169_v2 = vld [vmem:[%s9163_s1 + $0x3c0] sm:$0xff]  ;;  %2461 = vmatprep.subr.bf16.mxu0 %v5540_v0  ;;  %v5667_v7 = vcombine.low %v177_v60, %v181_v61 }
  0x22   :  { %v173_v3 = vld [vmem:[%s9163_s1 + $0x3e0] sm:$0xff]  ;;  %2462 = vmatpush1.bf16.msra.mxu0 %v5539_v6 }
  0x23   :  { %v297_v4 = vld [vmem:[%s9163_s1 + $0x7c0] sm:$0xff]  ;;  %v5660_v8 = vcombine.high %v169_v2, %v173_v3  ;;  %2502 = vmatprep.subr.bf16.mxu1 %v5668_v1  ;;  %v5659_v14 = vcombine.low %v169_v2, %v173_v3 }
  0x24   :  { %v301_v5 = vld [vmem:[%s9163_s1 + $0x7e0] sm:$0xff]  ;;  %2503 = vmatpush1.bf16.msra.mxu1 %v5667_v7 }
  0x25   :  { %v5788_v9 = vcombine.high %v297_v4, %v301_v5  ;;  %v161_v10 = vld [vmem:[%s9163_s1 + $0x380] sm:$0xff]  ;;  %2463 = vmatprep.subr.bf16.mxu0 %v5660_v8  ;;  %v5787_v15 = vcombine.low %v297_v4, %v301_v5 }
  0x26   :  { %v165_v11 = vld [vmem:[%s9163_s1 + $0x3a0] sm:$0xff]  ;;  %2464 = vmatpush2.bf16.msra.mxu0 %v5659_v14 }
  0x27   :  { %v289_v12 = vld [vmem:[%s9163_s1 + $0x780] sm:$0xff]  ;;  %v5652_v16 = vcombine.high %v161_v10, %v165_v11  ;;  %2504 = vmatprep.subr.bf16.mxu1 %v5788_v9  ;;  %v5651_v22 = vcombine.low %v161_v10, %v165_v11  ;;  %v37_v11 = vld [vmem:[%s9164_s0 + $0x10] sm:$0xff] }
  0x28   :  { %v293_v13 = vld [vmem:[%s9163_s1 + $0x7a0] sm:$0xff]  ;;  %2505 = vmatpush2.bf16.msra.mxu1 %v5787_v15 }
  0x29   :  { %v5780_v17 = vcombine.high %v289_v12, %v293_v13  ;;  %v153_v18 = vld [vmem:[%s9163_s1 + $0x340] sm:$0xff]  ;;  %2465 = vmatprep.subr.bf16.mxu0 %v5652_v16  ;;  %v5779_v23 = vcombine.low %v289_v12, %v293_v13 }
  0x2a   :  { %v157_v19 = vld [vmem:[%s9163_s1 + $0x360] sm:$0xff]  ;;  %2466 = vmatpush2.bf16.msra.mxu0 %v5651_v22 }
  0x2b   :  { %v281_v20 = vld [vmem:[%s9163_s1 + $0x740] sm:$0xff]  ;;  %v5644_v24 = vcombine.high %v153_v18, %v157_v19  ;;  %2506 = vmatprep.subr.bf16.mxu1 %v5780_v17  ;;  %v5643_v30 = vcombine.low %v153_v18, %v157_v19  ;;  %v106_v17 = vld [vmem:[%s9163_s1 + $0x1c8] sm:$0xff]  ;;  %v7030_v19 = vpack.c.bf16 %v37_v11, %v37_v11 }
  0x2c   :  { %v285_v21 = vld [vmem:[%s9163_s1 + $0x760] sm:$0xff]  ;;  %2507 = vmatpush2.bf16.msra.mxu1 %v5779_v23  ;;  %v110_v18 = vld [vmem:[%s9163_s1 + $0x1e8] sm:$0xff] }
  0x2d   :  { %v5772_v25 = vcombine.high %v281_v20, %v285_v21  ;;  %v145_v26 = vld [vmem:[%s9163_s1 + $0x300] sm:$0xff]  ;;  %2467 = vmatprep.subr.bf16.mxu0 %v5644_v24  ;;  %v5771_v31 = vcombine.low %v281_v20, %v285_v21  ;;  %v40_v21 = vld [vmem:[%s9164_s0 + $0x28] sm:$0xff]  ;;  %v5598_v24 = vcombine.high %v106_v17, %v110_v18 }
  0x2e   :  { %v149_v27 = vld [vmem:[%s9163_s1 + $0x320] sm:$0xff]  ;;  %2468 = vmatpush2.bf16.msra.mxu0 %v5643_v30  ;;  %v41_v30 = vld [vmem:[%s9164_s0 + $0x30] sm:$0xff] }
  0x2f   :  { %v273_v28 = vld [vmem:[%s9163_s1 + $0x700] sm:$0xff]  ;;  %v5636_v32 = vcombine.high %v145_v26, %v149_v27  ;;  %2508 = vmatprep.subr.bf16.mxu1 %v5772_v25  ;;  %v5635_v38 = vcombine.low %v145_v26, %v149_v27  ;;  %v7042_v27 = vpack.c.bf16 %v40_v21, %v40_v21 }
  0x30   :  { %v277_v29 = vld [vmem:[%s9163_s1 + $0x720] sm:$0xff]  ;;  %2509 = vmatpush2.bf16.msra.mxu1 %v5771_v31  ;;  %v6743_v31 = vmov 0  }
  0x31   :  { %v5764_v33 = vcombine.high %v273_v28, %v277_v29  ;;  %v137_v34 = vld [vmem:[%s9163_s1 + $0x2c0] sm:$0xff]  ;;  %2469 = vmatprep.subr.bf16.mxu0 %v5636_v32  ;;  %v5763_v39 = vcombine.low %v273_v28, %v277_v29 }
  0x32   :  { %v141_v35 = vld [vmem:[%s9163_s1 + $0x2e0] sm:$0xff]  ;;  %2470 = vmatpush2.bf16.msra.mxu0 %v5635_v38  ;;  %v5597_v38 = vcombine.low %v106_v17, %v110_v18 }
  0x33   :  { %v265_v36 = vld [vmem:[%s9163_s1 + $0x6c0] sm:$0xff]  ;;  %v5628_v40 = vcombine.high %v137_v34, %v141_v35  ;;  %2510 = vmatprep.subr.bf16.mxu1 %v5764_v33  ;;  %v5627_v46 = vcombine.low %v137_v34, %v141_v35  ;;  %v98_v34 = vld [vmem:[%s9163_s1 + $0x188] sm:$0xff] }
  0x34   :  { %v269_v37 = vld [vmem:[%s9163_s1 + $0x6e0] sm:$0xff]  ;;  %2511 = vmatpush2.bf16.msra.mxu1 %v5763_v39  ;;  %v102_v35 = vld [vmem:[%s9163_s1 + $0x1a8] sm:$0xff] }
  0x35   :  { %v5756_v41 = vcombine.high %v265_v36, %v269_v37  ;;  %v129_v42 = vld [vmem:[%s9163_s1 + $0x280] sm:$0xff]  ;;  %2471 = vmatprep.subr.bf16.mxu0 %v5628_v40  ;;  %v5755_v47 = vcombine.low %v265_v36, %v269_v37  ;;  %v7062_v37 = vpack.c.bf16 %v41_v30, %v41_v30  ;;  %v5590_v40 = vcombine.high %v98_v34, %v102_v35 }
  0x36   :  { %v133_v43 = vld [vmem:[%s9163_s1 + $0x2a0] sm:$0xff]  ;;  %2472 = vmatpush2.bf16.msra.mxu0 %v5627_v46  ;;  %v5589_v46 = vcombine.low %v98_v34, %v102_v35  ;;  %v174_v34 = vld [vmem:[%s9163_s1 + $0x3e8] sm:$0xff] }
  0x37   :  { %v257_v44 = vld [vmem:[%s9163_s1 + $0x680] sm:$0xff]  ;;  %v5620_v48 = vcombine.high %v129_v42, %v133_v43  ;;  %2512 = vmatprep.subr.bf16.mxu1 %v5756_v41  ;;  %v5619_v54 = vcombine.low %v129_v42, %v133_v43  ;;  %v90_v43 = vld [vmem:[%s9163_s1 + $0x148] sm:$0xff] }
  0x38   :  { %v261_v45 = vld [vmem:[%s9163_s1 + $0x6a0] sm:$0xff]  ;;  %2513 = vmatpush2.bf16.msra.mxu1 %v5755_v47 }
  0x39   :  { %v5748_v49 = vcombine.high %v257_v44, %v261_v45  ;;  %v121_v50 = vld [vmem:[%s9163_s1 + $0x240] sm:$0xff]  ;;  %2473 = vmatprep.subr.bf16.mxu0 %v5620_v48  ;;  %v5747_v55 = vcombine.low %v257_v44, %v261_v45  ;;  %v94_v44 = vld [vmem:[%s9163_s1 + $0x168] sm:$0xff] }
  0x3a   :  { %v125_v51 = vld [vmem:[%s9163_s1 + $0x260] sm:$0xff]  ;;  %2474 = vmatpush2.bf16.msra.mxu0 %v5619_v54  ;;  %v5582_v48 = vcombine.high %v90_v43, %v94_v44  ;;  %v5581_v54 = vcombine.low %v90_v43, %v94_v44  ;;  %v166_v43 = vld [vmem:[%s9163_s1 + $0x3a8] sm:$0xff] }
  0x3b   :  { %v249_v52 = vld [vmem:[%s9163_s1 + $0x640] sm:$0xff]  ;;  %v5612_v56 = vcombine.high %v121_v50, %v125_v51  ;;  %2514 = vmatprep.subr.bf16.mxu1 %v5748_v49  ;;  %v5611_v0 = vcombine.low %v121_v50, %v125_v51  ;;  %v82_v51 = vld [vmem:[%s9163_s1 + $0x108] sm:$0xff] }
  0x3c   :  { %v253_v53 = vld [vmem:[%s9163_s1 + $0x660] sm:$0xff]  ;;  %2515 = vmatpush2.bf16.msra.mxu1 %v5747_v55 }
  0x3d   :  { %v5740_v57 = vcombine.high %v249_v52, %v253_v53  ;;  %v113_v60 = vld [vmem:[%s9163_s1 + $0x200] sm:$0xff]  ;;  %2475 = vmatprep.subr.bf16.mxu0 %v5612_v56  ;;  %v5739_v1 = vcombine.low %v249_v52, %v253_v53  ;;  %v86_v52 = vld [vmem:[%s9163_s1 + $0x128] sm:$0xff] }
  0x3e   :  { %v117_v61 = vld [vmem:[%s9163_s1 + $0x220] sm:$0xff]  ;;  %2476 = vmatpush2.bf16.msra.mxu0 %v5611_v0  ;;  %v5574_v56 = vcombine.high %v82_v51, %v86_v52  ;;  %v5573_v0 = vcombine.low %v82_v51, %v86_v52  ;;  %v158_v51 = vld [vmem:[%s9163_s1 + $0x368] sm:$0xff] }
  0x3f   :  { %v241_v62 = vld [vmem:[%s9163_s1 + $0x600] sm:$0xff]  ;;  %v5604_v2 = vcombine.high %v113_v60, %v117_v61  ;;  %2516 = vmatprep.subr.bf16.mxu1 %v5740_v57  ;;  %v5603_v8 = vcombine.low %v113_v60, %v117_v61  ;;  %v74_v61 = vld [vmem:[%s9163_s1 + $0xc8] sm:$0xff] }
  0x40   :  { %v245_v63 = vld [vmem:[%s9163_s1 + $0x620] sm:$0xff]  ;;  %2517 = vmatpush2.bf16.msra.mxu1 %v5739_v1 }
  0x41   :  { %v5732_v3 = vcombine.high %v241_v62, %v245_v63  ;;  %v361_v4 = vld [vmem:[%s9163_s1 + $0x9c0] sm:$0xff]  ;;  %2477 = vmatprep.subr.bf16.mxu0 %v5604_v2  ;;  %v5731_v10 = vcombine.low %v241_v62, %v245_v63  ;;  %v78_v62 = vld [vmem:[%s9163_s1 + $0xe8] sm:$0xff] }
  0x42   :  { %v365_v5 = vld [vmem:[%s9163_s1 + $0x9e0] sm:$0xff]  ;;  %2478 = vmatpush2.bf16.msra.mxu0 %v5603_v8  ;;  %v5566_v2 = vcombine.high %v74_v61, %v78_v62  ;;  %v5565_v8 = vcombine.low %v74_v61, %v78_v62  ;;  %v150_v61 = vld [vmem:[%s9163_s1 + $0x328] sm:$0xff] }
  0x43   :  { %v433_v6 = vld [vmem:[%s9163_s1 + $0xc00] sm:$0xff]  ;;  %v5852_v12 = vcombine.high %v361_v4, %v365_v5  ;;  %2518 = vmatprep.subr.bf16.mxu1 %v5732_v3  ;;  %v5851_v20 = vcombine.low %v361_v4, %v365_v5  ;;  %v66_v5 = vld [vmem:[%s9163_s1 + $0x88] sm:$0xff] }
  0x44   :  { %v437_v7 = vld [vmem:[%s9163_s1 + $0xc20] sm:$0xff]  ;;  %2519 = vmatpush2.bf16.msra.mxu1 %v5731_v10 }
  0x45   :  { %v35_v9 = vld [vmem:[%s9164_s0] sm:$0xff]  ;;  %v5924_v13 = vcombine.high %v433_v6, %v437_v7  ;;  %2529 = vmatprep.subr.bf16.mxu0 %v5852_v12  ;;  %v5923_v22 = vcombine.low %v433_v6, %v437_v7  ;;  %v70_v6 = vld [vmem:[%s9163_s1 + $0xa8] sm:$0xff] }
  0x46   :  { %v353_v14 = vld [vmem:[%s9163_s1 + $0x980] sm:$0xff]  ;;  %v7022_v16 = vpack.c.bf16 %v35_v9, %v35_v9  ;;  %v5558_v10 = vcombine.high %v66_v5, %v70_v6  ;;  %v5557_v17 = vcombine.low %v66_v5, %v70_v6  ;;  %v142_v5 = vld [vmem:[%s9163_s1 + $0x2e8] sm:$0xff] }
  0x47   :  { %v357_v15 = vld [vmem:[%s9163_s1 + $0x9a0] sm:$0xff]  ;;  %2584 = vmatprep.subr.bf16.mxu1 %v5924_v13  ;;  %2521 = vmatmul.mubr.bf16.vlgmr.msra.gmra.mxu1 %v7030_v19  ;;  %v58_v13 = vld [vmem:[%s9163_s1 + $0x48] sm:$0xff] }
  0x48   :  { %v5844_v23 = vcombine.high %v353_v14, %v357_v15  ;;  %v345_v25 = vld [vmem:[%s9163_s1 + $0x940] sm:$0xff]  ;;  %2480 = vmatmul.mubr.bf16.vlgmr.msra.gmra.mxu0 %v7022_v16  ;;  %v5843_v28 = vcombine.low %v353_v14, %v357_v15  ;;  %2585 = vmatpush1.bf16.msra.mxu1 %v5923_v22  ;;  %v62_v14 = vld [vmem:[%s9163_s1 + $0x68] sm:$0xff] }
  0x49   :  { %v349_v26 = vld [vmem:[%s9163_s1 + $0x960] sm:$0xff]  ;;  %2530 = vmatpush1.bf16.msra.mxu0 %v5851_v20  ;;  %2602 = vmatprep.mubr.bf16.mxu1 %v6743_v31  ;;  %v5550_v20 = vcombine.high %v58_v13, %v62_v14 }
  0x4a   :  { %2531 = vmatprep.subr.bf16.mxu0 %v5844_v23  ;;  %v5836_v29 = vcombine.high %v345_v25, %v349_v26  ;;  %2611 = vmatprep.subr.bf16.mxu1 %v5598_v24  ;;  %v337_v32 = vld [vmem:[%s9163_s1 + $0x900] sm:$0xff]  ;;  %v5835_v36 = vcombine.low %v345_v25, %v349_v26  ;;  %v50_v23 = vld [vmem:[%s9163_s1 + $0x8] sm:$0xff]  ;;  %v5549_v26 = vcombine.low %v58_v13, %v62_v14 }
  0x4b   :  { %v341_v33 = vld [vmem:[%s9163_s1 + $0x920] sm:$0xff]  ;;  %2561 = vmatprep.mubr.bf16.mxu0 %v7042_v27  ;;  %v54_v24 = vld [vmem:[%s9163_s1 + $0x28] sm:$0xff] }
  0x4c   :  { %v5828_v39 = vcombine.high %v337_v32, %v341_v33  ;;  %v329_v41 = vld [vmem:[%s9163_s1 + $0x8c0] sm:$0xff]  ;;  %v5827_v45 = vcombine.low %v337_v32, %v341_v33  ;;  %v170_v33 = vld [vmem:[%s9163_s1 + $0x3c8] sm:$0xff] }
  0x4d   :  { %2532 = vmatpush1.bf16.msra.mxu0 %v5843_v28  ;;  %v333_v42 = vld [vmem:[%s9163_s1 + $0x8e0] sm:$0xff]  ;;  %v134_v13 = vld [vmem:[%s9163_s1 + $0x2a8] sm:$0xff] }
  0x4e   :  { %2533 = vmatprep.subr.bf16.mxu0 %v5836_v29  ;;  %v5820_v47 = vcombine.high %v329_v41, %v333_v42  ;;  %v321_v49 = vld [vmem:[%s9163_s1 + $0x880] sm:$0xff]  ;;  %v5819_v53 = vcombine.low %v329_v41, %v333_v42  ;;  %v5542_v29 = vcombine.high %v50_v23, %v54_v24  ;;  %v162_v42 = vld [vmem:[%s9163_s1 + $0x388] sm:$0xff] }
  0x4f   :  { %5931 = vmatmul.mubr.msk.bf16.vlgmr.msra.gmra.mxu1 %vm2443_vm0, %v7062_v37  ;;  %v325_v50 = vld [vmem:[%s9163_s1 + $0x8a0] sm:$0xff] }
  0x50   :  { %2612 = vmatpush1.bf16.msra.mxu1 %v5597_v38  ;;  %2643 = vmatprep.mubr.bf16.mxu1 %v6890_v58  ;;  %v5812_v55 = vcombine.high %v321_v49, %v325_v50  ;;  %v313_v57 = vld [vmem:[%s9163_s1 + $0x840] sm:$0xff]  ;;  %v5811_v63 = vcombine.low %v321_v49, %v325_v50  ;;  %v154_v50 = vld [vmem:[%s9163_s1 + $0x348] sm:$0xff] }
  0x51   :  { %2534 = vmatpush1.bf16.msra.mxu0 %v5835_v36  ;;  %2613 = vmatprep.subr.bf16.mxu1 %v5590_v40  ;;  %v317_v60 = vld [vmem:[%s9163_s1 + $0x860] sm:$0xff]  ;;  %v5541_v36 = vcombine.low %v50_v23, %v54_v24  ;;  %v126_v23 = vld [vmem:[%s9163_s1 + $0x268] sm:$0xff] }
  0x52   :  { %2535 = vmatprep.subr.bf16.mxu0 %v5828_v39  ;;  %v5804_v1 = vcombine.high %v313_v57, %v317_v60  ;;  %v305_v3 = vld [vmem:[%s9163_s1 + $0x800] sm:$0xff]  ;;  %v5803_v7 = vcombine.low %v313_v57, %v317_v60  ;;  %v5662_v39 = vcombine.high %v170_v33, %v174_v34  ;;  %v146_v60 = vld [vmem:[%s9163_s1 + $0x308] sm:$0xff] }
  0x53   :  { %v309_v4 = vld [vmem:[%s9163_s1 + $0x820] sm:$0xff] }
  0x54   :  { %2614 = vmatpush1.bf16.msra.mxu1 %v5589_v46  ;;  %v5796_v9 = vcombine.high %v305_v3, %v309_v4  ;;  %v425_v11 = vld [vmem:[%s9163_s1 + $0xbc0] sm:$0xff]  ;;  %v5795_v15 = vcombine.low %v305_v3, %v309_v4  ;;  %v138_v4 = vld [vmem:[%s9163_s1 + $0x2c8] sm:$0xff] }
  0x55   :  { %2536 = vmatpush1.bf16.msra.mxu0 %v5827_v45  ;;  %2615 = vmatprep.subr.bf16.mxu1 %v5582_v48  ;;  %v429_v12 = vld [vmem:[%s9163_s1 + $0xbe0] sm:$0xff]  ;;  %v5661_v45 = vcombine.low %v170_v33, %v174_v34  ;;  %v114_v34 = vld [vmem:[%s9163_s1 + $0x208] sm:$0xff] }
  0x56   :  { %2537 = vmatprep.subr.bf16.mxu0 %v5820_v47  ;;  %v5916_v18 = vcombine.high %v425_v11, %v429_v12  ;;  %v417_v21 = vld [vmem:[%s9163_s1 + $0xb80] sm:$0xff]  ;;  %v5915_v25 = vcombine.low %v425_v11, %v429_v12  ;;  %v5654_v47 = vcombine.high %v162_v42, %v166_v43  ;;  %v130_v12 = vld [vmem:[%s9163_s1 + $0x288] sm:$0xff] }
  0x57   :  { %v421_v22 = vld [vmem:[%s9163_s1 + $0xba0] sm:$0xff] }
  0x58   :  { %2616 = vmatpush1.bf16.msra.mxu1 %v5581_v54  ;;  %v5908_v28 = vcombine.high %v417_v21, %v421_v22  ;;  %v409_v30 = vld [vmem:[%s9163_s1 + $0xb40] sm:$0xff]  ;;  %v5907_v35 = vcombine.low %v417_v21, %v421_v22  ;;  %v238_v21 = vld [vmem:[%s9163_s1 + $0x5e8] sm:$0xff] }
  0x59   :  { %2538 = vmatpush1.bf16.msra.mxu0 %v5819_v53  ;;  %2617 = vmatprep.subr.bf16.mxu1 %v5574_v56  ;;  %v413_v32 = vld [vmem:[%s9163_s1 + $0xb60] sm:$0xff]  ;;  %v5653_v53 = vcombine.low %v162_v42, %v166_v43  ;;  %v122_v22 = vld [vmem:[%s9163_s1 + $0x248] sm:$0xff] }
  0x5a   :  { %2539 = vmatprep.subr.bf16.mxu0 %v5812_v55  ;;  %v5900_v38 = vcombine.high %v409_v30, %v413_v32  ;;  %v401_v40 = vld [vmem:[%s9163_s1 + $0xb00] sm:$0xff]  ;;  %v5899_v44 = vcombine.low %v409_v30, %v413_v32  ;;  %v5646_v55 = vcombine.high %v154_v50, %v158_v51  ;;  %v226_v30 = vld [vmem:[%s9163_s1 + $0x588] sm:$0xff] }
  0x5b   :  { %v405_v41 = vld [vmem:[%s9163_s1 + $0xb20] sm:$0xff]  ;;  %v230_v32 = vld [vmem:[%s9163_s1 + $0x5a8] sm:$0xff] }
  0x5c   :  { %2618 = vmatpush1.bf16.msra.mxu1 %v5573_v0  ;;  %v5892_v46 = vcombine.high %v401_v40, %v405_v41  ;;  %v393_v48 = vld [vmem:[%s9163_s1 + $0xac0] sm:$0xff]  ;;  %v5891_v52 = vcombine.low %v401_v40, %v405_v41  ;;  %v218_v41 = vld [vmem:[%s9163_s1 + $0x548] sm:$0xff] }
  0x5d   :  { %2540 = vmatpush1.bf16.msra.mxu0 %v5811_v63  ;;  %2619 = vmatprep.subr.bf16.mxu1 %v5566_v2  ;;  %v397_v49 = vld [vmem:[%s9163_s1 + $0xae0] sm:$0xff]  ;;  %v5645_v63 = vcombine.low %v154_v50, %v158_v51  ;;  %v222_v42 = vld [vmem:[%s9163_s1 + $0x568] sm:$0xff] }
  0x5e   :  { %2541 = vmatprep.subr.bf16.mxu0 %v5804_v1  ;;  %v5884_v54 = vcombine.high %v393_v48, %v397_v49  ;;  %v385_v56 = vld [vmem:[%s9163_s1 + $0xa80] sm:$0xff]  ;;  %v5883_v62 = vcombine.low %v393_v48, %v397_v49  ;;  %v5638_v1 = vcombine.high %v146_v60, %v150_v61  ;;  %v362_v43 = vld [vmem:[%s9163_s1 + $0x9c8] sm:$0xff] }
  0x5f   :  { %v389_v57 = vld [vmem:[%s9163_s1 + $0xaa0] sm:$0xff]  ;;  %v210_v49 = vld [vmem:[%s9163_s1 + $0x508] sm:$0xff] }
  0x60   :  { %2620 = vmatpush1.bf16.msra.mxu1 %v5565_v8  ;;  %v5876_v0 = vcombine.high %v385_v56, %v389_v57  ;;  %v377_v2 = vld [vmem:[%s9163_s1 + $0xa40] sm:$0xff]  ;;  %v5875_v6 = vcombine.low %v385_v56, %v389_v57  ;;  %v214_v50 = vld [vmem:[%s9163_s1 + $0x528] sm:$0xff] }
  0x61   :  { %2542 = vmatpush1.bf16.msra.mxu0 %v5803_v7  ;;  %2621 = vmatprep.subr.bf16.mxu1 %v5558_v10  ;;  %v381_v3 = vld [vmem:[%s9163_s1 + $0xa60] sm:$0xff]  ;;  %v5637_v7 = vcombine.low %v146_v60, %v150_v61  ;;  %v354_v51 = vld [vmem:[%s9163_s1 + $0x988] sm:$0xff] }
  0x62   :  { %2543 = vmatprep.subr.bf16.mxu0 %v5796_v9  ;;  %v5868_v8 = vcombine.high %v377_v2, %v381_v3  ;;  %v5630_v9 = vcombine.high %v138_v4, %v142_v5  ;;  %v369_v10 = vld [vmem:[%s9163_s1 + $0xa00] sm:$0xff]  ;;  %v5867_v14 = vcombine.low %v377_v2, %v381_v3  ;;  %v202_v57 = vld [vmem:[%s9163_s1 + $0x4c8] sm:$0xff] }
  0x63   :  { %v373_v11 = vld [vmem:[%s9163_s1 + $0xa20] sm:$0xff]  ;;  %v206_v60 = vld [vmem:[%s9163_s1 + $0x4e8] sm:$0xff] }
  0x64   :  { %2622 = vmatpush1.bf16.msra.mxu1 %v5557_v17  ;;  %v5860_v17 = vcombine.high %v369_v10, %v373_v11  ;;  %v5859_v24 = vcombine.low %v369_v10, %v373_v11  ;;  %v346_v61 = vld [vmem:[%s9163_s1 + $0x948] sm:$0xff] }
  0x65   :  { %2544 = vmatpush1.bf16.msra.mxu0 %v5795_v15  ;;  %2623 = vmatprep.subr.bf16.mxu1 %v5550_v20  ;;  %v5629_v15 = vcombine.low %v138_v4, %v142_v5  ;;  %v234_v20 = vld [vmem:[%s9163_s1 + $0x5c8] sm:$0xff] }
  0x66   :  { %2545 = vmatprep.subr.bf16.mxu0 %v5916_v18  ;;  %v5622_v18 = vcombine.high %v130_v12, %v134_v13  ;;  %v194_v3 = vld [vmem:[%s9163_s1 + $0x488] sm:$0xff] }
  0x67   :  { %v198_v4 = vld [vmem:[%s9163_s1 + $0x4a8] sm:$0xff] }
  0x68   :  { %2624 = vmatpush1.bf16.msra.mxu1 %v5549_v26  ;;  %v5621_v26 = vcombine.low %v130_v12, %v134_v13  ;;  %v338_v5 = vld [vmem:[%s9163_s1 + $0x908] sm:$0xff] }
  0x69   :  { %2546 = vmatpush2.bf16.msra.mxu0 %v5915_v25  ;;  %2625 = vmatprep.subr.bf16.mxu1 %v5542_v29  ;;  %v39_v25 = vld [vmem:[%s9164_s0 + $0x20] sm:$0xff]  ;;  %v5614_v29 = vcombine.high %v122_v22, %v126_v23  ;;  %v186_v11 = vld [vmem:[%s9163_s1 + $0x448] sm:$0xff] }
  0x6a   :  { %2547 = vmatprep.subr.bf16.mxu0 %v5908_v28  ;;  %v5726_v28 = vcombine.high %v234_v20, %v238_v21  ;;  %v7232_v33 = vpack.c.bf16 %v39_v25, %v39_v25  ;;  %v190_v12 = vld [vmem:[%s9163_s1 + $0x468] sm:$0xff] }
  0x6b   :  { %v330_v13 = vld [vmem:[%s9163_s1 + $0x8c8] sm:$0xff]  ;;  %v5677_v25 = vcombine.low %v186_v11, %v190_v12 }
  0x6c   :  { %2626 = vmatpush1.bf16.msra.mxu1 %v5541_v36  ;;  %v5725_v36 = vcombine.low %v234_v20, %v238_v21  ;;  %v178_v21 = vld [vmem:[%s9163_s1 + $0x408] sm:$0xff] }
  0x6d   :  { %2548 = vmatpush2.bf16.msra.mxu0 %v5907_v35  ;;  %2627 = vmatprep.subr.bf16.mxu1 %v5662_v39  ;;  %v118_v35 = vld [vmem:[%s9163_s1 + $0x228] sm:$0xff]  ;;  %v5718_v39 = vcombine.high %v226_v30, %v230_v32 }
  0x6e   :  { %2549 = vmatprep.subr.bf16.mxu0 %v5900_v38  ;;  %v5613_v38 = vcombine.low %v122_v22, %v126_v23  ;;  %v5606_v40 = vcombine.high %v114_v34, %v118_v35  ;;  %v182_v22 = vld [vmem:[%s9163_s1 + $0x428] sm:$0xff] }
  0x6f   :  { %v322_v23 = vld [vmem:[%s9163_s1 + $0x888] sm:$0xff] }
  0x70   :  { %2628 = vmatpush2.bf16.msra.mxu1 %v5661_v45  ;;  %v5717_v45 = vcombine.low %v226_v30, %v230_v32  ;;  %v298_v30 = vld [vmem:[%s9163_s1 + $0x7c8] sm:$0xff] }
  0x71   :  { %2550 = vmatpush2.bf16.msra.mxu0 %v5899_v44  ;;  %2629 = vmatprep.subr.bf16.mxu1 %v5654_v47  ;;  %v366_v44 = vld [vmem:[%s9163_s1 + $0x9e8] sm:$0xff]  ;;  %v5710_v47 = vcombine.high %v218_v41, %v222_v42 }
  0x72   :  { %2551 = vmatprep.subr.bf16.mxu0 %v5892_v46  ;;  %v5605_v46 = vcombine.low %v114_v34, %v118_v35  ;;  %v5854_v48 = vcombine.high %v362_v43, %v366_v44  ;;  %v302_v32 = vld [vmem:[%s9163_s1 + $0x7e8] sm:$0xff] }
  0x73   :  { %v314_v34 = vld [vmem:[%s9163_s1 + $0x848] sm:$0xff] }
  0x74   :  { %2630 = vmatpush2.bf16.msra.mxu1 %v5653_v53  ;;  %v5709_v53 = vcombine.low %v218_v41, %v222_v42  ;;  %v318_v35 = vld [vmem:[%s9163_s1 + $0x868] sm:$0xff] }
  0x75   :  { %2552 = vmatpush2.bf16.msra.mxu0 %v5891_v52  ;;  %2631 = vmatprep.subr.bf16.mxu1 %v5646_v55  ;;  %v358_v52 = vld [vmem:[%s9163_s1 + $0x9a8] sm:$0xff]  ;;  %v5702_v55 = vcombine.high %v210_v49, %v214_v50 }
  0x76   :  { %2553 = vmatprep.subr.bf16.mxu0 %v5884_v54  ;;  %v5853_v54 = vcombine.low %v362_v43, %v366_v44  ;;  %v5846_v56 = vcombine.high %v354_v51, %v358_v52  ;;  %v290_v41 = vld [vmem:[%s9163_s1 + $0x788] sm:$0xff] }
  0x77   :  { %v294_v42 = vld [vmem:[%s9163_s1 + $0x7a8] sm:$0xff] }
  0x78   :  { %2632 = vmatpush2.bf16.msra.mxu1 %v5645_v63  ;;  %v5701_v63 = vcombine.low %v210_v49, %v214_v50  ;;  %v306_v43 = vld [vmem:[%s9163_s1 + $0x808] sm:$0xff] }
  0x79   :  { %2554 = vmatpush2.bf16.msra.mxu0 %v5883_v62  ;;  %2633 = vmatprep.subr.bf16.mxu1 %v5638_v1  ;;  %v350_v62 = vld [vmem:[%s9163_s1 + $0x968] sm:$0xff]  ;;  %v5694_v1 = vcombine.high %v202_v57, %v206_v60 }
  0x7a   :  { %2555 = vmatprep.subr.bf16.mxu0 %v5876_v0  ;;  %v5845_v0 = vcombine.low %v354_v51, %v358_v52  ;;  %v5838_v2 = vcombine.high %v346_v61, %v350_v62  ;;  %v310_v44 = vld [vmem:[%s9163_s1 + $0x828] sm:$0xff] }
  0x7b   :  { %v282_v49 = vld [vmem:[%s9163_s1 + $0x748] sm:$0xff] }
  0x7c   :  { %2634 = vmatpush2.bf16.msra.mxu1 %v5637_v7  ;;  %v5693_v7 = vcombine.low %v202_v57, %v206_v60  ;;  %v286_v50 = vld [vmem:[%s9163_s1 + $0x768] sm:$0xff] }
  0x7d   :  { %2556 = vmatpush2.bf16.msra.mxu0 %v5875_v6  ;;  %2635 = vmatprep.subr.bf16.mxu1 %v5630_v9  ;;  %v342_v6 = vld [vmem:[%s9163_s1 + $0x928] sm:$0xff]  ;;  %v5686_v9 = vcombine.high %v194_v3, %v198_v4 }
  0x7e   :  { %2557 = vmatprep.subr.bf16.mxu0 %v5868_v8  ;;  %v5837_v8 = vcombine.low %v346_v61, %v350_v62  ;;  %v5830_v10 = vcombine.high %v338_v5, %v342_v6  ;;  %v426_v51 = vld [vmem:[%s9163_s1 + $0xbc8] sm:$0xff] }
  0x7f   :  { %v430_v52 = vld [vmem:[%s9163_s1 + $0xbe8] sm:$0xff] }
  0x80   :  { %2636 = vmatpush2.bf16.msra.mxu1 %v5629_v15  ;;  %v5685_v15 = vcombine.low %v194_v3, %v198_v4  ;;  %v274_v57 = vld [vmem:[%s9163_s1 + $0x708] sm:$0xff] }
  0x81   :  { %2558 = vmatpush2.bf16.msra.mxu0 %v5867_v14  ;;  %2637 = vmatprep.subr.bf16.mxu1 %v5622_v18  ;;  %v334_v14 = vld [vmem:[%s9163_s1 + $0x8e8] sm:$0xff]  ;;  %v5678_v18 = vcombine.high %v186_v11, %v190_v12 }
  0x82   :  { %2559 = vmatprep.subr.bf16.mxu0 %v5860_v17  ;;  %v5829_v17 = vcombine.low %v338_v5, %v342_v6  ;;  %v5822_v20 = vcombine.high %v330_v13, %v334_v14  ;;  %v278_v60 = vld [vmem:[%s9163_s1 + $0x728] sm:$0xff] }
  0x83   :  { %v418_v61 = vld [vmem:[%s9163_s1 + $0xb88] sm:$0xff] }
  0x84   :  { %2638 = vmatpush2.bf16.msra.mxu1 %v5621_v26  ;;  %v5821_v26 = vcombine.low %v330_v13, %v334_v14  ;;  %v422_v62 = vld [vmem:[%s9163_s1 + $0xba8] sm:$0xff] }
  0x85   :  { %2560 = vmatpush2.bf16.msra.mxu0 %v5859_v24  ;;  %2639 = vmatprep.subr.bf16.mxu1 %v5614_v29  ;;  %v326_v24 = vld [vmem:[%s9163_s1 + $0x8a8] sm:$0xff] }
  0x86   :  { %2652 = vmatprep.subr.bf16.mxu0 %v5726_v28  ;;  %v5670_v28 = vcombine.high %v178_v21, %v182_v22  ;;  %v5814_v29 = vcombine.high %v322_v23, %v326_v24  ;;  %v266_v3 = vld [vmem:[%s9163_s1 + $0x6c8] sm:$0xff] }
  0x87   :  { %v270_v4 = vld [vmem:[%s9163_s1 + $0x6e8] sm:$0xff] }
  0x88   :  { %2562 = vmatmul.mubr.bf16.vlgmr.msra.gmra.mxu0 %v7232_v33  ;;  %2640 = vmatpush2.bf16.msra.mxu1 %v5613_v38  ;;  %v5813_v38 = vcombine.low %v322_v23, %v326_v24  ;;  %v410_v5 = vld [vmem:[%s9163_s1 + $0xb48] sm:$0xff] }
  0x89   :  { %2653 = vmatpush1.bf16.msra.mxu0 %v5725_v36  ;;  %2684 = vmatprep.mubr.bf16.mxu0 %v6892_v59  ;;  %v5669_v36 = vcombine.low %v178_v21, %v182_v22  ;;  %v414_v6 = vld [vmem:[%s9163_s1 + $0xb68] sm:$0xff] }
  0x8a   :  { %2654 = vmatprep.subr.bf16.mxu0 %v5718_v39  ;;  %2641 = vmatprep.subr.bf16.mxu1 %v5606_v40  ;;  %v5790_v39 = vcombine.high %v298_v30, %v302_v32  ;;  %v5806_v40 = vcombine.high %v314_v34, %v318_v35  ;;  %v258_v11 = vld [vmem:[%s9163_s1 + $0x688] sm:$0xff] }
  0x8b   :  { %v262_v12 = vld [vmem:[%s9163_s1 + $0x6a8] sm:$0xff] }
  0x8c   :  { %2642 = vmatpush2.bf16.msra.mxu1 %v5605_v46  ;;  %v5805_v46 = vcombine.low %v314_v34, %v318_v35  ;;  %v402_v13 = vld [vmem:[%s9163_s1 + $0xb08] sm:$0xff] }
  0x8d   :  { %2655 = vmatpush1.bf16.msra.mxu0 %v5717_v45  ;;  %2693 = vmatprep.subr.bf16.mxu1 %v5854_v48  ;;  %v5789_v45 = vcombine.low %v298_v30, %v302_v32  ;;  %v5798_v48 = vcombine.high %v306_v43, %v310_v44  ;;  %v406_v14 = vld [vmem:[%s9163_s1 + $0xb28] sm:$0xff] }
  0x8e   :  { %2656 = vmatprep.subr.bf16.mxu0 %v5710_v47  ;;  %v5782_v47 = vcombine.high %v290_v41, %v294_v42  ;;  %v250_v21 = vld [vmem:[%s9163_s1 + $0x648] sm:$0xff] }
  0x8f   :  { %2644 = vmatmul.mubr.bf16.vlgmr.msra.gmra.mxu1 %v7022_v16  ;;  %v254_v22 = vld [vmem:[%s9163_s1 + $0x668] sm:$0xff] }
  0x90   :  { %2694 = vmatpush1.bf16.msra.mxu1 %v5853_v54  ;;  %2725 = vmatprep.mubr.bf16.mxu1 %v7042_v27  ;;  %v5797_v54 = vcombine.low %v306_v43, %v310_v44  ;;  %v394_v23 = vld [vmem:[%s9163_s1 + $0xac8] sm:$0xff] }
  0x91   :  { %2657 = vmatpush1.bf16.msra.mxu0 %v5709_v53  ;;  %2695 = vmatprep.subr.bf16.mxu1 %v5846_v56  ;;  %v5781_v53 = vcombine.low %v290_v41, %v294_v42  ;;  %v5918_v56 = vcombine.high %v426_v51, %v430_v52  ;;  %v398_v24 = vld [vmem:[%s9163_s1 + $0xae8] sm:$0xff] }
  0x92   :  { %2658 = vmatprep.subr.bf16.mxu0 %v5702_v55  ;;  %v5774_v55 = vcombine.high %v282_v49, %v286_v50  ;;  %v242_v30 = vld [vmem:[%s9163_s1 + $0x608] sm:$0xff] }
  0x93   :  { %v246_v32 = vld [vmem:[%s9163_s1 + $0x628] sm:$0xff] }
  0x94   :  { %2696 = vmatpush1.bf16.msra.mxu1 %v5845_v0  ;;  %v5917_v0 = vcombine.low %v426_v51, %v430_v52  ;;  %v386_v34 = vld [vmem:[%s9163_s1 + $0xa88] sm:$0xff] }
  0x95   :  { %2659 = vmatpush1.bf16.msra.mxu0 %v5701_v63  ;;  %2697 = vmatprep.subr.bf16.mxu1 %v5838_v2  ;;  %v5773_v63 = vcombine.low %v282_v49, %v286_v50  ;;  %v5910_v2 = vcombine.high %v418_v61, %v422_v62  ;;  %v390_v35 = vld [vmem:[%s9163_s1 + $0xaa8] sm:$0xff]  ;;  %v107_v49 = vld [vmem:[%s9163_s1 + $0x1d0] sm:$0xff] }
  0x96   :  { %2660 = vmatprep.subr.bf16.mxu0 %v5694_v1  ;;  %v5766_v1 = vcombine.high %v274_v57, %v278_v60  ;;  %v434_v41 = vld [vmem:[%s9163_s1 + $0xc08] sm:$0xff]  ;;  %v111_v50 = vld [vmem:[%s9163_s1 + $0x1f0] sm:$0xff] }
  0x97   :  { %v438_v42 = vld [vmem:[%s9163_s1 + $0xc28] sm:$0xff] }
  0x98   :  { %2698 = vmatpush1.bf16.msra.mxu1 %v5837_v8  ;;  %v5909_v8 = vcombine.low %v418_v61, %v422_v62  ;;  %v378_v43 = vld [vmem:[%s9163_s1 + $0xa48] sm:$0xff] }
  0x99   :  { %2661 = vmatpush1.bf16.msra.mxu0 %v5693_v7  ;;  %2699 = vmatprep.subr.bf16.mxu1 %v5830_v10  ;;  %v5765_v7 = vcombine.low %v274_v57, %v278_v60  ;;  %v5902_v10 = vcombine.high %v410_v5, %v414_v6  ;;  %v382_v44 = vld [vmem:[%s9163_s1 + $0xa68] sm:$0xff]  ;;  %v235_v57 = vld [vmem:[%s9163_s1 + $0x5d0] sm:$0xff] }
  0x9a   :  { %2662 = vmatprep.subr.bf16.mxu0 %v5686_v9  ;;  %v5758_v9 = vcombine.high %v266_v3, %v270_v4  ;;  %v370_v51 = vld [vmem:[%s9163_s1 + $0xa08] sm:$0xff]  ;;  %v239_v60 = vld [vmem:[%s9163_s1 + $0x5f0] sm:$0xff] }
  0x9b   :  { %v374_v52 = vld [vmem:[%s9163_s1 + $0xa28] sm:$0xff]  ;;  %v5728_v62 = vcombine.high %v235_v57, %v239_v60 }
  0x9c   :  { %2700 = vmatpush1.bf16.msra.mxu1 %v5829_v17  ;;  %v5901_v17 = vcombine.low %v410_v5, %v414_v6  ;;  %v5861_v61 = vcombine.low %v370_v51, %v374_v52 }
  0x9d   :  { %2663 = vmatpush1.bf16.msra.mxu0 %v5685_v15  ;;  %2701 = vmatprep.subr.bf16.mxu1 %v5822_v20  ;;  %v5757_v15 = vcombine.low %v266_v3, %v270_v4  ;;  %v5894_v20 = vcombine.high %v402_v13, %v406_v14  ;;  %v5599_v3 = vcombine.low %v107_v49, %v111_v50 }
  0x9e   :  { %2664 = vmatprep.subr.bf16.mxu0 %v5678_v18  ;;  %v5750_v18 = vcombine.high %v258_v11, %v262_v12  ;;  %v5727_v4 = vcombine.low %v235_v57, %v239_v60 }
  0xa0   :  { %2702 = vmatpush1.bf16.msra.mxu1 %v5821_v26  ;;  %v5893_v26 = vcombine.low %v402_v13, %v406_v14 }
  0xa1   :  { %2665 = vmatpush1.bf16.msra.mxu0 %v5677_v25  ;;  %2703 = vmatprep.subr.bf16.mxu1 %v5814_v29  ;;  %v5749_v25 = vcombine.low %v258_v11, %v262_v12  ;;  %v5886_v29 = vcombine.high %v394_v23, %v398_v24 }
  0xa2   :  { %2666 = vmatprep.subr.bf16.mxu0 %v5670_v28  ;;  %v5742_v28 = vcombine.high %v250_v21, %v254_v22 }
  0xa4   :  { %2704 = vmatpush1.bf16.msra.mxu1 %v5813_v38  ;;  %v5885_v38 = vcombine.low %v394_v23, %v398_v24 }
  0xa5   :  { %2667 = vmatpush1.bf16.msra.mxu0 %v5669_v36  ;;  %2705 = vmatprep.subr.bf16.mxu1 %v5806_v40  ;;  %v5741_v36 = vcombine.low %v250_v21, %v254_v22  ;;  %v5878_v40 = vcombine.high %v386_v34, %v390_v35 }
  0xa6   :  { %2668 = vmatprep.subr.bf16.mxu0 %v5790_v39  ;;  %v5734_v39 = vcombine.high %v242_v30, %v246_v32 }
  0xa8   :  { %2706 = vmatpush1.bf16.msra.mxu1 %v5805_v46  ;;  %v5877_v46 = vcombine.low %v386_v34, %v390_v35 }
  0xa9   :  { %2669 = vmatpush2.bf16.msra.mxu0 %v5789_v45  ;;  %2707 = vmatprep.subr.bf16.mxu1 %v5798_v48  ;;  %v5733_v45 = vcombine.low %v242_v30, %v246_v32  ;;  %v5870_v48 = vcombine.high %v378_v43, %v382_v44 }
  0xaa   :  { %2670 = vmatprep.subr.bf16.mxu0 %v5782_v47  ;;  %v5926_v47 = vcombine.high %v434_v41, %v438_v42 }
  0xac   :  { %2708 = vmatpush1.bf16.msra.mxu1 %v5797_v54  ;;  %v5869_v54 = vcombine.low %v378_v43, %v382_v44 }
  0xad   :  { %2671 = vmatpush2.bf16.msra.mxu0 %v5781_v53  ;;  %2709 = vmatprep.subr.bf16.mxu1 %v5918_v56  ;;  %v5925_v53 = vcombine.low %v434_v41, %v438_v42  ;;  %v5862_v56 = vcombine.high %v370_v51, %v374_v52 }
  0xae   :  { %2672 = vmatprep.subr.bf16.mxu0 %v5774_v55  ;;  %v5600_v55 = vcombine.high %v107_v49, %v111_v50 }
  0xb0   :  { %2710 = vmatpush2.bf16.msra.mxu1 %v5917_v0  ;;  %v103_v0 = vld [vmem:[%s9163_s1 + $0x1b0] sm:$0xff] }
  0xb1   :  { %2673 = vmatpush2.bf16.msra.mxu0 %v5773_v63  ;;  %2711 = vmatprep.subr.bf16.mxu1 %v5910_v2  ;;  %v99_v63 = vld [vmem:[%s9163_s1 + $0x190] sm:$0xff] }
  0xb2   :  { %2674 = vmatprep.subr.bf16.mxu0 %v5766_v1  ;;  %v227_v1 = vld [vmem:[%s9163_s1 + $0x590] sm:$0xff]  ;;  %v5592_v5 = vcombine.high %v99_v63, %v103_v0  ;;  %v5591_v11 = vcombine.low %v99_v63, %v103_v0 }
  0xb3   :  { %v231_v2 = vld [vmem:[%s9163_s1 + $0x5b0] sm:$0xff] }
  0xb4   :  { %2712 = vmatpush2.bf16.msra.mxu1 %v5909_v8  ;;  %v5720_v6 = vcombine.high %v227_v1, %v231_v2  ;;  %v95_v8 = vld [vmem:[%s9163_s1 + $0x170] sm:$0xff]  ;;  %v5719_v12 = vcombine.low %v227_v1, %v231_v2 }
  0xb5   :  { %2675 = vmatpush2.bf16.msra.mxu0 %v5765_v7  ;;  %2713 = vmatprep.subr.bf16.mxu1 %v5902_v10  ;;  %v91_v7 = vld [vmem:[%s9163_s1 + $0x150] sm:$0xff] }
  0xb6   :  { %2676 = vmatprep.subr.bf16.mxu0 %v5758_v9  ;;  %v219_v9 = vld [vmem:[%s9163_s1 + $0x550] sm:$0xff]  ;;  %v5584_v13 = vcombine.high %v91_v7, %v95_v8  ;;  %v5583_v21 = vcombine.low %v91_v7, %v95_v8 }
  0xb7   :  { %v223_v10 = vld [vmem:[%s9163_s1 + $0x570] sm:$0xff] }
  0xb8   :  { %2714 = vmatpush2.bf16.msra.mxu1 %v5901_v17  ;;  %v5712_v14 = vcombine.high %v219_v9, %v223_v10  ;;  %v87_v17 = vld [vmem:[%s9163_s1 + $0x130] sm:$0xff]  ;;  %v5711_v22 = vcombine.low %v219_v9, %v223_v10 }
  0xb9   :  { %2677 = vmatpush2.bf16.msra.mxu0 %v5757_v15  ;;  %2715 = vmatprep.subr.bf16.mxu1 %v5894_v20  ;;  %v83_v15 = vld [vmem:[%s9163_s1 + $0x110] sm:$0xff] }
  0xba   :  { %2678 = vmatprep.subr.bf16.mxu0 %v5750_v18  ;;  %v211_v18 = vld [vmem:[%s9163_s1 + $0x510] sm:$0xff]  ;;  %v5576_v23 = vcombine.high %v83_v15, %v87_v17  ;;  %v5575_v30 = vcombine.low %v83_v15, %v87_v17 }
  0xbb   :  { %v215_v20 = vld [vmem:[%s9163_s1 + $0x530] sm:$0xff] }
  0xbc   :  { %2716 = vmatpush2.bf16.msra.mxu1 %v5893_v26  ;;  %v5704_v24 = vcombine.high %v211_v18, %v215_v20  ;;  %v79_v26 = vld [vmem:[%s9163_s1 + $0xf0] sm:$0xff]  ;;  %v5703_v32 = vcombine.low %v211_v18, %v215_v20 }
  0xbd   :  { %2679 = vmatpush2.bf16.msra.mxu0 %v5749_v25  ;;  %2717 = vmatprep.subr.bf16.mxu1 %v5886_v29  ;;  %v75_v25 = vld [vmem:[%s9163_s1 + $0xd0] sm:$0xff] }
  0xbe   :  { %2680 = vmatprep.subr.bf16.mxu0 %v5742_v28  ;;  %v203_v28 = vld [vmem:[%s9163_s1 + $0x4d0] sm:$0xff]  ;;  %v5568_v34 = vcombine.high %v75_v25, %v79_v26  ;;  %v5567_v41 = vcombine.low %v75_v25, %v79_v26 }
  0xbf   :  { %v207_v29 = vld [vmem:[%s9163_s1 + $0x4f0] sm:$0xff] }
  0xc0   :  { %2718 = vmatpush2.bf16.msra.mxu1 %v5885_v38  ;;  %v5696_v35 = vcombine.high %v203_v28, %v207_v29  ;;  %v71_v38 = vld [vmem:[%s9163_s1 + $0xb0] sm:$0xff]  ;;  %v5695_v42 = vcombine.low %v203_v28, %v207_v29 }
  0xc1   :  { %2681 = vmatpush2.bf16.msra.mxu0 %v5741_v36  ;;  %2719 = vmatprep.subr.bf16.mxu1 %v5878_v40  ;;  %v67_v36 = vld [vmem:[%s9163_s1 + $0x90] sm:$0xff] }
  0xc2   :  { %2682 = vmatprep.subr.bf16.mxu0 %v5734_v39  ;;  %v195_v39 = vld [vmem:[%s9163_s1 + $0x490] sm:$0xff]  ;;  %v5560_v43 = vcombine.high %v67_v36, %v71_v38  ;;  %v5559_v49 = vcombine.low %v67_v36, %v71_v38 }
  0xc3   :  { %v199_v40 = vld [vmem:[%s9163_s1 + $0x4b0] sm:$0xff] }
  0xc4   :  { %2720 = vmatpush2.bf16.msra.mxu1 %v5877_v46  ;;  %v5688_v44 = vcombine.high %v195_v39, %v199_v40  ;;  %v63_v46 = vld [vmem:[%s9163_s1 + $0x70] sm:$0xff]  ;;  %v5687_v50 = vcombine.low %v195_v39, %v199_v40 }
  0xc5   :  { %2683 = vmatpush2.bf16.msra.mxu0 %v5733_v45  ;;  %2721 = vmatprep.subr.bf16.mxu1 %v5870_v48  ;;  %v59_v45 = vld [vmem:[%s9163_s1 + $0x50] sm:$0xff] }
  0xc6   :  { %2748 = vmatprep.subr.bf16.mxu0 %v5926_v47  ;;  %v187_v47 = vld [vmem:[%s9163_s1 + $0x450] sm:$0xff]  ;;  %v5552_v51 = vcombine.high %v59_v45, %v63_v46  ;;  %v5551_v57 = vcombine.low %v59_v45, %v63_v46 }
  0xc7   :  { %v191_v48 = vld [vmem:[%s9163_s1 + $0x470] sm:$0xff] }
  0xc8   :  { %2685 = vmatmul.mubr.bf16.vlgmr.msra.gmra.mxu0 %v7030_v19  ;;  %2722 = vmatpush2.bf16.msra.mxu1 %v5869_v54  ;;  %v5680_v52 = vcombine.high %v187_v47, %v191_v48  ;;  %v55_v54 = vld [vmem:[%s9163_s1 + $0x30] sm:$0xff]  ;;  %v5679_v60 = vcombine.low %v187_v47, %v191_v48 }
  0xc9   :  { %2749 = vmatpush1.bf16.msra.mxu0 %v5925_v53  ;;  %2766 = vmatprep.mubr.bf16.mxu0 %v6743_v31  ;;  %v51_v53 = vld [vmem:[%s9163_s1 + $0x10] sm:$0xff] }
  0xca   :  { %2775 = vmatprep.subr.bf16.mxu0 %v5600_v55  ;;  %2723 = vmatprep.subr.bf16.mxu1 %v5862_v56  ;;  %v179_v55 = vld [vmem:[%s9163_s1 + $0x410] sm:$0xff] }
  0xcb   :  { %v183_v56 = vld [vmem:[%s9163_s1 + $0x430] sm:$0xff] }
  0xcc   :  { %2724 = vmatpush2.bf16.msra.mxu1 %v5861_v61  ;;  %v5544_v61 = vcombine.high %v51_v53, %v55_v54  ;;  %v171_v63 = vld [vmem:[%s9163_s1 + $0x3d0] sm:$0xff] }
  0xcd   :  { %2816 = vmatprep.subr.bf16.mxu1 %v5728_v62  ;;  %v5672_v62 = vcombine.high %v179_v55, %v183_v56  ;;  %v175_v0 = vld [vmem:[%s9163_s1 + $0x3f0] sm:$0xff] }
  0xce   :  { %v299_v1 = vld [vmem:[%s9163_s1 + $0x7d0] sm:$0xff] }
  0xcf   :  { %2726 = vmatmul.mubr.bf16.vlgmr.msra.gmra.mxu1 %v7232_v33  ;;  %v303_v2 = vld [vmem:[%s9163_s1 + $0x7f0] sm:$0xff] }
  0xd0   :  { %5932 = vmatmul.mubr.msk.bf16.vlgmr.msra.gmra.mxu0 %vm2443_vm0, %v7062_v37  ;;  %2817 = vmatpush1.bf16.msra.mxu1 %v5727_v4  ;;  %v5671_v4 = vcombine.low %v179_v55, %v183_v56  ;;  %v163_v7 = vld [vmem:[%s9163_s1 + $0x390] sm:$0xff] }
  0xd1   :  { %2776 = vmatpush1.bf16.msra.mxu0 %v5599_v3  ;;  %2818 = vmatprep.subr.bf16.mxu1 %v5720_v6  ;;  %v5543_v3 = vcombine.low %v51_v53, %v55_v54  ;;  %v5792_v6 = vcombine.high %v299_v1, %v303_v2  ;;  %v167_v8 = vld [vmem:[%s9163_s1 + $0x3b0] sm:$0xff] }
  0xd2   :  { %2777 = vmatprep.subr.bf16.mxu0 %v5592_v5  ;;  %2807 = vmatprep.mubr.bf16.mxu0 %v6890_v58  ;;  %v5664_v5 = vcombine.high %v171_v63, %v175_v0  ;;  %v291_v9 = vld [vmem:[%s9163_s1 + $0x790] sm:$0xff] }
  0xd3   :  { %2848 = vmatprep.mubr.bf16.mxu1 %v6892_v59  ;;  %v295_v10 = vld [vmem:[%s9163_s1 + $0x7b0] sm:$0xff] }
  0xd4   :  { %2819 = vmatpush1.bf16.msra.mxu1 %v5719_v12  ;;  %v5791_v12 = vcombine.low %v299_v1, %v303_v2  ;;  %v155_v15 = vld [vmem:[%s9163_s1 + $0x350] sm:$0xff]  ;;  %v441_v1 = vld [vmem:[%s9165_s2] sm:$0xff] }
  0xd5   :  { %2778 = vmatpush1.bf16.msra.mxu0 %v5591_v11  ;;  %2820 = vmatprep.subr.bf16.mxu1 %v5712_v14  ;;  %v5663_v11 = vcombine.low %v171_v63, %v175_v0  ;;  %v5784_v14 = vcombine.high %v291_v9, %v295_v10  ;;  %v159_v17 = vld [vmem:[%s9163_s1 + $0x370] sm:$0xff] }
  0xd6   :  { %2779 = vmatprep.subr.bf16.mxu0 %v5584_v13  ;;  %v5656_v13 = vcombine.high %v163_v7, %v167_v8  ;;  %v283_v18 = vld [vmem:[%s9163_s1 + $0x750] sm:$0xff] }
  0xd7   :  { %v287_v20 = vld [vmem:[%s9163_s1 + $0x770] sm:$0xff] }
  0xd8   :  { %2821 = vmatpush1.bf16.msra.mxu1 %v5711_v22  ;;  %v5783_v22 = vcombine.low %v291_v9, %v295_v10  ;;  %v147_v25 = vld [vmem:[%s9163_s1 + $0x310] sm:$0xff] }
  0xd9   :  { %2780 = vmatpush1.bf16.msra.mxu0 %v5583_v21  ;;  %2822 = vmatprep.subr.bf16.mxu1 %v5704_v24  ;;  %v5655_v21 = vcombine.low %v163_v7, %v167_v8  ;;  %v5776_v24 = vcombine.high %v283_v18, %v287_v20  ;;  %v151_v26 = vld [vmem:[%s9163_s1 + $0x330] sm:$0xff] }
  0xda   :  { %2781 = vmatprep.subr.bf16.mxu0 %v5576_v23  ;;  %v5648_v23 = vcombine.high %v155_v15, %v159_v17  ;;  %v275_v28 = vld [vmem:[%s9163_s1 + $0x710] sm:$0xff] }
  0xdb   :  { %v279_v29 = vld [vmem:[%s9163_s1 + $0x730] sm:$0xff] }
  0xdc   :  { %2823 = vmatpush1.bf16.msra.mxu1 %v5703_v32  ;;  %v5775_v32 = vcombine.low %v283_v18, %v287_v20  ;;  %v139_v36 = vld [vmem:[%s9163_s1 + $0x2d0] sm:$0xff] }
  0xdd   :  { %2782 = vmatpush1.bf16.msra.mxu0 %v5575_v30  ;;  %2824 = vmatprep.subr.bf16.mxu1 %v5696_v35  ;;  %v5647_v30 = vcombine.low %v155_v15, %v159_v17  ;;  %v5768_v35 = vcombine.high %v275_v28, %v279_v29  ;;  %v143_v38 = vld [vmem:[%s9163_s1 + $0x2f0] sm:$0xff] }
  0xde   :  { %2783 = vmatprep.subr.bf16.mxu0 %v5568_v34  ;;  %v5640_v34 = vcombine.high %v147_v25, %v151_v26  ;;  %v267_v39 = vld [vmem:[%s9163_s1 + $0x6d0] sm:$0xff] }
  0xdf   :  { %v271_v40 = vld [vmem:[%s9163_s1 + $0x6f0] sm:$0xff] }
  0xe0   :  { %2825 = vmatpush1.bf16.msra.mxu1 %v5695_v42  ;;  %v443_v42 = vlaneseq  ;;  %v5760_v45 = vcombine.high %v267_v39, %v271_v40  ;;  %v131_v46 = vld [vmem:[%s9163_s1 + $0x290] sm:$0xff] }
  0xe1   :  { %2784 = vmatpush1.bf16.msra.mxu0 %v5567_v41  ;;  %2826 = vmatprep.subr.bf16.mxu1 %v5688_v44  ;;  %v5639_v41 = vcombine.low %v147_v25, %v151_v26  ;;  %v5632_v44 = vcombine.high %v139_v36, %v143_v38  ;;  %v135_v47 = vld [vmem:[%s9163_s1 + $0x2b0] sm:$0xff] }
  0xe2   :  { %2785 = vmatprep.subr.bf16.mxu0 %v5560_v43  ;;  %v5767_v43 = vcombine.low %v275_v28, %v279_v29  ;;  %v259_v48 = vld [vmem:[%s9163_s1 + $0x690] sm:$0xff]  ;;  %v5624_v53 = vcombine.high %v131_v46, %v135_v47 }
  0xe3   :  { %v123_v55 = vld [vmem:[%s9163_s1 + $0x250] sm:$0xff] }
  0xe4   :  { %2827 = vmatpush1.bf16.msra.mxu1 %v5687_v50  ;;  %v5631_v50 = vcombine.low %v139_v36, %v143_v38  ;;  %v127_v56 = vld [vmem:[%s9163_s1 + $0x270] sm:$0xff]  ;;  %v108_v38 = vld [vmem:[%s9163_s1 + $0x1d8] sm:$0xff] }
  0xe5   :  { %2786 = vmatpush1.bf16.msra.mxu0 %v5559_v49  ;;  %2828 = vmatprep.subr.bf16.mxu1 %v5680_v52  ;;  %v263_v49 = vld [vmem:[%s9163_s1 + $0x6b0] sm:$0xff]  ;;  %v5759_v52 = vcombine.low %v267_v39, %v271_v40  ;;  %v5616_v0 = vcombine.high %v123_v55, %v127_v56  ;;  %v5615_v8 = vcombine.low %v123_v55, %v127_v56  ;;  %v112_v39 = vld [vmem:[%s9163_s1 + $0x1f8] sm:$0xff] }
  0xe6   :  { %2787 = vmatprep.subr.bf16.mxu0 %v5552_v51  ;;  %v7605_v51 = vshrl.u32 %v443_v42, 7  ;;  %v5752_v54 = vcombine.high %v259_v48, %v263_v49  ;;  %v5751_v63 = vcombine.low %v259_v48, %v263_v49  ;;  %v247_v7 = vld [vmem:[%s9163_s1 + $0x630] sm:$0xff] }
  0xe7   :  { %v367_v15 = vld [vmem:[%s9163_s1 + $0x9f0] sm:$0xff] }
  0xe8   :  { %2829 = vmatpush1.bf16.msra.mxu1 %v5679_v60  ;;  %v255_v60 = vld [vmem:[%s9163_s1 + $0x670] sm:$0xff] }
  0xe9   :  { %2788 = vmatpush1.bf16.msra.mxu0 %v5551_v57  ;;  %2830 = vmatprep.subr.bf16.mxu1 %v5672_v62  ;;  %v251_v57 = vld [vmem:[%s9163_s1 + $0x650] sm:$0xff]  ;;  %v7620_v62 = vsub.s32 0, %v7605_v51 }
  0xea   :  { %2789 = vmatprep.subr.bf16.mxu0 %v5544_v61  ;;  %v5623_v61 = vcombine.low %v131_v46, %v135_v47  ;;  %v5744_v2 = vcombine.high %v251_v57, %v255_v60  ;;  %v5743_v10 = vcombine.low %v251_v57, %v255_v60  ;;  %v435_v18 = vld [vmem:[%s9163_s1 + $0xc10] sm:$0xff]  ;;  %v5602_v47 = vcombine.high %v108_v38, %v112_v39  ;;  %v100_v57 = vld [vmem:[%s9163_s1 + $0x198] sm:$0xff] }
  0xeb   :  { %v446_v9 = vrot.slane %v441_v1, %v7620_v62  ;;  %v439_v20 = vld [vmem:[%s9163_s1 + $0xc30] sm:$0xff]  ;;  %v104_v60 = vld [vmem:[%s9163_s1 + $0x1b8] sm:$0xff] }
  0xec   :  { %2831 = vmatpush1.bf16.msra.mxu1 %v5671_v4  ;;  %v115_v4 = vld [vmem:[%s9163_s1 + $0x210] sm:$0xff] }
  0xed   :  { %2790 = vmatpush1.bf16.msra.mxu0 %v5543_v3  ;;  %2832 = vmatprep.subr.bf16.mxu1 %v5792_v6  ;;  %v7626_v3 = vsub.s32 1, %v7605_v51  ;;  %v243_v6 = vld [vmem:[%s9163_s1 + $0x610] sm:$0xff] }
  0xee   :  { %2791 = vmatprep.subr.bf16.mxu0 %v5664_v5  ;;  %v119_v5 = vld [vmem:[%s9163_s1 + $0x230] sm:$0xff]  ;;  %v5735_v25 = vcombine.low %v243_v6, %v247_v7 }
  0xef   :  { %v347_v48 = vld [vmem:[%s9163_s1 + $0x950] sm:$0xff] }
  0xf0   :  { %2833 = vmatpush2.bf16.msra.mxu1 %v5791_v12  ;;  %v450_v12 = vrot.slane %v441_v1, %v7626_v3  ;;  %v351_v49 = vld [vmem:[%s9163_s1 + $0x970] sm:$0xff] }
  0xf1   :  { %2792 = vmatpush2.bf16.msra.mxu0 %v5663_v11  ;;  %2834 = vmatprep.subr.bf16.mxu1 %v5784_v14  ;;  %v5608_v11 = vcombine.high %v115_v4, %v119_v5  ;;  %v363_v14 = vld [vmem:[%s9163_s1 + $0x9d0] sm:$0xff] }
  0xf2   :  { %2793 = vmatprep.subr.bf16.mxu0 %v5656_v13  ;;  %v5736_v13 = vcombine.high %v243_v6, %v247_v7  ;;  %v5856_v26 = vcombine.high %v363_v14, %v367_v15  ;;  %v5855_v42 = vcombine.low %v363_v14, %v367_v15  ;;  %v339_v55 = vld [vmem:[%s9163_s1 + $0x910] sm:$0xff]  ;;  %v5594_v6 = vcombine.high %v100_v57, %v104_v60 }
  0xf3   :  { %v343_v56 = vld [vmem:[%s9163_s1 + $0x930] sm:$0xff] }
  0xf4   :  { %2835 = vmatpush2.bf16.msra.mxu1 %v5783_v22  ;;  %v5832_v1 = vcombine.high %v339_v55, %v343_v56  ;;  %v335_v7 = vld [vmem:[%s9163_s1 + $0x8f0] sm:$0xff] }
  0xf5   :  { %2794 = vmatpush2.bf16.msra.mxu0 %v5655_v21  ;;  %2836 = vmatprep.subr.bf16.mxu1 %v5776_v24  ;;  %v327_v15 = vld [vmem:[%s9163_s1 + $0x8b0] sm:$0xff] }
  0xf6   :  { %2795 = vmatprep.subr.bf16.mxu0 %v5648_v23  ;;  %v5607_v23 = vcombine.low %v115_v4, %v119_v5  ;;  %v331_v4 = vld [vmem:[%s9163_s1 + $0x8d0] sm:$0xff] }
  0xf8   :  { %2837 = vmatpush2.bf16.msra.mxu1 %v5775_v32  ;;  %v5928_v32 = vcombine.high %v435_v18, %v439_v20 }
  0xf9   :  { %2796 = vmatpush2.bf16.msra.mxu0 %v5647_v30  ;;  %2838 = vmatprep.subr.bf16.mxu1 %v5768_v35  ;;  %v359_v35 = vld [vmem:[%s9163_s1 + $0x9b0] sm:$0xff] }
  0xfa   :  { %2797 = vmatprep.subr.bf16.mxu0 %v5640_v34  ;;  %v355_v34 = vld [vmem:[%s9163_s1 + $0x990] sm:$0xff] }
  0xfc   :  { %2839 = vmatpush2.bf16.msra.mxu1 %v5767_v43 }
  0xfd   :  { %2798 = vmatpush2.bf16.msra.mxu0 %v5639_v41  ;;  %2840 = vmatprep.subr.bf16.mxu1 %v5760_v45  ;;  %v5848_v45 = vcombine.high %v355_v34, %v359_v35 }
  0xfe   :  { %2799 = vmatprep.subr.bf16.mxu0 %v5632_v44  ;;  %v5927_v44 = vcombine.low %v435_v18, %v439_v20  ;;  %v5823_v18 = vcombine.low %v331_v4, %v335_v7 }
 0x100   :  { %2841 = vmatpush2.bf16.msra.mxu1 %v5759_v52  ;;  %v5847_v52 = vcombine.low %v355_v34, %v359_v35  ;;  %v72_v34 = vld [vmem:[%s9163_s1 + $0xb8] sm:$0xff]  ;;  %v307_v35 = vld [vmem:[%s9163_s1 + $0x810] sm:$0xff] }
 0x101   :  { %2800 = vmatpush2.bf16.msra.mxu0 %v5631_v50  ;;  %2842 = vmatprep.subr.bf16.mxu1 %v5752_v54 }
 0x102   :  { %2801 = vmatprep.subr.bf16.mxu0 %v5624_v53  ;;  %v5840_v53 = vcombine.high %v347_v48, %v351_v49 }
 0x104   :  { %2843 = vmatpush2.bf16.msra.mxu1 %v5751_v63  ;;  %v5839_v63 = vcombine.low %v347_v48, %v351_v49 }
 0x105   :  { %2802 = vmatpush2.bf16.msra.mxu0 %v5623_v61  ;;  %2844 = vmatprep.subr.bf16.mxu1 %v5744_v2  ;;  %v92_v2 = vld [vmem:[%s9163_s1 + $0x158] sm:$0xff] }
 0x106   :  { %2803 = vmatprep.subr.bf16.mxu0 %v5616_v0  ;;  %v5601_v0 = vcombine.low %v108_v38, %v112_v39  ;;  %v311_v38 = vld [vmem:[%s9163_s1 + $0x830] sm:$0xff] }
 0x107   :  { %v2522_v22 = vpop.f32.mrf.mxu1  ;;  %v5799_v48 = vcombine.low %v307_v35, %v311_v38 }
 0x108   :  { %v2481_v17 = vpop.f32.mrf.mxu0  ;;  %2845 = vmatpush2.bf16.msra.mxu1 %v5743_v10  ;;  %v5593_v10 = vcombine.low %v100_v57, %v104_v60  ;;  %v423_v60 = vld [vmem:[%s9163_s1 + $0xbb0] sm:$0xff] }
 0x109   :  { %v2482_v21 = vadd.f32 %v2481_v17, %v446_v9  ;;  %2804 = vmatpush2.bf16.msra.mxu0 %v5615_v8  ;;  %v2524_v30 = vpop.f32.mrf.mxu1  ;;  %2846 = vmatprep.subr.bf16.mxu1 %v5736_v13  ;;  %v96_v8 = vld [vmem:[%s9163_s1 + $0x178] sm:$0xff]  ;;  %v5831_v9 = vcombine.low %v339_v55, %v343_v56  ;;  %v323_v13 = vld [vmem:[%s9163_s1 + $0x890] sm:$0xff] }
 0x10a   :  { %v2483_v24 = vpop.f32.mrf.mxu0  ;;  %2805 = vmatprep.subr.bf16.mxu0 %v5608_v11  ;;  %v5824_v11 = vcombine.high %v331_v4, %v335_v7  ;;  %v5586_v14 = vcombine.high %v92_v2, %v96_v8  ;;  %v88_v17 = vld [vmem:[%s9163_s1 + $0x138] sm:$0xff]  ;;  %v5585_v20 = vcombine.low %v92_v2, %v96_v8  ;;  %v419_v56 = vld [vmem:[%s9163_s1 + $0xb90] sm:$0xff] }
 0x10b   :  { %v7654_v28 = vadd.f32 %v2522_v22, %v2482_v21  ;;  %v2484_v29 = vadd.f32 %v2483_v24, %v450_v12  ;;  %v2526_v41 = vpop.f32.mrf.mxu1  ;;  %v84_v12 = vld [vmem:[%s9163_s1 + $0x118] sm:$0xff]  ;;  %v5816_v21 = vcombine.high %v323_v13, %v327_v15  ;;  %v411_v4 = vld [vmem:[%s9163_s1 + $0xb50] sm:$0xff]  ;;  %v5911_v7 = vcombine.low %v419_v56, %v423_v60 }
 0x10c   :  { %v2485_v36 = vpop.f32.mrf.mxu0  ;;  %2847 = vmatpush2.bf16.msra.mxu1 %v5735_v25  ;;  %v76_v22 = vld [vmem:[%s9163_s1 + $0xd8] sm:$0xff]  ;;  %v5578_v24 = vcombine.high %v84_v12, %v88_v17  ;;  %v319_v25 = vld [vmem:[%s9163_s1 + $0x870] sm:$0xff] }
 0x10d   :  { %v7668_v40 = vadd.f32 %v2524_v30, %v2484_v29  ;;  %2806 = vmatpush2.bf16.msra.mxu0 %v5607_v23  ;;  %v2527_v46 = vpop.f32.mrf.mxu1  ;;  %2912 = vmatprep.subr.bf16.mxu1 %v5928_v32  ;;  %v80_v23 = vld [vmem:[%s9163_s1 + $0xf8] sm:$0xff]  ;;  %v5577_v29 = vcombine.low %v84_v12, %v88_v17  ;;  %v403_v12 = vld [vmem:[%s9163_s1 + $0xb10] sm:$0xff] }
 0x10e   :  { %v2486_v43 = vpop.f32.mrf.mxu0  ;;  %2857 = vmatprep.subr.bf16.mxu0 %v5856_v26  ;;  %v5815_v26 = vcombine.low %v323_v13, %v327_v15  ;;  %v68_v32 = vld [vmem:[%s9163_s1 + $0x98] sm:$0xff]  ;;  %v5570_v36 = vcombine.high %v76_v22, %v80_v23  ;;  %v5569_v41 = vcombine.low %v76_v22, %v80_v23  ;;  %v395_v22 = vld [vmem:[%s9163_s1 + $0xad0] sm:$0xff] }
 0x10f   :  { %2849 = vmatmul.mubr.bf16.vlgmr.msra.gmra.mxu1 %v7030_v19  ;;  %v7678_v50 = vpop.f32.mrf.mxu1  ;;  %v60_v43 = vld [vmem:[%s9163_s1 + $0x58] sm:$0xff]  ;;  %v5562_v46 = vcombine.high %v68_v32, %v72_v34  ;;  %v5561_v49 = vcombine.low %v68_v32, %v72_v34  ;;  %v387_v32 = vld [vmem:[%s9163_s1 + $0xa90] sm:$0xff] }
 0x110   :  { %2808 = vmatmul.mubr.bf16.vlgmr.msra.gmra.mxu0 %v7022_v16  ;;  %2913 = vmatpush1.bf16.msra.mxu1 %v5927_v44  ;;  %v64_v44 = vld [vmem:[%s9163_s1 + $0x78] sm:$0xff] }
 0x111   :  { %2858 = vmatpush1.bf16.msra.mxu0 %v5855_v42  ;;  %v7680_v54 = vpop.f32.mrf.mxu1  ;;  %2930 = vmatprep.mubr.bf16.mxu1 %v6743_v31  ;;  %v5800_v42 = vcombine.high %v307_v35, %v311_v38  ;;  %v56_v55 = vld [vmem:[%s9163_s1 + $0x38] sm:$0xff]  ;;  %v5554_v57 = vcombine.high %v60_v43, %v64_v44  ;;  %v391_v35 = vld [vmem:[%s9163_s1 + $0xab0] sm:$0xff] }
 0x112   :  { %2859 = vmatprep.subr.bf16.mxu0 %v5848_v45  ;;  %2939 = vmatprep.subr.bf16.mxu1 %v5602_v47  ;;  %v427_v45 = vld [vmem:[%s9163_s1 + $0xbd0] sm:$0xff]  ;;  %v176_v2 = vld [vmem:[%s9163_s1 + $0x3f8] sm:$0xff] }
 0x113   :  { %2889 = vmatprep.mubr.bf16.mxu0 %v7042_v27  ;;  %v2608_v61 = vpop.f32.mrf.mxu1  ;;  %v431_v47 = vld [vmem:[%s9163_s1 + $0xbf0] sm:$0xff] }
 0x114   :  { %v5919_v61 = vcombine.low %v427_v45, %v431_v47 }
 0x115   :  { %2860 = vmatpush1.bf16.msra.mxu0 %v5847_v52  ;;  %v2609_v5 = vpop.f32.mrf.mxu1  ;;  %v5920_v52 = vcombine.high %v427_v45, %v431_v47  ;;  %v383_v45 = vld [vmem:[%s9163_s1 + $0xa70] sm:$0xff] }
 0x116   :  { %2861 = vmatprep.subr.bf16.mxu0 %v5840_v53  ;;  %v52_v53 = vld [vmem:[%s9163_s1 + $0x18] sm:$0xff] }
 0x117   :  { %5933 = vmatmul.mubr.msk.bf16.vlgmr.msra.gmra.mxu1 %vm2443_vm0, %v7062_v37  ;;  %v5546_v5 = vcombine.high %v52_v53, %v56_v55  ;;  %v5545_v8 = vcombine.low %v52_v53, %v56_v55  ;;  %v371_v53 = vld [vmem:[%s9163_s1 + $0xa10] sm:$0xff] }
 0x118   :  { %2940 = vmatpush1.bf16.msra.mxu1 %v5601_v0  ;;  %2971 = vmatprep.mubr.bf16.mxu1 %v6890_v58  ;;  %v315_v58 = vld [vmem:[%s9163_s1 + $0x850] sm:$0xff]  ;;  %v5912_v0 = vcombine.high %v419_v56, %v423_v60 }
 0x119   :  { %2862 = vmatpush1.bf16.msra.mxu0 %v5839_v63  ;;  %2941 = vmatprep.subr.bf16.mxu1 %v5594_v6  ;;  %v5808_v30 = vcombine.high %v315_v58, %v319_v25  ;;  %v5807_v39 = vcombine.low %v315_v58, %v319_v25  ;;  %v5553_v63 = vcombine.low %v60_v43, %v64_v44  ;;  %v415_v6 = vld [vmem:[%s9163_s1 + $0xb70] sm:$0xff] }
 0x11a   :  { %2863 = vmatprep.subr.bf16.mxu0 %v5832_v1  ;;  %v172_v1 = vld [vmem:[%s9163_s1 + $0x3d8] sm:$0xff]  ;;  %v5903_v15 = vcombine.low %v411_v4, %v415_v6  ;;  %v399_v58 = vld [vmem:[%s9163_s1 + $0xaf0] sm:$0xff] }
 0x11b   :  { %v5666_v13 = vcombine.high %v172_v1, %v176_v2  ;;  %v5665_v17 = vcombine.low %v172_v1, %v176_v2  ;;  %v379_v43 = vld [vmem:[%s9163_s1 + $0xa50] sm:$0xff]  ;;  %v236_v1 = vld [vmem:[%s9163_s1 + $0x5d8] sm:$0xff] }
 0x11c   :  { %2942 = vmatpush1.bf16.msra.mxu1 %v5593_v10  ;;  %v164_v10 = vld [vmem:[%s9163_s1 + $0x398] sm:$0xff]  ;;  %v375_v56 = vld [vmem:[%s9163_s1 + $0xa30] sm:$0xff] }
 0x11d   :  { %2864 = vmatpush1.bf16.msra.mxu0 %v5831_v9  ;;  %2943 = vmatprep.subr.bf16.mxu1 %v5586_v14  ;;  %v5904_v9 = vcombine.high %v411_v4, %v415_v6  ;;  %v407_v14 = vld [vmem:[%s9163_s1 + $0xb30] sm:$0xff]  ;;  %v240_v4 = vld [vmem:[%s9163_s1 + $0x5f8] sm:$0xff] }
 0x11e   :  { %2865 = vmatprep.subr.bf16.mxu0 %v5824_v11  ;;  %v168_v11 = vld [vmem:[%s9163_s1 + $0x3b8] sm:$0xff] }
 0x11f   :  { %v5658_v23 = vcombine.high %v164_v10, %v168_v11  ;;  %v5657_v25 = vcombine.low %v164_v10, %v168_v11  ;;  %v5730_v10 = vcombine.high %v236_v1, %v240_v4  ;;  %v116_v11 = vld [vmem:[%s9163_s1 + $0x218] sm:$0xff] }
 0x120   :  { %2944 = vmatpush1.bf16.msra.mxu1 %v5585_v20  ;;  %v156_v20 = vld [vmem:[%s9163_s1 + $0x358] sm:$0xff] }
 0x121   :  { %2866 = vmatpush1.bf16.msra.mxu0 %v5823_v18  ;;  %2945 = vmatprep.subr.bf16.mxu1 %v5578_v24  ;;  %v5896_v18 = vcombine.high %v403_v12, %v407_v14  ;;  %v5895_v24 = vcombine.low %v403_v12, %v407_v14  ;;  %v120_v12 = vld [vmem:[%s9163_s1 + $0x238] sm:$0xff] }
 0x122   :  { %2867 = vmatprep.subr.bf16.mxu0 %v5816_v21  ;;  %v160_v21 = vld [vmem:[%s9163_s1 + $0x378] sm:$0xff] }
 0x123   :  { %v5650_v34 = vcombine.high %v156_v20, %v160_v21  ;;  %v5649_v38 = vcombine.low %v156_v20, %v160_v21  ;;  %v5729_v21 = vcombine.low %v236_v1, %v240_v4 }
 0x124   :  { %2946 = vmatpush1.bf16.msra.mxu1 %v5577_v29  ;;  %v148_v29 = vld [vmem:[%s9163_s1 + $0x318] sm:$0xff] }
 0x125   :  { %2868 = vmatpush1.bf16.msra.mxu0 %v5815_v26  ;;  %2947 = vmatprep.subr.bf16.mxu1 %v5570_v36  ;;  %v5888_v26 = vcombine.high %v395_v22, %v399_v58  ;;  %v5887_v36 = vcombine.low %v395_v22, %v399_v58  ;;  %v368_v58 = vld [vmem:[%s9163_s1 + $0x9f8] sm:$0xff] }
 0x126   :  { %2869 = vmatprep.subr.bf16.mxu0 %v5808_v30  ;;  %v152_v30 = vld [vmem:[%s9163_s1 + $0x338] sm:$0xff] }
 0x127   :  { %v5642_v44 = vcombine.high %v148_v29, %v152_v30  ;;  %v5641_v47 = vcombine.low %v148_v29, %v152_v30  ;;  %v5609_v30 = vcombine.low %v116_v11, %v120_v12 }
 0x128   :  { %2948 = vmatpush1.bf16.msra.mxu1 %v5569_v41  ;;  %v140_v41 = vld [vmem:[%s9163_s1 + $0x2d8] sm:$0xff] }
 0x129   :  { %2870 = vmatpush1.bf16.msra.mxu0 %v5807_v39  ;;  %2949 = vmatprep.subr.bf16.mxu1 %v5562_v46  ;;  %v5880_v39 = vcombine.high %v387_v32, %v391_v35  ;;  %v5879_v46 = vcombine.low %v387_v32, %v391_v35 }
 0x12a   :  { %2871 = vmatprep.subr.bf16.mxu0 %v5800_v42  ;;  %v144_v42 = vld [vmem:[%s9163_s1 + $0x2f8] sm:$0xff] }
 0x12b   :  { %v5634_v55 = vcombine.high %v140_v41, %v144_v42  ;;  %v5633_v60 = vcombine.low %v140_v41, %v144_v42 }
 0x12c   :  { %2950 = vmatpush1.bf16.msra.mxu1 %v5561_v49  ;;  %v132_v49 = vld [vmem:[%s9163_s1 + $0x298] sm:$0xff] }
 0x12d   :  { %2872 = vmatpush1.bf16.msra.mxu0 %v5799_v48  ;;  %2951 = vmatprep.subr.bf16.mxu1 %v5554_v57  ;;  %v5872_v48 = vcombine.high %v379_v43, %v383_v45  ;;  %v5871_v57 = vcombine.low %v379_v43, %v383_v45  ;;  %v204_v43 = vld [vmem:[%s9163_s1 + $0x4d8] sm:$0xff] }
 0x12e   :  { %2873 = vmatprep.subr.bf16.mxu0 %v5920_v52  ;;  %v136_v52 = vld [vmem:[%s9163_s1 + $0x2b8] sm:$0xff] }
 0x12f   :  { %v5626_v2 = vcombine.high %v132_v49, %v136_v52 }
 0x130   :  { %2952 = vmatpush1.bf16.msra.mxu1 %v5553_v63  ;;  %v124_v63 = vld [vmem:[%s9163_s1 + $0x258] sm:$0xff] }
 0x131   :  { %2874 = vmatpush2.bf16.msra.mxu0 %v5919_v61  ;;  %2953 = vmatprep.subr.bf16.mxu1 %v5546_v5  ;;  %v5864_v61 = vcombine.high %v371_v53, %v375_v56 }
 0x132   :  { %2875 = vmatprep.subr.bf16.mxu0 %v5912_v0  ;;  %v128_v0 = vld [vmem:[%s9163_s1 + $0x278] sm:$0xff] }
 0x134   :  { %2954 = vmatpush1.bf16.msra.mxu1 %v5545_v8 }
 0x135   :  { %2876 = vmatpush2.bf16.msra.mxu0 %v5911_v7  ;;  %2955 = vmatprep.subr.bf16.mxu1 %v5666_v13  ;;  %v5863_v7 = vcombine.low %v371_v53, %v375_v56  ;;  %v228_v13 = vld [vmem:[%s9163_s1 + $0x598] sm:$0xff] }
 0x136   :  { %2877 = vmatprep.subr.bf16.mxu0 %v5904_v9  ;;  %v5625_v9 = vcombine.low %v132_v49, %v136_v52 }
 0x138   :  { %2956 = vmatpush2.bf16.msra.mxu1 %v5665_v17  ;;  %v232_v17 = vld [vmem:[%s9163_s1 + $0x5b8] sm:$0xff] }
 0x139   :  { %2878 = vmatpush2.bf16.msra.mxu0 %v5903_v15  ;;  %2957 = vmatprep.subr.bf16.mxu1 %v5658_v23  ;;  %v5618_v15 = vcombine.high %v124_v63, %v128_v0  ;;  %v5617_v23 = vcombine.low %v124_v63, %v128_v0  ;;  %v5721_v29 = vcombine.low %v228_v13, %v232_v17  ;;  %v200_v63 = vld [vmem:[%s9163_s1 + $0x4b8] sm:$0xff] }
 0x13a   :  { %2879 = vmatprep.subr.bf16.mxu0 %v5896_v18 }
 0x13c   :  { %2958 = vmatpush2.bf16.msra.mxu1 %v5657_v25  ;;  %v224_v25 = vld [vmem:[%s9163_s1 + $0x578] sm:$0xff] }
 0x13d   :  { %2880 = vmatpush2.bf16.msra.mxu0 %v5895_v24  ;;  %2959 = vmatprep.subr.bf16.mxu1 %v5650_v34  ;;  %v5610_v24 = vcombine.high %v116_v11, %v120_v12 }
 0x13e   :  { %2881 = vmatprep.subr.bf16.mxu0 %v5888_v26 }
 0x140   :  { %2960 = vmatpush2.bf16.msra.mxu1 %v5649_v38  ;;  %v216_v38 = vld [vmem:[%s9163_s1 + $0x538] sm:$0xff] }
 0x141   :  { %2882 = vmatpush2.bf16.msra.mxu0 %v5887_v36  ;;  %2961 = vmatprep.subr.bf16.mxu1 %v5642_v44  ;;  %v212_v36 = vld [vmem:[%s9163_s1 + $0x518] sm:$0xff] }
 0x142   :  { %2883 = vmatprep.subr.bf16.mxu0 %v5880_v39  ;;  %v360_v39 = vld [vmem:[%s9163_s1 + $0x9b8] sm:$0xff]  ;;  %v5705_v53 = vcombine.low %v212_v36, %v216_v38 }
 0x143   :  { %v208_v44 = vld [vmem:[%s9163_s1 + $0x4f8] sm:$0xff] }
 0x144   :  { %2962 = vmatpush2.bf16.msra.mxu1 %v5641_v47  ;;  %v348_v47 = vld [vmem:[%s9163_s1 + $0x958] sm:$0xff]  ;;  %v5698_v56 = vcombine.high %v204_v43, %v208_v44  ;;  %v5697_v0 = vcombine.low %v204_v43, %v208_v44 }
 0x145   :  { %2884 = vmatpush2.bf16.msra.mxu0 %v5879_v46  ;;  %2963 = vmatprep.subr.bf16.mxu1 %v5634_v55  ;;  %v5706_v46 = vcombine.high %v212_v36, %v216_v38  ;;  %v428_v43 = vld [vmem:[%s9163_s1 + $0xbd8] sm:$0xff] }
 0x146   :  { %2885 = vmatprep.subr.bf16.mxu0 %v5872_v48  ;;  %v352_v48 = vld [vmem:[%s9163_s1 + $0x978] sm:$0xff] }
 0x147   :  { %v5841_v1 = vcombine.low %v348_v47, %v352_v48  ;;  %v432_v44 = vld [vmem:[%s9163_s1 + $0xbf8] sm:$0xff] }
 0x148   :  { %v2563_v5 = vpop.f32.mrf.mxu0  ;;  %2964 = vmatpush2.bf16.msra.mxu1 %v5633_v60  ;;  %v344_v60 = vld [vmem:[%s9163_s1 + $0x938] sm:$0xff] }
 0x149   :  { %v2564_v6 = vadd.f32 %v2563_v5, %v7654_v28  ;;  %2886 = vmatpush2.bf16.msra.mxu0 %v5871_v57  ;;  %2965 = vmatprep.subr.bf16.mxu1 %v5626_v2  ;;  %v340_v57 = vld [vmem:[%s9163_s1 + $0x918] sm:$0xff] }
 0x14a   :  { %v2565_v8 = vpop.f32.mrf.mxu0  ;;  %2887 = vmatprep.subr.bf16.mxu0 %v5864_v61  ;;  %v5842_v61 = vcombine.high %v348_v47, %v352_v48  ;;  %v5834_v4 = vcombine.high %v340_v57, %v344_v60  ;;  %v332_v5 = vld [vmem:[%s9163_s1 + $0x8d8] sm:$0xff]  ;;  %v5833_v11 = vcombine.low %v340_v57, %v344_v60 }
 0x14b   :  { %v7866_v28 = vadd.f32 %v7678_v50, %v2564_v6  ;;  %v2566_v14 = vadd.f32 %v2565_v8, %v7668_v40  ;;  %v5722_v50 = vcombine.high %v228_v13, %v232_v17  ;;  %v364_v40 = vld [vmem:[%s9163_s1 + $0x9d8] sm:$0xff] }
 0x14c   :  { %v2567_v18 = vpop.f32.mrf.mxu0  ;;  %2966 = vmatpush2.bf16.msra.mxu1 %v5625_v9  ;;  %v5858_v35 = vcombine.high %v364_v40, %v368_v58  ;;  %v5857_v45 = vcombine.low %v364_v40, %v368_v58  ;;  %v188_v6 = vld [vmem:[%s9163_s1 + $0x458] sm:$0xff] }
 0x14d   :  { %v7873_v20 = vadd.f32 %v7680_v54, %v2566_v14  ;;  %2888 = vmatpush2.bf16.msra.mxu0 %v5863_v7  ;;  %v220_v54 = vld [vmem:[%s9163_s1 + $0x558] sm:$0xff]  ;;  %2967 = vmatprep.subr.bf16.mxu1 %v5618_v15 }
 0x14e   :  { %v2568_v22 = vpop.f32.mrf.mxu0  ;;  %2980 = vmatprep.subr.bf16.mxu0 %v5730_v10  ;;  %v5714_v32 = vcombine.high %v220_v54, %v224_v25  ;;  %v5713_v42 = vcombine.low %v220_v54, %v224_v25  ;;  %v336_v7 = vld [vmem:[%s9163_s1 + $0x8f8] sm:$0xff] }
 0x14f   :  { %v7888_v26 = vpop.f32.mrf.mxu1  ;;  %v180_v9 = vld [vmem:[%s9163_s1 + $0x418] sm:$0xff]  ;;  %v5826_v15 = vcombine.high %v332_v5, %v336_v7  ;;  %v5825_v22 = vcombine.low %v332_v5, %v336_v7 }
 0x150   :  { %2890 = vmatmul.mubr.bf16.vlgmr.msra.gmra.mxu0 %v7232_v33  ;;  %2968 = vmatpush2.bf16.msra.mxu1 %v5617_v23  ;;  %v184_v10 = vld [vmem:[%s9163_s1 + $0x438] sm:$0xff] }
 0x151   :  { %2981 = vmatpush1.bf16.msra.mxu0 %v5729_v21  ;;  %3012 = vmatprep.mubr.bf16.mxu0 %v6892_v59  ;;  %v7891_v34 = vpop.f32.mrf.mxu1  ;;  %v356_v59 = vld [vmem:[%s9163_s1 + $0x998] sm:$0xff]  ;;  %v5674_v23 = vcombine.high %v180_v9, %v184_v10  ;;  %v5673_v54 = vcombine.low %v180_v9, %v184_v10 }
 0x152   :  { %2982 = vmatprep.subr.bf16.mxu0 %v5722_v50  ;;  %2969 = vmatprep.subr.bf16.mxu1 %v5610_v24  ;;  %v5850_v52 = vcombine.high %v356_v59, %v360_v39  ;;  %v5849_v55 = vcombine.low %v356_v59, %v360_v39  ;;  %v324_v13 = vld [vmem:[%s9163_s1 + $0x898] sm:$0xff] }
 0x153   :  { %v2649_v41 = vpop.f32.mrf.mxu1  ;;  %v328_v14 = vld [vmem:[%s9163_s1 + $0x8b8] sm:$0xff] }
 0x154   :  { %2970 = vmatpush2.bf16.msra.mxu1 %v5609_v30  ;;  %v300_v18 = vld [vmem:[%s9163_s1 + $0x7d8] sm:$0xff]  ;;  %v5818_v58 = vcombine.high %v324_v13, %v328_v14 }
 0x155   :  { %2983 = vmatpush1.bf16.msra.mxu0 %v5721_v29  ;;  %v2650_v49 = vpop.f32.mrf.mxu1  ;;  %3021 = vmatprep.subr.bf16.mxu1 %v5858_v35  ;;  %v304_v21 = vld [vmem:[%s9163_s1 + $0x7f8] sm:$0xff]  ;;  %v5817_v29 = vcombine.low %v324_v13, %v328_v14 }
 0x156   :  { %2984 = vmatprep.subr.bf16.mxu0 %v5714_v32  ;;  %v316_v50 = vld [vmem:[%s9163_s1 + $0x858] sm:$0xff]  ;;  %v5794_v30 = vcombine.high %v300_v18, %v304_v21  ;;  %v5793_v38 = vcombine.low %v300_v18, %v304_v21  ;;  %v8040_v21 = vsub.s32 2, %v7605_v51 }
 0x157   :  { %2972 = vmatmul.mubr.bf16.vlgmr.msra.gmra.mxu1 %v7022_v16  ;;  %v196_v16 = vld [vmem:[%s9163_s1 + $0x498] sm:$0xff] }
 0x158   :  { %3022 = vmatpush1.bf16.msra.mxu1 %v5857_v45  ;;  %3053 = vmatprep.mubr.bf16.mxu1 %v7042_v27  ;;  %v5690_v2 = vcombine.high %v196_v16, %v200_v63  ;;  %v192_v27 = vld [vmem:[%s9163_s1 + $0x478] sm:$0xff]  ;;  %v5689_v8 = vcombine.low %v196_v16, %v200_v63  ;;  %v5921_v16 = vcombine.low %v428_v43, %v432_v44 }
 0x159   :  { %2985 = vmatpush1.bf16.msra.mxu0 %v5713_v42  ;;  %3023 = vmatprep.subr.bf16.mxu1 %v5850_v52  ;;  %v5682_v12 = vcombine.high %v188_v6, %v192_v27  ;;  %v5681_v17 = vcombine.low %v188_v6, %v192_v27  ;;  %v320_v40 = vld [vmem:[%s9163_s1 + $0x878] sm:$0xff] }
 0x15a   :  { %2986 = vmatprep.subr.bf16.mxu0 %v5706_v46  ;;  %v292_v24 = vld [vmem:[%s9163_s1 + $0x798] sm:$0xff]  ;;  %v5810_v36 = vcombine.high %v316_v50, %v320_v40  ;;  %v5809_v41 = vcombine.low %v316_v50, %v320_v40 }
 0x15b   :  { %v296_v25 = vld [vmem:[%s9163_s1 + $0x7b8] sm:$0xff] }
 0x15c   :  { %3024 = vmatpush1.bf16.msra.mxu1 %v5849_v55  ;;  %v308_v32 = vld [vmem:[%s9163_s1 + $0x818] sm:$0xff]  ;;  %v5786_v42 = vcombine.high %v292_v24, %v296_v25  ;;  %v5785_v46 = vcombine.low %v292_v24, %v296_v25 }
 0x15d   :  { %2987 = vmatpush1.bf16.msra.mxu0 %v5705_v53  ;;  %3025 = vmatprep.subr.bf16.mxu1 %v5842_v61  ;;  %v312_v35 = vld [vmem:[%s9163_s1 + $0x838] sm:$0xff] }
 0x15e   :  { %2988 = vmatprep.subr.bf16.mxu0 %v5698_v56  ;;  %v284_v59 = vld [vmem:[%s9163_s1 + $0x758] sm:$0xff]  ;;  %v5802_v45 = vcombine.high %v308_v32, %v312_v35  ;;  %v5801_v49 = vcombine.low %v308_v32, %v312_v35  ;;  %v5922_v56 = vcombine.high %v428_v43, %v432_v44 }
 0x15f   :  { %v288_v39 = vld [vmem:[%s9163_s1 + $0x778] sm:$0xff] }
 0x160   :  { %3026 = vmatpush1.bf16.msra.mxu1 %v5841_v1  ;;  %v276_v47 = vld [vmem:[%s9163_s1 + $0x718] sm:$0xff]  ;;  %v5778_v52 = vcombine.high %v284_v59, %v288_v39  ;;  %v5777_v57 = vcombine.low %v284_v59, %v288_v39 }
 0x161   :  { %2989 = vmatpush1.bf16.msra.mxu0 %v5697_v0  ;;  %3027 = vmatprep.subr.bf16.mxu1 %v5834_v4  ;;  %v280_v48 = vld [vmem:[%s9163_s1 + $0x738] sm:$0xff] }
 0x162   :  { %2990 = vmatprep.subr.bf16.mxu0 %v5690_v2  ;;  %v420_v53 = vld [vmem:[%s9163_s1 + $0xb98] sm:$0xff]  ;;  %v5770_v63 = vcombine.high %v276_v47, %v280_v48  ;;  %v5769_v4 = vcombine.low %v276_v47, %v280_v48 }
 0x163   :  { %v424_v55 = vld [vmem:[%s9163_s1 + $0xbb8] sm:$0xff] }
 0x164   :  { %3028 = vmatpush1.bf16.msra.mxu1 %v5833_v11  ;;  %v268_v60 = vld [vmem:[%s9163_s1 + $0x6d8] sm:$0xff]  ;;  %v5914_v2 = vcombine.high %v420_v53, %v424_v55  ;;  %v5913_v27 = vcombine.low %v420_v53, %v424_v55 }
 0x165   :  { %2991 = vmatpush1.bf16.msra.mxu0 %v5689_v8  ;;  %3029 = vmatprep.subr.bf16.mxu1 %v5826_v15  ;;  %v272_v61 = vld [vmem:[%s9163_s1 + $0x6f8] sm:$0xff] }
 0x166   :  { %2992 = vmatprep.subr.bf16.mxu0 %v5682_v12  ;;  %v412_v0 = vld [vmem:[%s9163_s1 + $0xb58] sm:$0xff]  ;;  %v5762_v7 = vcombine.high %v268_v60, %v272_v61  ;;  %v5761_v11 = vcombine.low %v268_v60, %v272_v61 }
 0x167   :  { %v416_v1 = vld [vmem:[%s9163_s1 + $0xb78] sm:$0xff] }
 0x168   :  { %3030 = vmatpush1.bf16.msra.mxu1 %v5825_v22  ;;  %v260_v5 = vld [vmem:[%s9163_s1 + $0x698] sm:$0xff]  ;;  %v5906_v10 = vcombine.high %v412_v0, %v416_v1  ;;  %v5905_v14 = vcombine.low %v412_v0, %v416_v1  ;;  %v6260_v0 = vld [vmem:[%s9166_s3 + $0xe4] ss:$16 sps:$4 sm:$0xff]  }
 0x169   :  { %2993 = vmatpush1.bf16.msra.mxu0 %v5681_v17  ;;  %3031 = vmatprep.subr.bf16.mxu1 %v5818_v58  ;;  %v264_v6 = vld [vmem:[%s9163_s1 + $0x6b8] sm:$0xff] }
 0x16a   :  { %2994 = vmatprep.subr.bf16.mxu0 %v5674_v23  ;;  %v404_v8 = vld [vmem:[%s9163_s1 + $0xb18] sm:$0xff]  ;;  %v5754_v15 = vcombine.high %v260_v5, %v264_v6  ;;  %v5753_v23 = vcombine.low %v260_v5, %v264_v6 }
 0x16b   :  { %v408_v9 = vld [vmem:[%s9163_s1 + $0xb38] sm:$0xff] }
 0x16c   :  { %3032 = vmatpush1.bf16.msra.mxu1 %v5817_v29  ;;  %v252_v12 = vld [vmem:[%s9163_s1 + $0x658] sm:$0xff]  ;;  %v5898_v22 = vcombine.high %v404_v8, %v408_v9  ;;  %v5897_v58 = vcombine.low %v404_v8, %v408_v9  ;;  %v8057_v29 = vld [vmem:[%s9165_s2] sm:$0xff] }
 0x16d   :  { %2995 = vmatpush1.bf16.msra.mxu0 %v5673_v54  ;;  %3033 = vmatprep.subr.bf16.mxu1 %v5810_v36  ;;  %v256_v13 = vld [vmem:[%s9163_s1 + $0x678] sm:$0xff] }
 0x16e   :  { %2996 = vmatprep.subr.bf16.mxu0 %v5794_v30  ;;  %v396_v17 = vld [vmem:[%s9163_s1 + $0xad8] sm:$0xff]  ;;  %v5746_v54 = vcombine.high %v252_v12, %v256_v13  ;;  %v454_v30 = vrot.slane %v8057_v29, %v8040_v21  ;;  %v5745_v35 = vcombine.low %v252_v12, %v256_v13 }
 0x16f   :  { %v400_v18 = vld [vmem:[%s9163_s1 + $0xaf8] sm:$0xff] }
 0x170   :  { %3034 = vmatpush1.bf16.msra.mxu1 %v5809_v41  ;;  %v244_v50 = vld [vmem:[%s9163_s1 + $0x618] sm:$0xff]  ;;  %v5890_v32 = vcombine.high %v396_v17, %v400_v18  ;;  %v5889_v59 = vcombine.low %v396_v17, %v400_v18  ;;  %v2646_v43 = vadd.f32 %v7888_v26, %v454_v30  ;;  %v6261_v17 = vld [vmem:[%s9166_s3 + $0x2e0] ss:$16 sps:$4 sm:$0xff]   ;;  %v6278_v30 = vld [vmem:[%s9166_s3 + $0x84] ss:$16 sps:$4 sm:$0xff]  }
 0x171   :  { %2997 = vmatpush2.bf16.msra.mxu0 %v5793_v38  ;;  %3035 = vmatprep.subr.bf16.mxu1 %v5802_v45  ;;  %v248_v40 = vld [vmem:[%s9163_s1 + $0x638] sm:$0xff]  ;;  %v457_v45 = vsub.s32 3, %v7605_v51 }
 0x172   :  { %2998 = vmatprep.subr.bf16.mxu0 %v5786_v42  ;;  %v388_v24 = vld [vmem:[%s9163_s1 + $0xa98] sm:$0xff]  ;;  %v5738_v39 = vcombine.high %v244_v50, %v248_v40  ;;  %v5737_v48 = vcombine.low %v244_v50, %v248_v40  ;;  %v6264_v40 = vld [vmem:[%s9166_s3 + $0xc0] ss:$16 sps:$4 sm:$0xff]  }
 0x173   :  { %v392_v25 = vld [vmem:[%s9163_s1 + $0xab8] sm:$0xff] }
 0x174   :  { %3036 = vmatpush1.bf16.msra.mxu1 %v5801_v49  ;;  %v436_v36 = vld [vmem:[%s9163_s1 + $0xc18] sm:$0xff]  ;;  %v5882_v44 = vcombine.high %v388_v24, %v392_v25 }
 0x175   :  { %2999 = vmatpush2.bf16.msra.mxu0 %v5785_v46  ;;  %3037 = vmatprep.subr.bf16.mxu1 %v5922_v56  ;;  %v440_v38 = vld [vmem:[%s9163_s1 + $0xc38] sm:$0xff]  ;;  %v458_v56 = vrot.slane %v8057_v29, %v457_v45 }
 0x176   :  { %3000 = vmatprep.subr.bf16.mxu0 %v5778_v52  ;;  %v380_v41 = vld [vmem:[%s9163_s1 + $0xa58] sm:$0xff]  ;;  %v5881_v52 = vcombine.low %v388_v24, %v392_v25  ;;  %v5930_v53 = vcombine.high %v436_v36, %v440_v38  ;;  %v5929_v61 = vcombine.low %v436_v36, %v440_v38  ;;  %v6270_v24 = vld [vmem:[%s9166_s3 + $0xa0] ss:$16 sps:$4 sm:$0xff]   ;;  %v6284_v38 = vld [vmem:[%s9166_s3 + $0x64] ss:$16 sps:$4 sm:$0xff]  }
 0x177   :  { %v384_v42 = vld [vmem:[%s9163_s1 + $0xa78] sm:$0xff]  ;;  %v6273_v25 = vld [vmem:[%s9166_s3 + $0x2a0] ss:$16 sps:$4 sm:$0xff]  }
 0x178   :  { %3038 = vmatpush2.bf16.msra.mxu1 %v5921_v16  ;;  %v5874_v55 = vcombine.high %v380_v41, %v384_v42  ;;  %v376_v60 = vld [vmem:[%s9163_s1 + $0xa38] sm:$0xff]  ;;  %v6279_v36 = vld [vmem:[%s9166_s3 + $0x280] ss:$16 sps:$4 sm:$0xff]  }
 0x179   :  { %3001 = vmatpush2.bf16.msra.mxu0 %v5777_v57  ;;  %3039 = vmatprep.subr.bf16.mxu1 %v5914_v2  ;;  %v372_v57 = vld [vmem:[%s9163_s1 + $0xa18] sm:$0xff]  ;;  %v2648_v2 = vadd.f32 %v7891_v34, %v458_v56  ;;  %v3104_v34 = vmax.f32 %v7873_v20, 0.0  ;;  %v6266_v20 = vld [vmem:[%s9166_s3 + $0xc4] ss:$16 sps:$4 sm:$0xff]   ;;  %v6300_v56 = vld [vmem:[%s9166_s3] ss:$16 sps:$4 sm:$0xff]  }
 0x17a   :  { %3002 = vmatprep.subr.bf16.mxu0 %v5770_v63  ;;  %v5873_v63 = vcombine.low %v380_v41, %v384_v42  ;;  %v5866_v1 = vcombine.high %v372_v57, %v376_v60  ;;  %v5865_v8 = vcombine.low %v372_v57, %v376_v60  ;;  %v6285_v41 = vld [vmem:[%s9166_s3 + $0x260] ss:$16 sps:$4 sm:$0xff]   ;;  %v6290_v42 = vld [vmem:[%s9166_s3 + $0x44] ss:$16 sps:$4 sm:$0xff]  }
 0x17b   :  { %v6308_v57 = vld [vmem:[%s9166_s3 + $0x1e4] ss:$16 sps:$4 sm:$0xff]  }
 0x17c   :  { %3040 = vmatpush2.bf16.msra.mxu1 %v5913_v27  ;;  %v6311_v60 = vld [vmem:[%s9166_s3 + $0x3e4] ss:$16 sps:$4 sm:$0xff]  }
 0x17d   :  { %3003 = vmatpush2.bf16.msra.mxu0 %v5769_v4  ;;  %3041 = vmatprep.subr.bf16.mxu1 %v5906_v10  ;;  %v6263_v10 = vld [vmem:[%s9166_s3 + $0x2e4] ss:$16 sps:$4 sm:$0xff]  }
 0x17e   :  { %3004 = vmatprep.subr.bf16.mxu0 %v5762_v7 }
 0x180   :  { %3042 = vmatpush2.bf16.msra.mxu1 %v5905_v14 }
 0x181   :  { %3005 = vmatpush2.bf16.msra.mxu0 %v5761_v11  ;;  %3043 = vmatprep.subr.bf16.mxu1 %v5898_v22  ;;  %v6269_v22 = vld [vmem:[%s9166_s3 + $0x2c4] ss:$16 sps:$4 sm:$0xff]  }
 0x182   :  { %3006 = vmatprep.subr.bf16.mxu0 %v5754_v15 }
 0x184   :  { %3044 = vmatpush2.bf16.msra.mxu1 %v5897_v58 }
 0x185   :  { %3007 = vmatpush2.bf16.msra.mxu0 %v5753_v23  ;;  %3045 = vmatprep.subr.bf16.mxu1 %v5890_v32  ;;  %v8108_v23 = vpack.c.bf16 %v3104_v34, %v3104_v34  ;;  %v6281_v32 = vld [vmem:[%s9166_s3 + $0x284] ss:$16 sps:$4 sm:$0xff]  }
 0x186   :  { %3008 = vmatprep.subr.bf16.mxu0 %v5746_v54  ;;  %v6267_v54 = vld [vmem:[%s9166_s3 + $0x2c0] ss:$16 sps:$4 sm:$0xff]   ;;  %v6332_v34 = vld [vmem:[%s9166_s3 + $0x164] ss:$16 sps:$4 sm:$0xff]  }
 0x188   :  { %v2686_v46 = vpop.f32.mrf.mxu0  ;;  %3046 = vmatpush2.bf16.msra.mxu1 %v5889_v59  ;;  %v6287_v59 = vld [vmem:[%s9166_s3 + $0x264] ss:$16 sps:$4 sm:$0xff]  }
 0x189   :  { %v2687_v47 = vadd.f32 %v2686_v46, %v2646_v43  ;;  %3009 = vmatpush2.bf16.msra.mxu0 %v5745_v35  ;;  %3047 = vmatprep.subr.bf16.mxu1 %v5882_v44  ;;  %v6276_v35 = vld [vmem:[%s9166_s3 + $0x80] ss:$16 sps:$4 sm:$0xff]   ;;  %v6293_v43 = vld [vmem:[%s9166_s3 + $0x244] ss:$16 sps:$4 sm:$0xff]  }
 0x18a   :  { %v2688_v49 = vpop.f32.mrf.mxu0  ;;  %3010 = vmatprep.subr.bf16.mxu0 %v5738_v39  ;;  %v6282_v39 = vld [vmem:[%s9166_s3 + $0x60] ss:$16 sps:$4 sm:$0xff]  }
 0x18b   :  { %v2689_v6 = vadd.f32 %v2688_v49, %v2648_v2  ;;  %v6288_v44 = vld [vmem:[%s9166_s3 + $0x40] ss:$16 sps:$4 sm:$0xff]  }
 0x18c   :  { %v2690_v26 = vpop.f32.mrf.mxu0  ;;  %3048 = vmatpush2.bf16.msra.mxu1 %v5881_v52  ;;  %v6291_v46 = vld [vmem:[%s9166_s3 + $0x240] ss:$16 sps:$4 sm:$0xff]  }
 0x18d   :  { %3011 = vmatpush2.bf16.msra.mxu0 %v5737_v48  ;;  %3049 = vmatprep.subr.bf16.mxu1 %v5874_v55  ;;  %v6299_v48 = vld [vmem:[%s9166_s3 + $0x224] ss:$16 sps:$4 sm:$0xff]   ;;  %v6294_v49 = vld [vmem:[%s9166_s3 + $0x20] ss:$16 sps:$4 sm:$0xff]  }
 0x18e   :  { %v2691_v16 = vpop.f32.mrf.mxu0  ;;  %3076 = vmatprep.subr.bf16.mxu0 %v5930_v53  ;;  %v6297_v52 = vld [vmem:[%s9166_s3 + $0x220] ss:$16 sps:$4 sm:$0xff]   ;;  %v6302_v53 = vld [vmem:[%s9166_s3 + $0x4] ss:$16 sps:$4 sm:$0xff]  }
 0x18f   :  { %v2727_v5 = vpop.f32.mrf.mxu1  ;;  %v6305_v55 = vld [vmem:[%s9166_s3 + $0x204] ss:$16 sps:$4 sm:$0xff]   ;;  %v6303_v26 = vld [vmem:[%s9166_s3 + $0x200] ss:$16 sps:$4 sm:$0xff]  }
 0x190   :  { %3013 = vmatmul.mubr.bf16.vlgmr.msra.gmra.mxu0 %v7030_v19  ;;  %v2768_v4 = vpop.f32.mrf.mxu0  ;;  %v2728_v27 = vadd.f32 %v2727_v5, %v2687_v47  ;;  %3050 = vmatpush2.bf16.msra.mxu1 %v5873_v63  ;;  %v6296_v47 = vld [vmem:[%s9166_s3 + $0x24] ss:$16 sps:$4 sm:$0xff]   ;;  %v6309_v16 = vld [vmem:[%s9166_s3 + $0x3e0] ss:$16 sps:$4 sm:$0xff]  }
 0x191   :  { %3077 = vmatpush1.bf16.msra.mxu0 %v5929_v61  ;;  %3094 = vmatprep.mubr.bf16.mxu0 %v6743_v31  ;;  %v2729_v9 = vpop.f32.mrf.mxu1  ;;  %v6258_v31 = vld [vmem:[%s9166_s3 + $0xe0] ss:$16 sps:$4 sm:$0xff]   ;;  %v6314_v63 = vld [vmem:[%s9166_s3 + $0x1c4] ss:$16 sps:$4 sm:$0xff]  }
 0x192   :  { %v2770_v7 = vpop.f32.mrf.mxu0  ;;  %4677 = vmatprep.subr.bf16.mxu0 %v6260_v0  ;;  %3051 = vmatprep.subr.bf16.mxu1 %v5866_v1  ;;  %v8094_v19 = vadd.f32 %v2768_v4, %v2728_v27  ;;  %v2730_v11 = vadd.f32 %v2729_v9, %v2689_v6  ;;  %v6306_v61 = vld [vmem:[%s9166_s3 + $0x1e0] ss:$16 sps:$4 sm:$0xff]   ;;  %v6317_v0 = vld [vmem:[%s9166_s3 + $0x3c4] ss:$16 sps:$4 sm:$0xff]  }
 0x193   :  { %v2731_v13 = vpop.f32.mrf.mxu1  ;;  %v6312_v1 = vld [vmem:[%s9166_s3 + $0x1c0] ss:$16 sps:$4 sm:$0xff]   ;;  %v6320_v4 = vld [vmem:[%s9166_s3 + $0x1a4] ss:$16 sps:$4 sm:$0xff]  }
 0x194   :  { %v2772_v12 = vpop.f32.mrf.mxu0  ;;  %v2771_v14 = vadd.f32 %v2770_v7, %v2730_v11  ;;  %3052 = vmatpush2.bf16.msra.mxu1 %v5865_v8  ;;  %v6315_v2 = vld [vmem:[%s9166_s3 + $0x3c0] ss:$16 sps:$4 sm:$0xff]   ;;  %v6323_v5 = vld [vmem:[%s9166_s3 + $0x3a4] ss:$16 sps:$4 sm:$0xff]  }
 0x195   :  { %v2732_v18 = vpop.f32.mrf.mxu1  ;;  %4718 = vmatprep.subr.bf16.mxu1 %v6263_v10  ;;  %v6318_v6 = vld [vmem:[%s9166_s3 + $0x1a0] ss:$16 sps:$4 sm:$0xff]   ;;  %v6326_v7 = vld [vmem:[%s9166_s3 + $0x184] ss:$16 sps:$4 sm:$0xff]  }
 0x196   :  { %v2773_v15 = vpop.f32.mrf.mxu0  ;;  %v3106_v50 = vmax.f32 %v2771_v14, 0.0  ;;  %v6321_v27 = vld [vmem:[%s9166_s3 + $0x3a0] ss:$16 sps:$4 sm:$0xff]   ;;  %v6329_v8 = vld [vmem:[%s9166_s3 + $0x384] ss:$16 sps:$4 sm:$0xff]  }
 0x197   :  { %3054 = vmatmul.mubr.bf16.vlgmr.msra.gmra.mxu1 %v7232_v33  ;;  %v6275_v33 = vld [vmem:[%s9166_s3 + $0x2a4] ss:$16 sps:$4 sm:$0xff]   ;;  %v6324_v9 = vld [vmem:[%s9166_s3 + $0x180] ss:$16 sps:$4 sm:$0xff]  }
 0x198   :  { %5934 = vmatmul.mubr.msk.bf16.vlgmr.msra.gmra.mxu0 %vm2443_vm0, %v7062_v37  ;;  %v8116_v58 = vpack.c.bf16 %v3106_v50, %v3106_v50  ;;  %4719 = vmatpush1.bf16.msra.mxu1 %v6261_v17  ;;  %v6272_v37 = vld [vmem:[%s9166_s3 + $0xa4] ss:$16 sps:$4 sm:$0xff]   ;;  %v6327_v10 = vld [vmem:[%s9166_s3 + $0x380] ss:$16 sps:$4 sm:$0xff]  }
 0x199   :  { %4678 = vmatpush1.bf16.msra.mxu0 %v6258_v31  ;;  %4709 = vmatprep.mubr.bf16.mxu0 %v8108_v23  ;;  %v6335_v11 = vld [vmem:[%s9166_s3 + $0x364] ss:$16 sps:$4 sm:$0xff]   ;;  %v6330_v12 = vld [vmem:[%s9166_s3 + $0x160] ss:$16 sps:$4 sm:$0xff]  }
 0x19a   :  { %4679 = vmatprep.subr.bf16.mxu0 %v6266_v20  ;;  %4720 = vmatprep.subr.bf16.mxu1 %v6269_v22  ;;  %v6333_v13 = vld [vmem:[%s9166_s3 + $0x360] ss:$16 sps:$4 sm:$0xff]   ;;  %v6338_v31 = vld [vmem:[%s9166_s3 + $0x144] ss:$16 sps:$4 sm:$0xff]  }
 0x19b   :  { %4750 = vmatprep.mubr.bf16.mxu1 %v8116_v58  ;;  %v6341_v14 = vld [vmem:[%s9166_s3 + $0x344] ss:$16 sps:$4 sm:$0xff]   ;;  %v6336_v15 = vld [vmem:[%s9166_s3 + $0x140] ss:$16 sps:$4 sm:$0xff]  }
 0x19c   :  { %4721 = vmatpush1.bf16.msra.mxu1 %v6267_v54  ;;  %v6339_v17 = vld [vmem:[%s9166_s3 + $0x340] ss:$16 sps:$4 sm:$0xff]   ;;  %v6344_v18 = vld [vmem:[%s9166_s3 + $0x124] ss:$16 sps:$4 sm:$0xff]  }
 0x19d   :  { %4680 = vmatpush1.bf16.msra.mxu0 %v6264_v40  ;;  %4722 = vmatprep.subr.bf16.mxu1 %v6275_v33  ;;  %v6347_v20 = vld [vmem:[%s9166_s3 + $0x324] ss:$16 sps:$4 sm:$0xff]   ;;  %v6342_v22 = vld [vmem:[%s9166_s3 + $0x120] ss:$16 sps:$4 sm:$0xff]  }
 0x19e   :  { %4681 = vmatprep.subr.bf16.mxu0 %v6272_v37  ;;  %v6345_v50 = vld [vmem:[%s9166_s3 + $0x320] ss:$16 sps:$4 sm:$0xff]   ;;  %v6350_v40 = vld [vmem:[%s9166_s3 + $0x104] ss:$16 sps:$4 sm:$0xff]  }
 0x19f   :  { %v6353_v54 = vld [vmem:[%s9166_s3 + $0x304] ss:$16 sps:$4 sm:$0xff]  }
 0x1a0   :  { %4723 = vmatpush1.bf16.msra.mxu1 %v6273_v25  ;;  %v3103_v25 = vmax.f32 %v7866_v28, 0.0  ;;  %v6410_v28 = vld [vmem:[%s9166_s3 + $0x6e4] ss:$16 sps:$4 sm:$0xff]  }
 0x1a1   :  { %4682 = vmatpush1.bf16.msra.mxu0 %v6270_v24  ;;  %4724 = vmatprep.subr.bf16.mxu1 %v6281_v32  ;;  %v6348_v24 = vld [vmem:[%s9166_s3 + $0x100] ss:$16 sps:$4 sm:$0xff]  }
 0x1a2   :  { %4683 = vmatprep.subr.bf16.mxu0 %v6278_v30  ;;  %v6351_v32 = vld [vmem:[%s9166_s3 + $0x300] ss:$16 sps:$4 sm:$0xff]  }
 0x1a4   :  { %4725 = vmatpush1.bf16.msra.mxu1 %v6279_v36  ;;  %v3105_v36 = vmax.f32 %v8094_v19, 0.0  ;;  %v6359_v19 = vld [vmem:[%s9166_s3 + $0x4c4] ss:$16 sps:$4 sm:$0xff]  }
 0x1a5   :  { %4684 = vmatpush1.bf16.msra.mxu0 %v6276_v35  ;;  %4726 = vmatprep.subr.bf16.mxu1 %v6287_v59  ;;  %v6356_v35 = vld [vmem:[%s9166_s3 + $0x4e4] ss:$16 sps:$4 sm:$0xff]  }
 0x1a6   :  { %4685 = vmatprep.subr.bf16.mxu0 %v6284_v38 }
 0x1a8   :  { %4727 = vmatpush1.bf16.msra.mxu1 %v6285_v41  ;;  %v6354_v41 = vld [vmem:[%s9166_s3 + $0x4e0] ss:$16 sps:$4 sm:$0xff]  }
 0x1a9   :  { %4686 = vmatpush1.bf16.msra.mxu0 %v6282_v39  ;;  %4728 = vmatprep.subr.bf16.mxu1 %v6293_v43 }
 0x1aa   :  { %4687 = vmatprep.subr.bf16.mxu0 %v6290_v42  ;;  %v8310_v42 = vpack.c.bf16 %v3103_v25, %v3103_v25  ;;  %v6386_v25 = vld [vmem:[%s9166_s3 + $0x5a4] ss:$16 sps:$4 sm:$0xff]  }
 0x1ac   :  { %4729 = vmatpush1.bf16.msra.mxu1 %v6291_v46  ;;  %v8318_v46 = vpack.c.bf16 %v3105_v36, %v3105_v36  ;;  %v6384_v36 = vld [vmem:[%s9166_s3 + $0x5a0] ss:$16 sps:$4 sm:$0xff]  }
 0x1ad   :  { %4688 = vmatpush1.bf16.msra.mxu0 %v6288_v44  ;;  %4730 = vmatprep.subr.bf16.mxu1 %v6299_v48  ;;  %v6408_v44 = vld [vmem:[%s9166_s3 + $0x6e0] ss:$16 sps:$4 sm:$0xff]   ;;  %v6416_v48 = vld [vmem:[%s9166_s3 + $0x6c4] ss:$16 sps:$4 sm:$0xff]  }
 0x1ae   :  { %4689 = vmatprep.subr.bf16.mxu0 %v6296_v47 }
 0x1b0   :  { %4731 = vmatpush1.bf16.msra.mxu1 %v6297_v52  ;;  %v6357_v52 = vld [vmem:[%s9166_s3 + $0x4c0] ss:$16 sps:$4 sm:$0xff]  }
 0x1b1   :  { %4690 = vmatpush1.bf16.msra.mxu0 %v6294_v49  ;;  %4732 = vmatprep.subr.bf16.mxu1 %v6305_v55  ;;  %v6414_v55 = vld [vmem:[%s9166_s3 + $0x6c0] ss:$16 sps:$4 sm:$0xff]  }
 0x1b2   :  { %4691 = vmatprep.subr.bf16.mxu0 %v6302_v53  ;;  %v6362_v53 = vld [vmem:[%s9166_s3 + $0x4a4] ss:$16 sps:$4 sm:$0xff]  }
 0x1b4   :  { %4733 = vmatpush1.bf16.msra.mxu1 %v6303_v26  ;;  %v6422_v26 = vld [vmem:[%s9166_s3 + $0x6a4] ss:$16 sps:$4 sm:$0xff]  }
 0x1b5   :  { %4692 = vmatpush1.bf16.msra.mxu0 %v6300_v56  ;;  %4734 = vmatprep.subr.bf16.mxu1 %v6311_v60  ;;  %v6360_v60 = vld [vmem:[%s9166_s3 + $0x4a0] ss:$16 sps:$4 sm:$0xff]  }
 0x1b6   :  { %4693 = vmatprep.subr.bf16.mxu0 %v6308_v57 }
 0x1b8   :  { %4735 = vmatpush2.bf16.msra.mxu1 %v6309_v16  ;;  %v6420_v16 = vld [vmem:[%s9166_s3 + $0x6a0] ss:$16 sps:$4 sm:$0xff]  }
 0x1b9   :  { %4694 = vmatpush2.bf16.msra.mxu0 %v6306_v61  ;;  %4736 = vmatprep.subr.bf16.mxu1 %v6317_v0  ;;  %v6365_v61 = vld [vmem:[%s9166_s3 + $0x484] ss:$16 sps:$4 sm:$0xff]  }
 0x1ba   :  { %4695 = vmatprep.subr.bf16.mxu0 %v6314_v63  ;;  %v6428_v0 = vld [vmem:[%s9166_s3 + $0x684] ss:$16 sps:$4 sm:$0xff]  }
 0x1bc   :  { %4737 = vmatpush2.bf16.msra.mxu1 %v6315_v2  ;;  %v6368_v2 = vld [vmem:[%s9166_s3 + $0x464] ss:$16 sps:$4 sm:$0xff]  }
 0x1bd   :  { %4696 = vmatpush2.bf16.msra.mxu0 %v6312_v1  ;;  %4738 = vmatprep.subr.bf16.mxu1 %v6323_v5  ;;  %v6363_v1 = vld [vmem:[%s9166_s3 + $0x480] ss:$16 sps:$4 sm:$0xff]   ;;  %v6434_v5 = vld [vmem:[%s9166_s3 + $0x664] ss:$16 sps:$4 sm:$0xff]  }
 0x1be   :  { %4697 = vmatprep.subr.bf16.mxu0 %v6320_v4  ;;  %v6426_v4 = vld [vmem:[%s9166_s3 + $0x680] ss:$16 sps:$4 sm:$0xff]  }
 0x1c0   :  { %4739 = vmatpush2.bf16.msra.mxu1 %v6321_v27  ;;  %v6371_v27 = vld [vmem:[%s9166_s3 + $0x444] ss:$16 sps:$4 sm:$0xff]  }
 0x1c1   :  { %4698 = vmatpush2.bf16.msra.mxu0 %v6318_v6  ;;  %4740 = vmatprep.subr.bf16.mxu1 %v6329_v8  ;;  %v6366_v6 = vld [vmem:[%s9166_s3 + $0x460] ss:$16 sps:$4 sm:$0xff]   ;;  %v6440_v8 = vld [vmem:[%s9166_s3 + $0x644] ss:$16 sps:$4 sm:$0xff]  }
 0x1c2   :  { %4699 = vmatprep.subr.bf16.mxu0 %v6326_v7  ;;  %v6432_v7 = vld [vmem:[%s9166_s3 + $0x660] ss:$16 sps:$4 sm:$0xff]  }
 0x1c4   :  { %4741 = vmatpush2.bf16.msra.mxu1 %v6327_v10  ;;  %v6374_v10 = vld [vmem:[%s9166_s3 + $0x424] ss:$16 sps:$4 sm:$0xff]  }
 0x1c5   :  { %4700 = vmatpush2.bf16.msra.mxu0 %v6324_v9  ;;  %4742 = vmatprep.subr.bf16.mxu1 %v6335_v11  ;;  %v6369_v9 = vld [vmem:[%s9166_s3 + $0x440] ss:$16 sps:$4 sm:$0xff]   ;;  %v6446_v11 = vld [vmem:[%s9166_s3 + $0x624] ss:$16 sps:$4 sm:$0xff]  }
 0x1c6   :  { %4701 = vmatprep.subr.bf16.mxu0 %v6332_v34  ;;  %v6438_v34 = vld [vmem:[%s9166_s3 + $0x640] ss:$16 sps:$4 sm:$0xff]  }
 0x1c8   :  { %4743 = vmatpush2.bf16.msra.mxu1 %v6333_v13  ;;  %v6377_v13 = vld [vmem:[%s9166_s3 + $0x404] ss:$16 sps:$4 sm:$0xff]  }
 0x1c9   :  { %4702 = vmatpush2.bf16.msra.mxu0 %v6330_v12  ;;  %4744 = vmatprep.subr.bf16.mxu1 %v6341_v14  ;;  %v6372_v12 = vld [vmem:[%s9166_s3 + $0x420] ss:$16 sps:$4 sm:$0xff]   ;;  %v6452_v14 = vld [vmem:[%s9166_s3 + $0x604] ss:$16 sps:$4 sm:$0xff]  }
 0x1ca   :  { %4703 = vmatprep.subr.bf16.mxu0 %v6338_v31  ;;  %v6444_v31 = vld [vmem:[%s9166_s3 + $0x620] ss:$16 sps:$4 sm:$0xff]  }
 0x1cc   :  { %4745 = vmatpush2.bf16.msra.mxu1 %v6339_v17  ;;  %v6380_v17 = vld [vmem:[%s9166_s3 + $0x5e4] ss:$16 sps:$4 sm:$0xff]  }
 0x1cd   :  { %4704 = vmatpush2.bf16.msra.mxu0 %v6336_v15  ;;  %4746 = vmatprep.subr.bf16.mxu1 %v6347_v20  ;;  %v6375_v15 = vld [vmem:[%s9166_s3 + $0x400] ss:$16 sps:$4 sm:$0xff]   ;;  %v6458_v20 = vld [vmem:[%s9166_s3 + $0x7e4] ss:$16 sps:$4 sm:$0xff]  }
 0x1ce   :  { %4705 = vmatprep.subr.bf16.mxu0 %v6344_v18  ;;  %v6450_v18 = vld [vmem:[%s9166_s3 + $0x600] ss:$16 sps:$4 sm:$0xff]  }
 0x1cf   :  { %v8287_v33 = vpop.f32.mrf.mxu1 }
 0x1d0   :  { %v8285_v37 = vpop.f32.mrf.mxu0  ;;  %4747 = vmatpush2.bf16.msra.mxu1 %v6345_v50  ;;  %v6383_v50 = vld [vmem:[%s9166_s3 + $0x5c4] ss:$16 sps:$4 sm:$0xff]  }
 0x1d1   :  { %4706 = vmatpush2.bf16.msra.mxu0 %v6342_v22  ;;  %v8302_v38 = vpop.f32.mrf.mxu1  ;;  %4748 = vmatprep.subr.bf16.mxu1 %v6353_v54  ;;  %v6378_v22 = vld [vmem:[%s9166_s3 + $0x5e0] ss:$16 sps:$4 sm:$0xff]   ;;  %v6464_v54 = vld [vmem:[%s9166_s3 + $0x7c4] ss:$16 sps:$4 sm:$0xff]  }
 0x1d2   :  { %v8293_v30 = vpop.f32.mrf.mxu0  ;;  %4707 = vmatprep.subr.bf16.mxu0 %v6350_v40  ;;  %v6456_v40 = vld [vmem:[%s9166_s3 + $0x7e0] ss:$16 sps:$4 sm:$0xff]  }
 0x1d3   :  { %v2854_v39 = vpop.f32.mrf.mxu1 }
 0x1d4   :  { %v2813_v59 = vpop.f32.mrf.mxu0  ;;  %4749 = vmatpush2.bf16.msra.mxu1 %v6351_v32  ;;  %v6462_v32 = vld [vmem:[%s9166_s3 + $0x7c0] ss:$16 sps:$4 sm:$0xff]   ;;  %v6476_v39 = vld [vmem:[%s9166_s3 + $0x784] ss:$16 sps:$4 sm:$0xff]  }
 0x1d5   :  { %4708 = vmatpush2.bf16.msra.mxu0 %v6348_v24  ;;  %v2855_v47 = vpop.f32.mrf.mxu1  ;;  %4800 = vmatprep.subr.bf16.mxu1 %v6410_v28  ;;  %v6381_v24 = vld [vmem:[%s9166_s3 + $0x5c0] ss:$16 sps:$4 sm:$0xff]   ;;  %v6389_v28 = vld [vmem:[%s9166_s3 + $0x584] ss:$16 sps:$4 sm:$0xff]  }
 0x1d6   :  { %v2814_v43 = vpop.f32.mrf.mxu0  ;;  %4759 = vmatprep.subr.bf16.mxu0 %v6356_v35  ;;  %v6470_v35 = vld [vmem:[%s9166_s3 + $0x7a4] ss:$16 sps:$4 sm:$0xff]   ;;  %v6468_v59 = vld [vmem:[%s9166_s3 + $0x7a0] ss:$16 sps:$4 sm:$0xff]  }
 0x1d7   :  { %4751 = vmatmul.mubr.bf16.vlgmr.msra.gmra.mxu1 %v8318_v46  ;;  %v8325_v49 = vpop.f32.mrf.mxu1  ;;  %v6392_v43 = vld [vmem:[%s9166_s3 + $0x564] ss:$16 sps:$4 sm:$0xff]  }
 0x1d8   :  { %4710 = vmatmul.mubr.bf16.vlgmr.msra.gmra.mxu0 %v8310_v42  ;;  %4801 = vmatpush1.bf16.msra.mxu1 %v6408_v44  ;;  %v461_v44 = vsub.s32 4, %v7605_v51  ;;  %v6482_v47 = vld [vmem:[%s9166_s3 + $0x764] ss:$16 sps:$4 sm:$0xff]  }
 0x1d9   :  { %4760 = vmatpush1.bf16.msra.mxu0 %v6354_v41  ;;  %v8336_v56 = vpop.f32.mrf.mxu1  ;;  %4802 = vmatprep.subr.bf16.mxu1 %v6416_v48  ;;  %v6387_v41 = vld [vmem:[%s9166_s3 + $0x580] ss:$16 sps:$4 sm:$0xff]   ;;  %v465_v48 = vsub.s32 5, %v7605_v51 }
 0x1da   :  { %4761 = vmatprep.subr.bf16.mxu0 %v6359_v19  ;;  %v6474_v19 = vld [vmem:[%s9166_s3 + $0x780] ss:$16 sps:$4 sm:$0xff]  }
 0x1db   :  { %v2936_v57 = vpop.f32.mrf.mxu1 }
 0x1dc   :  { %4803 = vmatpush1.bf16.msra.mxu1 %v6414_v55  ;;  %v6480_v55 = vld [vmem:[%s9166_s3 + $0x760] ss:$16 sps:$4 sm:$0xff]   ;;  %v6488_v57 = vld [vmem:[%s9166_s3 + $0x744] ss:$16 sps:$4 sm:$0xff]  }
 0x1dd   :  { %4762 = vmatpush1.bf16.msra.mxu0 %v6357_v52  ;;  %v2937_v63 = vpop.f32.mrf.mxu1  ;;  %4804 = vmatprep.subr.bf16.mxu1 %v6422_v26  ;;  %v6390_v52 = vld [vmem:[%s9166_s3 + $0x560] ss:$16 sps:$4 sm:$0xff]   ;;  %v462_v26 = vrot.slane %v8057_v29, %v461_v44  ;;  %v6441_v44 = vld [vmem:[%s9166_s3 + $0x8] ss:$16 sps:$4 sm:$0xff]  }
 0x1de   :  { %4763 = vmatprep.subr.bf16.mxu0 %v6362_v53  ;;  %v6395_v53 = vld [vmem:[%s9166_s3 + $0x544] ss:$16 sps:$4 sm:$0xff]   ;;  %v6486_v63 = vld [vmem:[%s9166_s3 + $0x740] ss:$16 sps:$4 sm:$0xff]  }
 0x1e0   :  { %4805 = vmatpush1.bf16.msra.mxu1 %v6420_v16  ;;  %v6398_v16 = vld [vmem:[%s9166_s3 + $0x524] ss:$16 sps:$4 sm:$0xff]  }
 0x1e1   :  { %4764 = vmatpush1.bf16.msra.mxu0 %v6360_v60  ;;  %4806 = vmatprep.subr.bf16.mxu1 %v6428_v0  ;;  %v466_v60 = vrot.slane %v8057_v29, %v465_v48  ;;  %v2810_v0 = vadd.f32 %v8285_v37, %v462_v26  ;;  %v6492_v37 = vld [vmem:[%s9166_s3 + $0x720] ss:$16 sps:$4 sm:$0xff]   ;;  %v6447_v48 = vld [vmem:[%s9166_s3 + $0x1e8] ss:$16 sps:$4 sm:$0xff]  }
 0x1e2   :  { %4765 = vmatprep.subr.bf16.mxu0 %v6365_v61  ;;  %v6393_v61 = vld [vmem:[%s9166_s3 + $0x540] ss:$16 sps:$4 sm:$0xff]   ;;  %v6459_v26 = vld [vmem:[%s9166_s3 + $0x1a8] ss:$16 sps:$4 sm:$0xff]  }
 0x1e4   :  { %4807 = vmatpush1.bf16.msra.mxu1 %v6426_v4  ;;  %v6396_v4 = vld [vmem:[%s9166_s3 + $0x520] ss:$16 sps:$4 sm:$0xff]  }
 0x1e5   :  { %4766 = vmatpush1.bf16.msra.mxu0 %v6363_v1  ;;  %4808 = vmatprep.subr.bf16.mxu1 %v6434_v5  ;;  %v6494_v1 = vld [vmem:[%s9166_s3 + $0x724] ss:$16 sps:$4 sm:$0xff]  }
 0x1e6   :  { %4767 = vmatprep.subr.bf16.mxu0 %v6368_v2  ;;  %v2812_v2 = vadd.f32 %v8293_v30, %v466_v60  ;;  %v6401_v5 = vld [vmem:[%s9166_s3 + $0x504] ss:$16 sps:$4 sm:$0xff]   ;;  %v6465_v60 = vld [vmem:[%s9166_s3 + $0x188] ss:$16 sps:$4 sm:$0xff]  }
 0x1e7   :  { %v6500_v30 = vld [vmem:[%s9166_s3 + $0x704] ss:$16 sps:$4 sm:$0xff]  }
 0x1e8   :  { %4809 = vmatpush1.bf16.msra.mxu1 %v6432_v7  ;;  %v2853_v7 = vadd.f32 %v8302_v38, %v2812_v2  ;;  %v6485_v2 = vld [vmem:[%s9166_s3 + $0x12c] ss:$16 sps:$4 sm:$0xff]  }
 0x1e9   :  { %4768 = vmatpush1.bf16.msra.mxu0 %v6366_v6  ;;  %4810 = vmatprep.subr.bf16.mxu1 %v6440_v8  ;;  %v2851_v6 = vadd.f32 %v8287_v33, %v2810_v0  ;;  %v6404_v33 = vld [vmem:[%s9166_s3 + $0xec] ss:$16 sps:$4 sm:$0xff]   ;;  %v6477_v0 = vld [vmem:[%s9166_s3 + $0x148] ss:$16 sps:$4 sm:$0xff]  }
 0x1ea   :  { %4769 = vmatprep.subr.bf16.mxu0 %v6371_v27 }
 0x1ec   :  { %4811 = vmatpush1.bf16.msra.mxu1 %v6438_v34  ;;  %v6498_v34 = vld [vmem:[%s9166_s3 + $0x700] ss:$16 sps:$4 sm:$0xff]  }
 0x1ed   :  { %4770 = vmatpush1.bf16.msra.mxu0 %v6369_v9  ;;  %4812 = vmatprep.subr.bf16.mxu1 %v6446_v11  ;;  %v6399_v9 = vld [vmem:[%s9166_s3 + $0x500] ss:$16 sps:$4 sm:$0xff]  }
 0x1ee   :  { %4771 = vmatprep.subr.bf16.mxu0 %v6374_v10 }
 0x1f0   :  { %4813 = vmatpush1.bf16.msra.mxu1 %v6444_v31 }
 0x1f1   :  { %4772 = vmatpush1.bf16.msra.mxu0 %v6372_v12  ;;  %4814 = vmatprep.subr.bf16.mxu1 %v6452_v14  ;;  %v6506_v12 = vld [vmem:[%s9166_s3 + $0x2ec] ss:$16 sps:$4 sm:$0xff]  }
 0x1f2   :  { %4773 = vmatprep.subr.bf16.mxu0 %v6377_v13 }
 0x1f4   :  { %4815 = vmatpush1.bf16.msra.mxu1 %v6450_v18 }
 0x1f5   :  { %4774 = vmatpush1.bf16.msra.mxu0 %v6375_v15  ;;  %4816 = vmatprep.subr.bf16.mxu1 %v6458_v20 }
 0x1f6   :  { %4775 = vmatprep.subr.bf16.mxu0 %v6380_v17 }
 0x1f8   :  { %4817 = vmatpush2.bf16.msra.mxu1 %v6456_v40 }
 0x1f9   :  { %4776 = vmatpush2.bf16.msra.mxu0 %v6378_v22  ;;  %4818 = vmatprep.subr.bf16.mxu1 %v6464_v54  ;;  %v6405_v54 = vld [vmem:[%s9166_s3 + $0xc8] ss:$16 sps:$4 sm:$0xff]  }
 0x1fa   :  { %4777 = vmatprep.subr.bf16.mxu0 %v6383_v50 }
 0x1fc   :  { %4819 = vmatpush2.bf16.msra.mxu1 %v6462_v32  ;;  %v6411_v32 = vld [vmem:[%s9166_s3 + $0xa8] ss:$16 sps:$4 sm:$0xff]  }
 0x1fd   :  { %4778 = vmatpush2.bf16.msra.mxu0 %v6381_v24  ;;  %4820 = vmatprep.subr.bf16.mxu1 %v6470_v35  ;;  %v6413_v24 = vld [vmem:[%s9166_s3 + $0xac] ss:$16 sps:$4 sm:$0xff]   ;;  %v6417_v35 = vld [vmem:[%s9166_s3 + $0x88] ss:$16 sps:$4 sm:$0xff]  }
 0x1fe   :  { %4779 = vmatprep.subr.bf16.mxu0 %v6386_v25 }
 0x200   :  { %4821 = vmatpush2.bf16.msra.mxu1 %v6468_v59  ;;  %v6431_v59 = vld [vmem:[%s9166_s3 + $0x4c] ss:$16 sps:$4 sm:$0xff]  }
 0x201   :  { %4780 = vmatpush2.bf16.msra.mxu0 %v6384_v36  ;;  %4822 = vmatprep.subr.bf16.mxu1 %v6476_v39  ;;  %v6425_v36 = vld [vmem:[%s9166_s3 + $0x6c] ss:$16 sps:$4 sm:$0xff]   ;;  %v6429_v39 = vld [vmem:[%s9166_s3 + $0x48] ss:$16 sps:$4 sm:$0xff]  }
 0x202   :  { %4781 = vmatprep.subr.bf16.mxu0 %v6389_v28  ;;  %v6423_v28 = vld [vmem:[%s9166_s3 + $0x68] ss:$16 sps:$4 sm:$0xff]  }
 0x204   :  { %4823 = vmatpush2.bf16.msra.mxu1 %v6474_v19  ;;  %v6443_v19 = vld [vmem:[%s9166_s3 + $0xc] ss:$16 sps:$4 sm:$0xff]  }
 0x205   :  { %4782 = vmatpush2.bf16.msra.mxu0 %v6387_v41  ;;  %4824 = vmatprep.subr.bf16.mxu1 %v6482_v47  ;;  %v6437_v41 = vld [vmem:[%s9166_s3 + $0x2c] ss:$16 sps:$4 sm:$0xff]  }
 0x206   :  { %4783 = vmatprep.subr.bf16.mxu0 %v6392_v43  ;;  %v6435_v43 = vld [vmem:[%s9166_s3 + $0x28] ss:$16 sps:$4 sm:$0xff]   ;;  %v6449_v47 = vld [vmem:[%s9166_s3 + $0x1ec] ss:$16 sps:$4 sm:$0xff]  }
 0x208   :  { %4825 = vmatpush2.bf16.msra.mxu1 %v6480_v55  ;;  %v6461_v55 = vld [vmem:[%s9166_s3 + $0x1ac] ss:$16 sps:$4 sm:$0xff]  }
 0x209   :  { %4784 = vmatpush2.bf16.msra.mxu0 %v6390_v52  ;;  %4826 = vmatprep.subr.bf16.mxu1 %v6488_v57  ;;  %v6455_v52 = vld [vmem:[%s9166_s3 + $0x1cc] ss:$16 sps:$4 sm:$0xff]  }
 0x20a   :  { %4785 = vmatprep.subr.bf16.mxu0 %v6395_v53  ;;  %v6453_v53 = vld [vmem:[%s9166_s3 + $0x1c8] ss:$16 sps:$4 sm:$0xff]   ;;  %v6467_v57 = vld [vmem:[%s9166_s3 + $0x18c] ss:$16 sps:$4 sm:$0xff]  }
 0x20c   :  { %4827 = vmatpush2.bf16.msra.mxu1 %v6486_v63  ;;  %v6479_v63 = vld [vmem:[%s9166_s3 + $0x14c] ss:$16 sps:$4 sm:$0xff]  }
 0x20d   :  { %4786 = vmatpush2.bf16.msra.mxu0 %v6393_v61  ;;  %4828 = vmatprep.subr.bf16.mxu1 %v6494_v1  ;;  %v6473_v61 = vld [vmem:[%s9166_s3 + $0x16c] ss:$16 sps:$4 sm:$0xff]   ;;  %v469_v1 = vsub.s32 6, %v7605_v51 }
 0x20e   :  { %4787 = vmatprep.subr.bf16.mxu0 %v6398_v16  ;;  %v6471_v16 = vld [vmem:[%s9166_s3 + $0x168] ss:$16 sps:$4 sm:$0xff]  }
 0x210   :  { %v2891_v27 = vpop.f32.mrf.mxu0  ;;  %4829 = vmatpush2.bf16.msra.mxu1 %v6492_v37  ;;  %v6483_v37 = vld [vmem:[%s9166_s3 + $0x128] ss:$16 sps:$4 sm:$0xff]  }
 0x211   :  { %v2892_v8 = vadd.f32 %v2891_v27, %v2851_v6  ;;  %4788 = vmatpush2.bf16.msra.mxu0 %v6396_v4  ;;  %4830 = vmatprep.subr.bf16.mxu1 %v6500_v30  ;;  %v473_v4 = vsub.s32 7, %v7605_v51  ;;  %v470_v6 = vrot.slane %v8057_v29, %v469_v1  ;;  %v6491_v27 = vld [vmem:[%s9166_s3 + $0x10c] ss:$16 sps:$4 sm:$0xff]   ;;  %v6534_v1 = vld [vmem:[%s9166_s3 + $0x248] ss:$16 sps:$4 sm:$0xff]  }
 0x212   :  { %v2893_v10 = vpop.f32.mrf.mxu0  ;;  %4789 = vmatprep.subr.bf16.mxu0 %v6401_v5 }
 0x213   :  { %v2933_v11 = vadd.f32 %v8325_v49, %v2892_v8  ;;  %v2894_v38 = vadd.f32 %v2893_v10, %v2853_v7  ;;  %v6402_v49 = vld [vmem:[%s9166_s3 + $0xe8] ss:$16 sps:$4 sm:$0xff]   ;;  %v474_v7 = vrot.slane %v8057_v29, %v473_v4  ;;  %v6542_v4 = vld [vmem:[%s9166_s3 + $0x22c] ss:$16 sps:$4 sm:$0xff]  }
 0x214   :  { %v2895_v13 = vpop.f32.mrf.mxu0  ;;  %4831 = vmatpush2.bf16.msra.mxu1 %v6498_v34  ;;  %v6497_v34 = vld [vmem:[%s9166_s3 + $0x4ec] ss:$16 sps:$4 sm:$0xff]   ;;  %v6495_v29 = vld [vmem:[%s9166_s3 + $0x4e8] ss:$16 sps:$4 sm:$0xff]  }
 0x215   :  { %v2935_v31 = vadd.f32 %v8336_v56, %v2894_v38  ;;  %4790 = vmatpush2.bf16.msra.mxu0 %v6399_v9  ;;  %v3107_v14 = vmax.f32 %v2933_v11, 0.0  ;;  %4882 = vmatprep.subr.bf16.mxu1 %v6506_v12  ;;  %v6407_v56 = vld [vmem:[%s9166_s3 + $0xcc] ss:$16 sps:$4 sm:$0xff]   ;;  %v6489_v9 = vld [vmem:[%s9166_s3 + $0x108] ss:$16 sps:$4 sm:$0xff]  }
 0x216   :  { %v2896_v15 = vpop.f32.mrf.mxu0  ;;  %4841 = vmatprep.subr.bf16.mxu0 %v6404_v33 }
 0x217   :  { %v3108_v17 = vmax.f32 %v2935_v31, 0.0  ;;  %v8521_v20 = vpop.f32.mrf.mxu1  ;;  %v8526_v22 = vpack.c.bf16 %v3107_v14, %v3107_v14 }
 0x218   :  { %v2974_v10 = vadd.f32 %v8521_v20, %v470_v6  ;;  %v6540_v6 = vld [vmem:[%s9166_s3 + $0x228] ss:$16 sps:$4 sm:$0xff]  }
 0x219   :  { %v8519_v18 = vpack.c.bf16 %v3108_v17, %v3108_v17  ;;  %v8531_v50 = vpop.f32.mrf.mxu1  ;;  %v6503_v17 = vld [vmem:[%s9166_s3 + $0x4cc] ss:$16 sps:$4 sm:$0xff]  }
 0x21a   :  { %v2976_v11 = vadd.f32 %v8531_v50, %v474_v7  ;;  %v6549_v7 = vld [vmem:[%s9166_s3 + $0x5c8] ss:$16 sps:$4 sm:$0xff]  }
 0x21b   :  { %4791 = vmatprep.mubr.bf16.mxu0 %v8519_v18  ;;  %v2977_v40 = vpop.f32.mrf.mxu1 }
 0x21c   :  { %4792 = vmatmul.mubr.bf16.vlgmr.msra.gmra.mxu0 %v8526_v22 }
 0x21d   :  { %4842 = vmatpush1.bf16.msra.mxu0 %v6402_v49  ;;  %4873 = vmatprep.mubr.bf16.mxu0 %v8108_v23  ;;  %v2978_v25 = vpop.f32.mrf.mxu1  ;;  %v6419_v23 = vld [vmem:[%s9166_s3 + $0x8c] ss:$16 sps:$4 sm:$0xff]  }
 0x21e   :  { %4843 = vmatprep.subr.bf16.mxu0 %v6407_v56 }
 0x221   :  { %4844 = vmatpush1.bf16.msra.mxu0 %v6405_v54  ;;  %v6501_v54 = vld [vmem:[%s9166_s3 + $0x4c8] ss:$16 sps:$4 sm:$0xff]  }
 0x222   :  { %4845 = vmatprep.subr.bf16.mxu0 %v6413_v24 }
 0x225   :  { %4846 = vmatpush1.bf16.msra.mxu0 %v6411_v32  ;;  %v6509_v32 = vld [vmem:[%s9166_s3 + $0x4ac] ss:$16 sps:$4 sm:$0xff]  }
 0x226   :  { %4847 = vmatprep.subr.bf16.mxu0 %v6419_v23 }
 0x229   :  { %4848 = vmatpush1.bf16.msra.mxu0 %v6417_v35 }
 0x22a   :  { %4849 = vmatprep.subr.bf16.mxu0 %v6425_v36 }
 0x22d   :  { %4850 = vmatpush1.bf16.msra.mxu0 %v6423_v28  ;;  %v6504_v28 = vld [vmem:[%s9166_s3 + $0x2e8] ss:$16 sps:$4 sm:$0xff]  }
 0x22e   :  { %4851 = vmatprep.subr.bf16.mxu0 %v6431_v59 }
 0x231   :  { %4852 = vmatpush1.bf16.msra.mxu0 %v6429_v39  ;;  %v6512_v39 = vld [vmem:[%s9166_s3 + $0x2cc] ss:$16 sps:$4 sm:$0xff]  }
 0x232   :  { %4853 = vmatprep.subr.bf16.mxu0 %v6437_v41  ;;  %v6515_v41 = vld [vmem:[%s9166_s3 + $0x48c] ss:$16 sps:$4 sm:$0xff]  }
 0x235   :  { %4854 = vmatpush1.bf16.msra.mxu0 %v6435_v43  ;;  %v6510_v43 = vld [vmem:[%s9166_s3 + $0x2c8] ss:$16 sps:$4 sm:$0xff]  }
 0x236   :  { %4855 = vmatprep.subr.bf16.mxu0 %v6443_v19  ;;  %v6513_v19 = vld [vmem:[%s9166_s3 + $0x488] ss:$16 sps:$4 sm:$0xff]  }
 0x239   :  { %4856 = vmatpush1.bf16.msra.mxu0 %v6441_v44  ;;  %v6521_v44 = vld [vmem:[%s9166_s3 + $0x46c] ss:$16 sps:$4 sm:$0xff]  }
 0x23a   :  { %4857 = vmatprep.subr.bf16.mxu0 %v6449_v47  ;;  %v6518_v47 = vld [vmem:[%s9166_s3 + $0x2ac] ss:$16 sps:$4 sm:$0xff]  }
 0x23d   :  { %4858 = vmatpush2.bf16.msra.mxu0 %v6447_v48  ;;  %v6516_v48 = vld [vmem:[%s9166_s3 + $0x2a8] ss:$16 sps:$4 sm:$0xff]  }
 0x23e   :  { %4859 = vmatprep.subr.bf16.mxu0 %v6455_v52  ;;  %v6519_v52 = vld [vmem:[%s9166_s3 + $0x468] ss:$16 sps:$4 sm:$0xff]  }
 0x241   :  { %4860 = vmatpush2.bf16.msra.mxu0 %v6453_v53  ;;  %v6524_v53 = vld [vmem:[%s9166_s3 + $0x28c] ss:$16 sps:$4 sm:$0xff]  }
 0x242   :  { %4861 = vmatprep.subr.bf16.mxu0 %v6461_v55  ;;  %v6522_v55 = vld [vmem:[%s9166_s3 + $0x288] ss:$16 sps:$4 sm:$0xff]  }
 0x245   :  { %4862 = vmatpush2.bf16.msra.mxu0 %v6459_v26  ;;  %v6525_v26 = vld [vmem:[%s9166_s3 + $0x448] ss:$16 sps:$4 sm:$0xff]  }
 0x246   :  { %4863 = vmatprep.subr.bf16.mxu0 %v6467_v57  ;;  %v6533_v57 = vld [vmem:[%s9166_s3 + $0x42c] ss:$16 sps:$4 sm:$0xff]  }
 0x249   :  { %4864 = vmatpush2.bf16.msra.mxu0 %v6465_v60  ;;  %v6530_v60 = vld [vmem:[%s9166_s3 + $0x26c] ss:$16 sps:$4 sm:$0xff]  }
 0x24a   :  { %4865 = vmatprep.subr.bf16.mxu0 %v6473_v61  ;;  %v6528_v61 = vld [vmem:[%s9166_s3 + $0x268] ss:$16 sps:$4 sm:$0xff]  }
 0x24d   :  { %4866 = vmatpush2.bf16.msra.mxu0 %v6471_v16  ;;  %v6531_v16 = vld [vmem:[%s9166_s3 + $0x428] ss:$16 sps:$4 sm:$0xff]  }
 0x24e   :  { %4867 = vmatprep.subr.bf16.mxu0 %v6479_v63  ;;  %v6539_v63 = vld [vmem:[%s9166_s3 + $0x40c] ss:$16 sps:$4 sm:$0xff]  }
 0x250   :  { %v3014_v5 = vpop.f32.mrf.mxu0 }
 0x251   :  { %4868 = vmatpush2.bf16.msra.mxu0 %v6477_v0  ;;  %v3015_v38 = vadd.f32 %v3014_v5, %v2974_v10  ;;  %v6536_v0 = vld [vmem:[%s9166_s3 + $0x24c] ss:$16 sps:$4 sm:$0xff]  }
 0x252   :  { %v3016_v30 = vpop.f32.mrf.mxu0  ;;  %4869 = vmatprep.subr.bf16.mxu0 %v6485_v2  ;;  %v6537_v2 = vld [vmem:[%s9166_s3 + $0x408] ss:$16 sps:$4 sm:$0xff]   ;;  %v6545_v5 = vld [vmem:[%s9166_s3 + $0x5ec] ss:$16 sps:$4 sm:$0xff]  }
 0x253   :  { %v3017_v31 = vadd.f32 %v3016_v30, %v2976_v11  ;;  %v6551_v30 = vld [vmem:[%s9166_s3 + $0x5cc] ss:$16 sps:$4 sm:$0xff]  }
 0x254   :  { %v3018_v8 = vpop.f32.mrf.mxu0  ;;  %v6554_v10 = vld [vmem:[%s9166_s3 + $0x3ec] ss:$16 sps:$4 sm:$0xff]  }
 0x255   :  { %4870 = vmatpush2.bf16.msra.mxu0 %v6483_v37  ;;  %v6543_v37 = vld [vmem:[%s9166_s3 + $0x5e8] ss:$16 sps:$4 sm:$0xff]   ;;  %v6563_v11 = vld [vmem:[%s9166_s3 + $0x58c] ss:$16 sps:$4 sm:$0xff]  }
 0x256   :  { %v3019_v33 = vpop.f32.mrf.mxu0  ;;  %4871 = vmatprep.subr.bf16.mxu0 %v6491_v27  ;;  %v6548_v27 = vld [vmem:[%s9166_s3 + $0x20c] ss:$16 sps:$4 sm:$0xff]   ;;  %v6546_v8 = vld [vmem:[%s9166_s3 + $0x208] ss:$16 sps:$4 sm:$0xff]  }
 0x257   :  { %v3055_v13 = vpop.f32.mrf.mxu1  ;;  %v6555_v33 = vld [vmem:[%s9166_s3 + $0x5a8] ss:$16 sps:$4 sm:$0xff]  }
 0x258   :  { %v3096_v12 = vpop.f32.mrf.mxu0  ;;  %v3056_v14 = vadd.f32 %v3055_v13, %v3015_v38  ;;  %v6560_v38 = vld [vmem:[%s9166_s3 + $0x3cc] ss:$16 sps:$4 sm:$0xff]   ;;  %v6558_v13 = vld [vmem:[%s9166_s3 + $0x3c8] ss:$16 sps:$4 sm:$0xff]  }
 0x259   :  { %4872 = vmatpush2.bf16.msra.mxu0 %v6489_v9  ;;  %v3057_v20 = vpop.f32.mrf.mxu1  ;;  %v6557_v9 = vld [vmem:[%s9166_s3 + $0x5ac] ss:$16 sps:$4 sm:$0xff]  }
 0x25a   :  { %v3098_v15 = vpop.f32.mrf.mxu0  ;;  %4923 = vmatprep.subr.bf16.mxu0 %v6497_v34  ;;  %v3097_v49 = vadd.f32 %v3096_v12, %v3056_v14  ;;  %v3058_v56 = vadd.f32 %v3057_v20, %v3017_v31  ;;  %v6552_v34 = vld [vmem:[%s9166_s3 + $0x3e8] ss:$16 sps:$4 sm:$0xff]   ;;  %v6566_v31 = vld [vmem:[%s9166_s3 + $0x3ac] ss:$16 sps:$4 sm:$0xff]  }
 0x25b   :  { %v3059_v40 = vpop.f32.mrf.mxu1  ;;  %v6561_v12 = vld [vmem:[%s9166_s3 + $0x588] ss:$16 sps:$4 sm:$0xff]   ;;  %v6572_v20 = vld [vmem:[%s9166_s3 + $0x38c] ss:$16 sps:$4 sm:$0xff]  }
 0x25c   :  { %4874 = vmatmul.mubr.bf16.vlgmr.msra.gmra.mxu0 %v8310_v42  ;;  %v3100_v50 = vpop.f32.mrf.mxu0  ;;  %v3099_v24 = vadd.f32 %v3098_v15, %v3058_v56  ;;  %v3109_v23 = vmax.f32 %v3097_v49, 0.0  ;;  %v6507_v42 = vld [vmem:[%s9166_s3 + $0x4a8] ss:$16 sps:$4 sm:$0xff]   ;;  %v6578_v40 = vld [vmem:[%s9166_s3 + $0x36c] ss:$16 sps:$4 sm:$0xff]  }
 0x25d   :  { %4924 = vmatpush1.bf16.msra.mxu0 %v6495_v29  ;;  %4955 = vmatprep.mubr.bf16.mxu0 %v8519_v18  ;;  %v3060_v35 = vpop.f32.mrf.mxu1  ;;  %v6569_v29 = vld [vmem:[%s9166_s3 + $0x56c] ss:$16 sps:$4 sm:$0xff]   ;;  %v6567_v14 = vld [vmem:[%s9166_s3 + $0x568] ss:$16 sps:$4 sm:$0xff]  }
 0x25e   :  { %v3101_v25 = vpop.f32.mrf.mxu0  ;;  %4925 = vmatprep.subr.bf16.mxu0 %v6503_v17  ;;  %v3110_v36 = vmax.f32 %v3099_v24, 0.0  ;;  %v8654_v59 = vpack.c.bf16 %v3109_v23, %v3109_v23  ;;  %v6564_v15 = vld [vmem:[%s9166_s3 + $0x3a8] ss:$16 sps:$4 sm:$0xff]   ;;  %v6575_v17 = vld [vmem:[%s9166_s3 + $0x54c] ss:$16 sps:$4 sm:$0xff]  }
 0x25f   :  { %v6573_v49 = vld [vmem:[%s9166_s3 + $0x548] ss:$16 sps:$4 sm:$0xff]   ;;  %v6581_v50 = vld [vmem:[%s9166_s3 + $0x52c] ss:$16 sps:$4 sm:$0xff]   ;;  %v8806_v25 = vld [vmem:[%s9168_s4] sm:$0xf] }
 0x260   :  { %v8649_v18 = vpack.c.bf16 %v3110_v36, %v3110_v36  ;;  %v6570_v56 = vld [vmem:[%s9166_s3 + $0x388] ss:$16 sps:$4 sm:$0xff]   ;;  %v6584_v23 = vld [vmem:[%s9166_s3 + $0x34c] ss:$16 sps:$4 sm:$0xff]   ;;  %v3380_v35 = vrot.slane %v8806_v25, %v7620_v62 }
 0x261   :  { %4926 = vmatpush1.bf16.msra.mxu0 %v6501_v54  ;;  %v6579_v54 = vld [vmem:[%s9166_s3 + $0x528] ss:$16 sps:$4 sm:$0xff]  }
 0x262   :  { %4927 = vmatprep.subr.bf16.mxu0 %v6509_v32  ;;  %4832 = vmatprep.mubr.bf16.mxu1 %v8649_v18  ;;  %v6576_v24 = vld [vmem:[%s9166_s3 + $0x368] ss:$16 sps:$4 sm:$0xff]   ;;  %v6587_v32 = vld [vmem:[%s9166_s3 + $0x50c] ss:$16 sps:$4 sm:$0xff]  }
 0x263   :  { %4833 = vmatmul.mubr.bf16.vlgmr.msra.gmra.mxu1 %v8654_v59  ;;  %v6585_v36 = vld [vmem:[%s9166_s3 + $0x508] ss:$16 sps:$4 sm:$0xff]  }
 0x264   :  { %4883 = vmatpush1.bf16.msra.mxu1 %v6504_v28  ;;  %4914 = vmatprep.mubr.bf16.mxu1 %v8116_v58  ;;  %v6527_v58 = vld [vmem:[%s9166_s3 + $0x44c] ss:$16 sps:$4 sm:$0xff]  }
 0x265   :  { %4928 = vmatpush1.bf16.msra.mxu0 %v6507_v42  ;;  %4884 = vmatprep.subr.bf16.mxu1 %v6512_v39  ;;  %v6582_v42 = vld [vmem:[%s9166_s3 + $0x348] ss:$16 sps:$4 sm:$0xff]   ;;  %v6644_v28 = vld [vmem:[%s9167_s5 + $0x74] ss:$8 sps:$4 sm:$0xff]   ;;  %v3384_v39 = vrot.slane %v8806_v25, %v7626_v3 }
 0x266   :  { %4929 = vmatprep.subr.bf16.mxu0 %v6515_v41  ;;  %v6590_v41 = vld [vmem:[%s9166_s3 + $0x32c] ss:$16 sps:$4 sm:$0xff]  }
 0x268   :  { %4885 = vmatpush1.bf16.msra.mxu1 %v6510_v43 }
 0x269   :  { %4930 = vmatpush1.bf16.msra.mxu0 %v6513_v19  ;;  %4886 = vmatprep.subr.bf16.mxu1 %v6518_v47  ;;  %v6642_v47 = vld [vmem:[%s9167_s5 + $0x70] ss:$8 sps:$4 sm:$0xff]  }
 0x26a   :  { %4931 = vmatprep.subr.bf16.mxu0 %v6521_v44 }
 0x26c   :  { %4887 = vmatpush1.bf16.msra.mxu1 %v6516_v48 }
 0x26d   :  { %4932 = vmatpush1.bf16.msra.mxu0 %v6519_v52  ;;  %4888 = vmatprep.subr.bf16.mxu1 %v6524_v53  ;;  %v6588_v52 = vld [vmem:[%s9166_s3 + $0x328] ss:$16 sps:$4 sm:$0xff]  }
 0x26e   :  { %4933 = vmatprep.subr.bf16.mxu0 %v6527_v58  ;;  %v6647_v58 = vld [vmem:[%s9167_s5 + $0x64] ss:$8 sps:$4 sm:$0xff]  }
 0x270   :  { %4889 = vmatpush1.bf16.msra.mxu1 %v6522_v55 }
 0x271   :  { %4934 = vmatpush1.bf16.msra.mxu0 %v6525_v26  ;;  %4890 = vmatprep.subr.bf16.mxu1 %v6530_v60 }
 0x272   :  { %4935 = vmatprep.subr.bf16.mxu0 %v6533_v57  ;;  %v6593_v57 = vld [vmem:[%s9166_s3 + $0x30c] ss:$16 sps:$4 sm:$0xff]  }
 0x274   :  { %4891 = vmatpush1.bf16.msra.mxu1 %v6528_v61 }
 0x275   :  { %4936 = vmatpush1.bf16.msra.mxu0 %v6531_v16  ;;  %4892 = vmatprep.subr.bf16.mxu1 %v6536_v0 }
 0x276   :  { %4937 = vmatprep.subr.bf16.mxu0 %v6539_v63  ;;  %v6645_v63 = vld [vmem:[%s9167_s5 + $0x60] ss:$8 sps:$4 sm:$0xff]  }
 0x278   :  { %4893 = vmatpush1.bf16.msra.mxu1 %v6534_v1  ;;  %v6591_v1 = vld [vmem:[%s9166_s3 + $0x308] ss:$16 sps:$4 sm:$0xff]  }
 0x279   :  { %4938 = vmatpush1.bf16.msra.mxu0 %v6537_v2  ;;  %4894 = vmatprep.subr.bf16.mxu1 %v6542_v4  ;;  %v6650_v2 = vld [vmem:[%s9167_s5 + $0x54] ss:$8 sps:$4 sm:$0xff]  }
 0x27a   :  { %4939 = vmatprep.subr.bf16.mxu0 %v6545_v5  ;;  %v6596_v4 = vld [vmem:[%s9166_s3 + $0x6ec] ss:$16 sps:$4 sm:$0xff]   ;;  %v6648_v5 = vld [vmem:[%s9167_s5 + $0x50] ss:$8 sps:$4 sm:$0xff]  }
 0x27c   :  { %4895 = vmatpush1.bf16.msra.mxu1 %v6540_v6  ;;  %v6599_v6 = vld [vmem:[%s9166_s3 + $0x6cc] ss:$16 sps:$4 sm:$0xff]  }
 0x27d   :  { %4940 = vmatpush2.bf16.msra.mxu0 %v6543_v37  ;;  %4896 = vmatprep.subr.bf16.mxu1 %v6548_v27  ;;  %v6594_v37 = vld [vmem:[%s9166_s3 + $0x6e8] ss:$16 sps:$4 sm:$0xff]  }
 0x27e   :  { %4941 = vmatprep.subr.bf16.mxu0 %v6551_v30  ;;  %v6653_v30 = vld [vmem:[%s9167_s5 + $0x44] ss:$8 sps:$4 sm:$0xff]   ;;  %v6651_v27 = vld [vmem:[%s9167_s5 + $0x40] ss:$8 sps:$4 sm:$0xff]  }
 0x280   :  { %4897 = vmatpush1.bf16.msra.mxu1 %v6546_v8  ;;  %v6656_v8 = vld [vmem:[%s9167_s5 + $0x34] ss:$8 sps:$4 sm:$0xff]  }
 0x281   :  { %4942 = vmatpush2.bf16.msra.mxu0 %v6549_v7  ;;  %4898 = vmatprep.subr.bf16.mxu1 %v6554_v10  ;;  %v6597_v7 = vld [vmem:[%s9166_s3 + $0x6c8] ss:$16 sps:$4 sm:$0xff]   ;;  %v6659_v10 = vld [vmem:[%s9167_s5 + $0x24] ss:$8 sps:$4 sm:$0xff]  }
 0x282   :  { %4943 = vmatprep.subr.bf16.mxu0 %v6557_v9  ;;  %v6654_v9 = vld [vmem:[%s9167_s5 + $0x30] ss:$8 sps:$4 sm:$0xff]  }
 0x284   :  { %4899 = vmatpush2.bf16.msra.mxu1 %v6552_v34  ;;  %v6657_v34 = vld [vmem:[%s9167_s5 + $0x20] ss:$8 sps:$4 sm:$0xff]  }
 0x285   :  { %4944 = vmatpush2.bf16.msra.mxu0 %v6555_v33  ;;  %4900 = vmatprep.subr.bf16.mxu1 %v6560_v38  ;;  %v6605_v33 = vld [vmem:[%s9166_s3 + $0x68c] ss:$16 sps:$4 sm:$0xff]  }
 0x286   :  { %4945 = vmatprep.subr.bf16.mxu0 %v6563_v11  ;;  %v6603_v11 = vld [vmem:[%s9166_s3 + $0x688] ss:$16 sps:$4 sm:$0xff]   ;;  %v6662_v38 = vld [vmem:[%s9167_s5 + $0x14] ss:$8 sps:$4 sm:$0xff]  }
 0x288   :  { %4901 = vmatpush2.bf16.msra.mxu1 %v6558_v13  ;;  %v6660_v13 = vld [vmem:[%s9167_s5 + $0x10] ss:$8 sps:$4 sm:$0xff]  }
 0x289   :  { %4946 = vmatpush2.bf16.msra.mxu0 %v6561_v12  ;;  %4902 = vmatprep.subr.bf16.mxu1 %v6566_v31  ;;  %v6608_v12 = vld [vmem:[%s9166_s3 + $0x66c] ss:$16 sps:$4 sm:$0xff]  }
 0x28a   :  { %4947 = vmatprep.subr.bf16.mxu0 %v6569_v29  ;;  %v6606_v29 = vld [vmem:[%s9166_s3 + $0x668] ss:$16 sps:$4 sm:$0xff]   ;;  %v6665_v31 = vld [vmem:[%s9167_s5 + $0x4] ss:$8 sps:$4 sm:$0xff]  }
 0x28c   :  { %4903 = vmatpush2.bf16.msra.mxu1 %v6564_v15  ;;  %v6663_v15 = vld [vmem:[%s9167_s5] ss:$8 sps:$4 sm:$0xff]  }
 0x28d   :  { %4948 = vmatpush2.bf16.msra.mxu0 %v6567_v14  ;;  %4904 = vmatprep.subr.bf16.mxu1 %v6572_v20  ;;  %v6611_v14 = vld [vmem:[%s9166_s3 + $0x64c] ss:$16 sps:$4 sm:$0xff]  }
 0x28e   :  { %4949 = vmatprep.subr.bf16.mxu0 %v6575_v17  ;;  %v6609_v17 = vld [vmem:[%s9166_s3 + $0x648] ss:$16 sps:$4 sm:$0xff]   ;;  %v6668_v20 = vld [vmem:[%s9167_s5 + $0xf4] ss:$8 sps:$4 sm:$0xff]  }
 0x290   :  { %4905 = vmatpush2.bf16.msra.mxu1 %v6570_v56  ;;  %v6666_v56 = vld [vmem:[%s9167_s5 + $0xf0] ss:$8 sps:$4 sm:$0xff]  }
 0x291   :  { %4950 = vmatpush2.bf16.msra.mxu0 %v6573_v49  ;;  %4906 = vmatprep.subr.bf16.mxu1 %v6578_v40  ;;  %v6614_v49 = vld [vmem:[%s9166_s3 + $0x62c] ss:$16 sps:$4 sm:$0xff]  }
 0x292   :  { %4951 = vmatprep.subr.bf16.mxu0 %v6581_v50  ;;  %v6612_v50 = vld [vmem:[%s9166_s3 + $0x628] ss:$16 sps:$4 sm:$0xff]   ;;  %v6671_v40 = vld [vmem:[%s9167_s5 + $0xe4] ss:$8 sps:$4 sm:$0xff]  }
 0x294   :  { %4907 = vmatpush2.bf16.msra.mxu1 %v6576_v24  ;;  %v6669_v24 = vld [vmem:[%s9167_s5 + $0xe0] ss:$8 sps:$4 sm:$0xff]  }
 0x295   :  { %4952 = vmatpush2.bf16.msra.mxu0 %v6579_v54  ;;  %4908 = vmatprep.subr.bf16.mxu1 %v6584_v23  ;;  %v6617_v54 = vld [vmem:[%s9166_s3 + $0x60c] ss:$16 sps:$4 sm:$0xff]  }
 0x296   :  { %4953 = vmatprep.subr.bf16.mxu0 %v6587_v32  ;;  %v6615_v32 = vld [vmem:[%s9166_s3 + $0x608] ss:$16 sps:$4 sm:$0xff]   ;;  %v6674_v23 = vld [vmem:[%s9167_s5 + $0xd4] ss:$8 sps:$4 sm:$0xff]  }
 0x297   :  { %v4752_v44 = vpop.f32.mrf.mxu1 }
 0x298   :  { %v4711_v43 = vpop.f32.mrf.mxu0  ;;  %4909 = vmatpush2.bf16.msra.mxu1 %v6582_v42  ;;  %v6618_v42 = vld [vmem:[%s9166_s3 + $0x7e8] ss:$16 sps:$4 sm:$0xff]  }
 0x299   :  { %v4712_v19 = vadd.f32 %v4711_v43, %v3380_v35  ;;  %4954 = vmatpush2.bf16.msra.mxu0 %v6585_v36  ;;  %v4754_v26 = vpop.f32.mrf.mxu1  ;;  %4910 = vmatprep.subr.bf16.mxu1 %v6590_v41  ;;  %v6620_v35 = vld [vmem:[%s9166_s3 + $0x7ec] ss:$16 sps:$4 sm:$0xff]   ;;  %v6672_v36 = vld [vmem:[%s9167_s5 + $0xd0] ss:$8 sps:$4 sm:$0xff]   ;;  %v6675_v41 = vld [vmem:[%s9167_s5 + $0xc0] ss:$8 sps:$4 sm:$0xff]  }
 0x29a   :  { %v4713_v48 = vpop.f32.mrf.mxu0  ;;  %5409 = vmatprep.subr.bf16.mxu0 %v6644_v28  ;;  %v6677_v28 = vld [vmem:[%s9167_s5 + $0xc4] ss:$8 sps:$4 sm:$0xff]   ;;  %v6621_v43 = vld [vmem:[%s9166_s3 + $0x7c8] ss:$16 sps:$4 sm:$0xff]  }
 0x29b   :  { %v8839_v53 = vadd.f32 %v4752_v44, %v4712_v19  ;;  %v4714_v55 = vadd.f32 %v4713_v48, %v3384_v39  ;;  %v4756_v16 = vpop.f32.mrf.mxu1  ;;  %v6623_v39 = vld [vmem:[%s9166_s3 + $0x7cc] ss:$16 sps:$4 sm:$0xff]   ;;  %v6624_v48 = vld [vmem:[%s9166_s3 + $0x7a8] ss:$16 sps:$4 sm:$0xff]  }
 0x29c   :  { %v4715_v60 = vpop.f32.mrf.mxu0  ;;  %4956 = vmatmul.mubr.bf16.vlgmr.msra.gmra.mxu0 %v8526_v22  ;;  %4911 = vmatpush2.bf16.msra.mxu1 %v6588_v52  ;;  %v6680_v19 = vld [vmem:[%s9167_s5 + $0xb4] ss:$8 sps:$4 sm:$0xff]   ;;  %v6683_v52 = vld [vmem:[%s9167_s5 + $0xa4] ss:$8 sps:$4 sm:$0xff]   ;;  %v6684_v16 = vld [vmem:[%s9167_s5 + $0x90] ss:$8 sps:$4 sm:$0xff]  }
 0x29d   :  { %v8845_v61 = vadd.f32 %v4754_v26, %v4714_v55  ;;  %5410 = vmatpush1.bf16.msra.mxu0 %v6642_v47  ;;  %v4757_v22 = vpop.f32.mrf.mxu1  ;;  %4912 = vmatprep.subr.bf16.mxu1 %v6593_v57  ;;  %v6626_v44 = vld [vmem:[%s9166_s3 + $0x7ac] ss:$16 sps:$4 sm:$0xff]   ;;  %v6678_v47 = vld [vmem:[%s9167_s5 + $0xb0] ss:$8 sps:$4 sm:$0xff]   ;;  %v6681_v55 = vld [vmem:[%s9167_s5 + $0xa0] ss:$8 sps:$4 sm:$0xff]  }
 0x29e   :  { %v4716_v0 = vpop.f32.mrf.mxu0  ;;  %5411 = vmatprep.subr.bf16.mxu0 %v6647_v58  ;;  %v6629_v58 = vld [vmem:[%s9166_s3 + $0x78c] ss:$16 sps:$4 sm:$0xff]   ;;  %v6627_v26 = vld [vmem:[%s9166_s3 + $0x788] ss:$16 sps:$4 sm:$0xff]  }
 0x29f   :  { %v6686_v57 = vld [vmem:[%s9167_s5 + $0x94] ss:$8 sps:$4 sm:$0xff]   ;;  %v6689_v0 = vld [vmem:[%s9167_s5 + $0x84] ss:$8 sps:$4 sm:$0xff]   ;;  %v6633_v22 = vld [vmem:[%s9166_s3 + $0x748] ss:$16 sps:$4 sm:$0xff]  }
 0x2a0   :  { %4913 = vmatpush2.bf16.msra.mxu1 %v6591_v1  ;;  %v6632_v60 = vld [vmem:[%s9166_s3 + $0x76c] ss:$16 sps:$4 sm:$0xff]  }
 0x2a1   :  { %5412 = vmatpush1.bf16.msra.mxu0 %v6645_v63  ;;  %4964 = vmatprep.subr.bf16.mxu1 %v6596_v4  ;;  %v6630_v63 = vld [vmem:[%s9166_s3 + $0x768] ss:$16 sps:$4 sm:$0xff]   ;;  %v6635_v1 = vld [vmem:[%s9166_s3 + $0x74c] ss:$16 sps:$4 sm:$0xff]  }
 0x2a2   :  { %5413 = vmatprep.subr.bf16.mxu0 %v6650_v2  ;;  %v6687_v2 = vld [vmem:[%s9167_s5 + $0x80] ss:$8 sps:$4 sm:$0xff]   ;;  %v6638_v4 = vld [vmem:[%s9166_s3 + $0x72c] ss:$16 sps:$4 sm:$0xff]  }
 0x2a3   :  { %4915 = vmatmul.mubr.bf16.vlgmr.msra.gmra.mxu1 %v8318_v46  ;;  %v6602_v46 = vld [vmem:[%s9166_s3 + $0x6ac] ss:$16 sps:$4 sm:$0xff]  }
 0x2a4   :  { %4965 = vmatpush1.bf16.msra.mxu1 %v6594_v37  ;;  %4996 = vmatprep.mubr.bf16.mxu1 %v8649_v18  ;;  %v6600_v18 = vld [vmem:[%s9166_s3 + $0x6a8] ss:$16 sps:$4 sm:$0xff]   ;;  %v6641_v37 = vld [vmem:[%s9166_s3 + $0x70c] ss:$16 sps:$4 sm:$0xff]  }
 0x2a5   :  { %5414 = vmatpush1.bf16.msra.mxu0 %v6648_v5  ;;  %4966 = vmatprep.subr.bf16.mxu1 %v6599_v6  ;;  %v6636_v5 = vld [vmem:[%s9166_s3 + $0x728] ss:$16 sps:$4 sm:$0xff]  }
 0x2a6   :  { %5415 = vmatprep.subr.bf16.mxu0 %v6653_v30 }
 0x2a8   :  { %4967 = vmatpush1.bf16.msra.mxu1 %v6597_v7  ;;  %v6639_v7 = vld [vmem:[%s9166_s3 + $0x708] ss:$16 sps:$4 sm:$0xff]  }
 0x2a9   :  { %5416 = vmatpush1.bf16.msra.mxu0 %v6651_v27  ;;  %4968 = vmatprep.subr.bf16.mxu1 %v6602_v46 }
 0x2aa   :  { %5417 = vmatprep.subr.bf16.mxu0 %v6656_v8 }
 0x2ac   :  { %4969 = vmatpush1.bf16.msra.mxu1 %v6600_v18  ;;  %v6692_v18 = vld [vmem:[%s9167_s5 + $0x174] ss:$8 sps:$4 sm:$0xff]  }
 0x2ad   :  { %5418 = vmatpush1.bf16.msra.mxu0 %v6654_v9  ;;  %4970 = vmatprep.subr.bf16.mxu1 %v6605_v33  ;;  %v6696_v33 = vld [vmem:[%s9167_s5 + $0x150] ss:$8 sps:$4 sm:$0xff]  }
 0x2ae   :  { %5419 = vmatprep.subr.bf16.mxu0 %v6659_v10  ;;  %v6695_v10 = vld [vmem:[%s9167_s5 + $0x164] ss:$8 sps:$4 sm:$0xff]  }
 0x2b0   :  { %4971 = vmatpush1.bf16.msra.mxu1 %v6603_v11  ;;  %v6699_v11 = vld [vmem:[%s9167_s5 + $0x140] ss:$8 sps:$4 sm:$0xff]  }
 0x2b1   :  { %5420 = vmatpush1.bf16.msra.mxu0 %v6657_v34  ;;  %4972 = vmatprep.subr.bf16.mxu1 %v6608_v12  ;;  %v6701_v34 = vld [vmem:[%s9167_s5 + $0x144] ss:$8 sps:$4 sm:$0xff]   ;;  %v6702_v12 = vld [vmem:[%s9167_s5 + $0x130] ss:$8 sps:$4 sm:$0xff]  }
 0x2b2   :  { %5421 = vmatprep.subr.bf16.mxu0 %v6662_v38  ;;  %v6704_v38 = vld [vmem:[%s9167_s5 + $0x134] ss:$8 sps:$4 sm:$0xff]  }
 0x2b4   :  { %4973 = vmatpush1.bf16.msra.mxu1 %v6606_v29  ;;  %v6705_v29 = vld [vmem:[%s9167_s5 + $0x120] ss:$8 sps:$4 sm:$0xff]  }
 0x2b5   :  { %5422 = vmatpush1.bf16.msra.mxu0 %v6660_v13  ;;  %4974 = vmatprep.subr.bf16.mxu1 %v6611_v14  ;;  %v6707_v13 = vld [vmem:[%s9167_s5 + $0x124] ss:$8 sps:$4 sm:$0xff]   ;;  %v6708_v14 = vld [vmem:[%s9167_s5 + $0x110] ss:$8 sps:$4 sm:$0xff]  }
 0x2b6   :  { %5423 = vmatprep.subr.bf16.mxu0 %v6665_v31  ;;  %v6710_v31 = vld [vmem:[%s9167_s5 + $0x114] ss:$8 sps:$4 sm:$0xff]  }
 0x2b8   :  { %4975 = vmatpush1.bf16.msra.mxu1 %v6609_v17  ;;  %v6711_v17 = vld [vmem:[%s9167_s5 + $0x100] ss:$8 sps:$4 sm:$0xff]  }
 0x2b9   :  { %5424 = vmatpush1.bf16.msra.mxu0 %v6663_v15  ;;  %4976 = vmatprep.subr.bf16.mxu1 %v6614_v49  ;;  %v6713_v15 = vld [vmem:[%s9167_s5 + $0x104] ss:$8 sps:$4 sm:$0xff]   ;;  %v6714_v49 = vld [vmem:[%s9167_s5 + $0x1f0] ss:$8 sps:$4 sm:$0xff]  }
 0x2ba   :  { %5425 = vmatprep.subr.bf16.mxu0 %v6668_v20  ;;  %v6716_v20 = vld [vmem:[%s9167_s5 + $0x1f4] ss:$8 sps:$4 sm:$0xff]  }
 0x2bc   :  { %4977 = vmatpush1.bf16.msra.mxu1 %v6612_v50  ;;  %v6717_v50 = vld [vmem:[%s9167_s5 + $0x1e0] ss:$8 sps:$4 sm:$0xff]  }
 0x2bd   :  { %5426 = vmatpush2.bf16.msra.mxu0 %v6666_v56  ;;  %4978 = vmatprep.subr.bf16.mxu1 %v6617_v54  ;;  %v6719_v56 = vld [vmem:[%s9167_s5 + $0x1e4] ss:$8 sps:$4 sm:$0xff]   ;;  %v6720_v54 = vld [vmem:[%s9167_s5 + $0x1d0] ss:$8 sps:$4 sm:$0xff]  }
 0x2be   :  { %5427 = vmatprep.subr.bf16.mxu0 %v6671_v40  ;;  %v6722_v40 = vld [vmem:[%s9167_s5 + $0x1d4] ss:$8 sps:$4 sm:$0xff]  }
 0x2c0   :  { %4979 = vmatpush1.bf16.msra.mxu1 %v6615_v32  ;;  %v6723_v32 = vld [vmem:[%s9167_s5 + $0x1c0] ss:$8 sps:$4 sm:$0xff]  }
 0x2c1   :  { %5428 = vmatpush2.bf16.msra.mxu0 %v6669_v24  ;;  %4980 = vmatprep.subr.bf16.mxu1 %v6620_v35  ;;  %v6725_v24 = vld [vmem:[%s9167_s5 + $0x1c4] ss:$8 sps:$4 sm:$0xff]   ;;  %v6726_v35 = vld [vmem:[%s9167_s5 + $0x1b0] ss:$8 sps:$4 sm:$0xff]  }
 0x2c2   :  { %5429 = vmatprep.subr.bf16.mxu0 %v6674_v23  ;;  %v6728_v23 = vld [vmem:[%s9167_s5 + $0x1b4] ss:$8 sps:$4 sm:$0xff]  }
 0x2c4   :  { %4981 = vmatpush2.bf16.msra.mxu1 %v6618_v42 }
 0x2c5   :  { %5430 = vmatpush2.bf16.msra.mxu0 %v6672_v36  ;;  %4982 = vmatprep.subr.bf16.mxu1 %v6623_v39  ;;  %v6731_v36 = vld [vmem:[%s9167_s5 + $0x1a4] ss:$8 sps:$4 sm:$0xff]   ;;  %v6729_v39 = vld [vmem:[%s9167_s5 + $0x1a0] ss:$8 sps:$4 sm:$0xff]  }
 0x2c6   :  { %5431 = vmatprep.subr.bf16.mxu0 %v6677_v28 }
 0x2c8   :  { %4983 = vmatpush2.bf16.msra.mxu1 %v6621_v43 }
 0x2c9   :  { %5432 = vmatpush2.bf16.msra.mxu0 %v6675_v41  ;;  %4984 = vmatprep.subr.bf16.mxu1 %v6626_v44  ;;  %v6734_v44 = vld [vmem:[%s9167_s5 + $0x194] ss:$8 sps:$4 sm:$0xff]  }
 0x2ca   :  { %5433 = vmatprep.subr.bf16.mxu0 %v6680_v19 }
 0x2cc   :  { %4985 = vmatpush2.bf16.msra.mxu1 %v6624_v48  ;;  %v6732_v48 = vld [vmem:[%s9167_s5 + $0x190] ss:$8 sps:$4 sm:$0xff]  }
 0x2cd   :  { %5434 = vmatpush2.bf16.msra.mxu0 %v6678_v47  ;;  %4986 = vmatprep.subr.bf16.mxu1 %v6629_v58 }
 0x2ce   :  { %5435 = vmatprep.subr.bf16.mxu0 %v6683_v52 }
 0x2d0   :  { %4987 = vmatpush2.bf16.msra.mxu1 %v6627_v26 }
 0x2d1   :  { %5436 = vmatpush2.bf16.msra.mxu0 %v6681_v55  ;;  %4988 = vmatprep.subr.bf16.mxu1 %v6632_v60 }
 0x2d2   :  { %5437 = vmatprep.subr.bf16.mxu0 %v6686_v57  ;;  %v6737_v57 = vld [vmem:[%s9167_s5 + $0x184] ss:$8 sps:$4 sm:$0xff]  }
 0x2d4   :  { %4989 = vmatpush2.bf16.msra.mxu1 %v6630_v63 }
 0x2d5   :  { %5438 = vmatpush2.bf16.msra.mxu0 %v6684_v16  ;;  %4990 = vmatprep.subr.bf16.mxu1 %v6635_v1  ;;  %v6735_v16 = vld [vmem:[%s9167_s5 + $0x180] ss:$8 sps:$4 sm:$0xff]  }
 0x2d6   :  { %5439 = vmatprep.subr.bf16.mxu0 %v6689_v0 }
 0x2d8   :  { %4991 = vmatpush2.bf16.msra.mxu1 %v6633_v22 }
 0x2d9   :  { %5440 = vmatpush2.bf16.msra.mxu0 %v6687_v2  ;;  %4992 = vmatprep.subr.bf16.mxu1 %v6638_v4  ;;  %v3388_v4 = vrot.slane %v8806_v25, %v8040_v21 }
 0x2dc   :  { %v4793_v6 = vpop.f32.mrf.mxu0  ;;  %4993 = vmatpush2.bf16.msra.mxu1 %v6636_v5 }
 0x2dd   :  { %v9033_v30 = vadd.f32 %v4793_v6, %v8839_v53  ;;  %4994 = vmatprep.subr.bf16.mxu1 %v6641_v37  ;;  %v6690_v53 = vld [vmem:[%s9167_s5 + $0x170] ss:$8 sps:$4 sm:$0xff]   ;;  %v3392_v37 = vrot.slane %v8806_v25, %v457_v45 }
 0x2de   :  { %v4795_v27 = vpop.f32.mrf.mxu0 }
 0x2df   :  { %v9039_v8 = vadd.f32 %v4795_v27, %v8845_v61  ;;  %v6693_v61 = vld [vmem:[%s9167_s5 + $0x160] ss:$8 sps:$4 sm:$0xff]  }
 0x2e0   :  { %v4797_v46 = vpop.f32.mrf.mxu0  ;;  %4995 = vmatpush2.bf16.msra.mxu1 %v6639_v7 }
 0x2e1   :  { %5450 = vmatprep.subr.bf16.mxu1 %v6692_v18 }
 0x2e2   :  { %v4798_v9 = vpop.f32.mrf.mxu0 }
 0x2e3   :  { %4997 = vmatmul.mubr.bf16.vlgmr.msra.gmra.mxu1 %v8654_v59  ;;  %v6698_v59 = vld [vmem:[%s9167_s5 + $0x154] ss:$8 sps:$4 sm:$0xff]  }
 0x2e4   :  { %5451 = vmatpush1.bf16.msra.mxu1 %v6690_v53 }
 0x2e5   :  { %5452 = vmatprep.subr.bf16.mxu1 %v6695_v10 }
 0x2e8   :  { %5453 = vmatpush1.bf16.msra.mxu1 %v6693_v61 }
 0x2e9   :  { %5454 = vmatprep.subr.bf16.mxu1 %v6698_v59 }
 0x2ec   :  { %5455 = vmatpush1.bf16.msra.mxu1 %v6696_v33 }
 0x2ed   :  { %5456 = vmatprep.subr.bf16.mxu1 %v6701_v34 }
 0x2f0   :  { %5457 = vmatpush1.bf16.msra.mxu1 %v6699_v11 }
 0x2f1   :  { %5458 = vmatprep.subr.bf16.mxu1 %v6704_v38 }
 0x2f4   :  { %5459 = vmatpush1.bf16.msra.mxu1 %v6702_v12 }
 0x2f5   :  { %5460 = vmatprep.subr.bf16.mxu1 %v6707_v13 }
 0x2f8   :  { %5461 = vmatpush1.bf16.msra.mxu1 %v6705_v29 }
 0x2f9   :  { %5462 = vmatprep.subr.bf16.mxu1 %v6710_v31 }
 0x2fc   :  { %5463 = vmatpush1.bf16.msra.mxu1 %v6708_v14 }
 0x2fd   :  { %5464 = vmatprep.subr.bf16.mxu1 %v6713_v15 }
 0x300   :  { %5465 = vmatpush1.bf16.msra.mxu1 %v6711_v17  ;;  %v14_v17 = vstv %s9169_s8 }
 0x301   :  { %5466 = vmatprep.subr.bf16.mxu1 %v6716_v20  ;;  %15 = vst [vmem:[#allocation2] sm:$0x1] %v14_v17  ;;  %v5077_v20 = vld [vmem:[%s9170_s6] sm:$0x3] }
 0x304   :  { %5467 = vmatpush2.bf16.msra.mxu1 %v6714_v49  ;;  %v5493_v49 = vld [vmem:[%s9171_s7] sm:$0x3] }
 0x305   :  { %5468 = vmatprep.subr.bf16.mxu1 %v6719_v56  ;;  %v5082_v56 = vrot.slane %v5077_v20, %v7620_v62 }
 0x308   :  { %5469 = vmatpush2.bf16.msra.mxu1 %v6717_v50  ;;  %v5494_v50 = vunpack.c.l.bf16 %v5493_v49 }
 0x309   :  { %5470 = vmatprep.subr.bf16.mxu1 %v6722_v40  ;;  %v5086_v40 = vrot.slane %v5077_v20, %v7626_v3 }
 0x30c   :  { %5471 = vmatpush2.bf16.msra.mxu1 %v6720_v54 }
 0x30d   :  { %5472 = vmatprep.subr.bf16.mxu1 %v6725_v24  ;;  %v5499_v24 = vrot.slane %v5494_v50, %v7620_v62 }
 0x310   :  { %5473 = vmatpush2.bf16.msra.mxu1 %v6723_v32  ;;  %v5503_v32 = vrot.slane %v5494_v50, %v8040_v21 }
 0x311   :  { %5474 = vmatprep.subr.bf16.mxu1 %v6728_v23 }
 0x314   :  { %5475 = vmatpush2.bf16.msra.mxu1 %v6726_v35 }
 0x315   :  { %5476 = vmatprep.subr.bf16.mxu1 %v6731_v36 }
 0x318   :  { %5477 = vmatpush2.bf16.msra.mxu1 %v6729_v39 }
 0x319   :  { %5478 = vmatprep.subr.bf16.mxu1 %v6734_v44 }
 0x31c   :  { %v4875_v42 = vpop.f32.mrf.mxu0  ;;  %5479 = vmatpush2.bf16.msra.mxu1 %v6732_v48 }
 0x31d   :  { %5480 = vmatprep.subr.bf16.mxu1 %v6737_v57 }
 0x31e   :  { %v4877_v28 = vpop.f32.mrf.mxu0 }
 0x31f   :  { %v4878_v7 = vadd.f32 %v4877_v28, %v3392_v37 }
 0x320   :  { %v4879_v41 = vpop.f32.mrf.mxu0  ;;  %5481 = vmatpush2.bf16.msra.mxu1 %v6735_v16 }
 0x321   :  { %v5509_v41 = vrot.slane %v5499_v24, %v7620_v62 }
 0x322   :  { %v4880_v43 = vpop.f32.mrf.mxu0 }
 0x323   :  { %v4834_v19 = vpop.f32.mrf.mxu1  ;;  %v5513_v43 = vrot.slane %v5503_v32, %v7620_v62 }
 0x324   :  { %v4835_v47 = vadd.f32 %v4834_v19, %v9033_v30  ;;  %v4876_v30 = vadd.f32 %v4875_v42, %v3388_v4 }
 0x325   :  { %v4836_v52 = vpop.f32.mrf.mxu1 }
 0x326   :  { %v4837_v58 = vadd.f32 %v4836_v52, %v9039_v8  ;;  %v5005_v55 = vmax.f32 %v4835_v47, 0.0 }
 0x327   :  { %v4838_v26 = vpop.f32.mrf.mxu1 }
 0x328   :  { %v5006_v60 = vmax.f32 %v4837_v58, 0.0  ;;  %v5009_v1 = vpack.c.bf16 %v5005_v55, %v5005_v55  ;;  %v6255_v58 = vld [vmem:[#allocation2] ss:$0 sm:$0xff] }
 0x329   :  { %v4839_v63 = vpop.f32.mrf.mxu1 }
 0x32a   :  { %v5010_v0 = vpack.c.bf16 %v5006_v60, %v5006_v60 }
 0x32c   :  { %5441 = vmatprep.mubr.bf16.mxu0 %v5010_v0 }
 0x32d   :  { %5442 = vmatmul.mubr.bf16.vlgmr.msra.gmra.mxu0 %v5009_v1 }
 0x35c   :  { %v4957_v2 = vpop.f32.mrf.mxu0 }
 0x35e   :  { %v4959_v22 = vpop.f32.mrf.mxu0 }
 0x360   :  { %v4961_v5 = vpop.f32.mrf.mxu0 }
 0x362   :  { %v4962_v6 = vpop.f32.mrf.mxu0 }
 0x363   :  { %v4916_v27 = vpop.f32.mrf.mxu1 }
 0x364   :  { %v4917_v8 = vadd.f32 %v4916_v27, %v4876_v30 }
 0x365   :  { %v4918_v46 = vpop.f32.mrf.mxu1 }
 0x366   :  { %v4919_v9 = vadd.f32 %v4918_v46, %v4878_v7  ;;  %v4958_v53 = vadd.f32 %v4957_v2, %v4917_v8 }
 0x367   :  { %v4920_v18 = vpop.f32.mrf.mxu1 }
 0x368   :  { %v4960_v10 = vadd.f32 %v4959_v22, %v4919_v9 }
 0x369   :  { %v4921_v61 = vpop.f32.mrf.mxu1 }
 0x3a3   :  { %v4998_v59 = vpop.f32.mrf.mxu1 }
 0x3a4   :  { %v4999_v33 = vadd.f32 %v4998_v59, %v4958_v53 }
 0x3a5   :  { %v5000_v34 = vpop.f32.mrf.mxu1 }
 0x3a6   :  { %v5001_v11 = vadd.f32 %v5000_v34, %v4960_v10  ;;  %v5007_v38 = vmax.f32 %v4999_v33, 0.0 }
 0x3a7   :  { %v5002_v12 = vpop.f32.mrf.mxu1 }
 0x3a8   :  { %v5008_v51 = vmax.f32 %v5001_v11, 0.0  ;;  %v5011_v25 = vpack.c.bf16 %v5007_v38, %v5007_v38 }
 0x3a9   :  { %v5003_v13 = vpop.f32.mrf.mxu1 }
 0x3aa   :  { %v5012_v45 = vpack.c.bf16 %v5008_v51, %v5008_v51 }
 0x3ac   :  { %5482 = vmatprep.mubr.bf16.mxu1 %v5012_v45 }
 0x3ad   :  { %5483 = vmatmul.mubr.bf16.vlgmr.msra.gmra.mxu1 %v5011_v25 }
 0x3ed   :  { %v5443_v29 = vpop.f32.mrf.mxu0 }
 0x3ee   :  { %v5444_v54 = vadd.f32 %v5443_v29, %v5082_v56 }
 0x3ef   :  { %v5445_v31 = vpop.f32.mrf.mxu0 }
 0x3f0   :  { %v5446_v35 = vadd.f32 %v5445_v31, %v5086_v40 }
 0x3f1   :  { %v5447_v14 = vpop.f32.mrf.mxu0 }
 0x3f3   :  { %v5448_v15 = vpop.f32.mrf.mxu0 }
 0x46d   :  { %v5484_v23 = vpop.f32.mrf.mxu1 }
 0x46e   :  { %v5485_v36 = vadd.f32 %v5484_v23, %v5444_v54 }
 0x46f   :  { %v5486_v42 = vpop.f32.mrf.mxu1 }
 0x470   :  { %v5491_v28 = vmax.f32 %v5485_v36, 0.0  ;;  %v5487_v39 = vadd.f32 %v5486_v42, %v5446_v35 }
 0x471   :  { %v5488_v19 = vpop.f32.mrf.mxu1 }
 0x472   :  { %v5492_v44 = vmax.f32 %v5487_v39, 0.0  ;;  %v5514_v48 = vmul.f32 %v5509_v41, %v5491_v28 }
 0x473   :  { %v5489_v47 = vpop.f32.mrf.mxu1 }
 0x474   :  { %v5515_v3 = vmul.f32 %v5513_v43, %v5492_v44 }
 0x476   :  { %v5516_v52 = vadd.f32 %v5515_v3, %v5514_v48 }
 0x478   :  { %5517 = vadd.xlane.f32.xlu0 %v5516_v52 }
 0x501   :  { %v5518_v55 = vpop.xlane.xlu0 %5517 }
 0x502   :  { %v5526_v21 = vadd.f32 %v6255_v58, %v5518_v55 }
 0x504   :  { %v6256_v26 = vmul.f32 -1.442695, %v5526_v21 }
 0x506   :  { %6738 = vpow2.f32 %v6256_v26 }
 0x513   :  { %v6739_v57 = vpop.eup %6738 }
 0x514   :  { %v5530_v60 = vadd.f32 1.0, %v6739_v57 }
 0x516   :  { %6740 = vrcp.f32 %v5530_v60 }
 0x523   :  { %v6741_v16 = vpop.eup %6740 }
 0x524   :  { %5534 = vst.msk [vmem:[%s9172_s9] sm:$0xff] %vm5533_vm1, %v6741_v16 }

</bundles_post_ra>
